<compile_context>
chip_gen: v7x
topology: tpu7x:2x2x1
jax: 0.10.0
libtpu: 0.0.40
codegen_flags: <defaults>
</compile_context>

<pallas_src>
import functools
import math

import jax
import jax.numpy as jnp
from jax.experimental import pallas as pl
from jax.experimental.pallas import tpu as pltpu


# --------------------------------------------------------------------------
# Fused decoder-layer kernel.  Grid = (batch,), everything else resident.
# --------------------------------------------------------------------------
def _decoder_layer_kernel(dec_ref, glob_ref, det_ref,
                          self_bias_ref, enc_bias_ref,
                          wq_ref, wk_ref, wv_ref, wo_ref,
                          bq_ref, bk_ref, bv_ref, bo_ref,
                          gamma_ref, beta_ref,
                          lwd_ref, lwg_ref, lb_ref,
                          o_ref, ctx_ref, *, n_heads):
    d_model = dec_ref.shape[-1]
    dh = d_model // n_heads

    dec_in = dec_ref[...]                             # (Sq, D) f32 (kept f32 for residual)
    dec_b16 = dec_in.astype(jnp.bfloat16)
    glob_b16 = glob_ref[...].astype(jnp.bfloat16)     # (Sk, D)
    det_b16 = det_ref[...].astype(jnp.bfloat16)       # (Sk, D)
    self_bias = self_bias_ref[...]                    # (Sq, Sq) f32 additive bias
    enc_bias = enc_bias_ref[...]                      # (Sq, Sk) f32 additive bias

    def mha(a, xq_f32, xq_b16, xkv_b16, bias):
        """One MultiHeadAttention block (index a) + residual + LayerNorm."""
        # Full-width projections (bf16 in, f32 accumulate).  1/sqrt(dh) is folded into wq/bq.
        q = jnp.dot(xq_b16, wq_ref[a], preferred_element_type=jnp.float32) + bq_ref[a]
        k = jnp.dot(xkv_b16, wk_ref[a], preferred_element_type=jnp.float32) + bk_ref[a]
        v = jnp.dot(xkv_b16, wv_ref[a], preferred_element_type=jnp.float32) + bv_ref[a]

        # Heads: static lane slices, score/context per head, ctx written into column
        # block h*dh of the VMEM scratch -> one K=D out-projection GEMM afterwards.
        for h in range(n_heads):
            sl = slice(h * dh, (h + 1) * dh)
            qh = q[:, sl].astype(jnp.bfloat16)        # (Sq, dh)
            kh = k[:, sl].astype(jnp.bfloat16)        # (Skv, dh)
            vh = v[:, sl].astype(jnp.bfloat16)        # (Skv, dh)
            s = jax.lax.dot_general(qh, kh, (((1,), (1,)), ((), ())),
                                    preferred_element_type=jnp.float32)   # (Sq, Skv) f32
            s = s + bias
            s = s - jnp.max(s, axis=-1, keepdims=True)
            p = jnp.exp(s)
            # approx reciprocal lands on the EUP slot; use exact divide if bit-parity needed.
            p = p * pl.reciprocal(jnp.sum(p, axis=-1, keepdims=True), approx=True)
            ctx_ref[:, sl] = jnp.dot(p.astype(jnp.bfloat16), vh,
                                     preferred_element_type=jnp.float32)  # (Sq, dh)

        out = (jnp.dot(ctx_ref[...].astype(jnp.bfloat16), wo_ref[a],
                       preferred_element_type=jnp.float32)
               + bo_ref[a] + xq_f32)                                      # bias + residual (f32)

        # Single-pass LayerNorm: var = E[x^2] - mean^2 (one lane-reduction pass).
        mean = jnp.mean(out, axis=-1, keepdims=True)
        var = jnp.mean(out * out, axis=-1, keepdims=True) - mean * mean
        out = (out - mean) * jax.lax.rsqrt(var + jnp.float32(1e-5))
        return out * gamma_ref[a] + beta_ref[a]

    dec = mha(0, dec_in, dec_b16, dec_b16, self_bias)     # self-attention
    dec_b16_2 = dec.astype(jnp.bfloat16)
    dec_glob = mha(1, dec, dec_b16_2, glob_b16, enc_bias)  # enc-attention over global feats
    dec_det = mha(2, dec, dec_b16_2, det_b16, enc_bias)    # enc-attention over detail feats

    # Final linear over concat([detail, global], -1) as a split GEMM (no concat, no [.., 2D]).
    o_ref[...] = (jnp.dot(dec_det.astype(jnp.bfloat16), lwd_ref[...],
                          preferred_element_type=jnp.float32)
                  + jnp.dot(dec_glob.astype(jnp.bfloat16), lwg_ref[...],
                            preferred_element_type=jnp.float32)
                  + lb_ref[...]).astype(o_ref.dtype)


# --------------------------------------------------------------------------
# Wrapper
# --------------------------------------------------------------------------
def _round_up(x, m):
    return (x + m - 1) // m * m


def decoder_layer_forward(packed, encoder_output, decoder_input,
                          self_attn_mask=None, enc_attn_mask=None, *, n_heads):
    global_feats, detail_feats = encoder_output
    B, Sq, D = decoder_input.shape
    Sk = global_feats.shape[1]

    if self_attn_mask is None:
        self_attn_mask = jnp.ones((Sq, Sq), jnp.float32)
    if enc_attn_mask is None:
        enc_attn_mask = jnp.ones((Sq, Sk), jnp.float32)

    # Pad sequence dims to sublane multiples (8); padded keys are masked out via the
    # additive bias, padded query rows are sliced off afterwards -> results are exact.
    Sq_p, Sk_p = _round_up(Sq, 8), _round_up(Sk, 8)

    def pad_seq(x, s_p):
        s = x.shape[1]
        return x if s == s_p else jnp.pad(x, ((0, 0), (0, s_p - s), (0, 0)))

    dec = pad_seq(decoder_input, Sq_p).astype(jnp.float32)      # (B, Sq_p, D)
    glob = pad_seq(global_feats, Sk_p).astype(jnp.float32)      # (B, Sk_p, D)
    det = pad_seq(detail_feats, Sk_p).astype(jnp.float32)       # (B, Sk_p, D)

    # mask -> additive f32 bias, computed ONCE (not per grid step / per head).
    neg = jnp.float32(-1e9)
    self_bias = jnp.where(
        jnp.pad(self_attn_mask, ((0, Sq_p - Sq), (0, Sq_p - Sq))) > 0,
        jnp.float32(0.0), neg).astype(jnp.float32)
    enc_bias = jnp.where(
        jnp.pad(enc_attn_mask, ((0, Sq_p - Sq), (0, Sk_p - Sk))) > 0,
        jnp.float32(0.0), neg).astype(jnp.float32)

    kernel = functools.partial(_decoder_layer_kernel, n_heads=n_heads)

    # Constant-index specs: weights / masks are DMA'd once and stay resident across the grid.
    def full(shape):
        return pl.BlockSpec(shape, lambda b, _n=len(shape): (0,) * _n)

    def per_batch(s, d_):
        return pl.BlockSpec((None, s, d_), lambda b: (b, 0, 0))

    out3d = pl.pallas_call(
        kernel,
        out_shape=jax.ShapeDtypeStruct((B, Sq_p, D), jnp.float32),
        grid=(B,),
        in_specs=[
            per_batch(Sq_p, D),            # decoder input (Q/K/V of self-attn)
            per_batch(Sk_p, D),            # global feats
            per_batch(Sk_p, D),            # detail feats
            full((Sq_p, Sq_p)),            # self-attn additive bias
            full((Sq_p, Sk_p)),            # enc-attn additive bias
            full((3, D, D)),               # wq (bf16, pre-scaled by 1/sqrt(dh))
            full((3, D, D)),               # wk (bf16)
            full((3, D, D)),               # wv (bf16)
            full((3, D, D)),               # wo (bf16)
            full((3, 1, D)),               # bq (f32, pre-scaled)
            full((3, 1, D)),               # bk
            full((3, 1, D)),               # bv
            full((3, 1, D)),               # bo
            full((3, 1, D)),               # gamma
            full((3, 1, D)),               # beta
            full((D, D)),                  # linear W (detail half, bf16)
            full((D, D)),                  # linear W (global half, bf16)
            full((1, D)),                  # linear bias
        ],
        out_specs=per_batch(Sq_p, D),
        scratch_shapes=[pltpu.VMEM((Sq_p, D), jnp.float32)],   # per-head ctx -> column blocks
        compiler_params=pltpu.CompilerParams(
            dimension_semantics=("parallel",),   # batch axis -> dual-TC on v7x
            # Raise v5e's 16 MiB scoped default; within v7x's 64 MiB physical VMEM.
            # At production D, re-budget: bf16 weights are ~28*D^2 bytes.
            vmem_limit_bytes=32 * 1024 * 1024),
    )(dec, glob, det, self_bias, enc_bias,
      packed["wq"], packed["wk"], packed["wv"], packed["wo"],
      packed["bq"], packed["bk"], packed["bv"], packed["bo"],
      packed["gamma"], packed["beta"],
      packed["lin_w_det"], packed["lin_w_glob"], packed["lin_b"])

    return out3d[:, :Sq, :], None, None


# --------------------------------------------------------------------------
# Parameter init (conventional layout) + host-side packing to kernel layout
# --------------------------------------------------------------------------
def init_mha_params(key, d_model):
    ks = jax.random.split(key, 4)
    mk = lambda k: (0.02 * jax.random.normal(k, (d_model, d_model))).astype(jnp.float32)
    zeros = jnp.zeros((1, d_model), jnp.float32)
    return {
        "wq": mk(ks[0]), "wk": mk(ks[1]), "wv": mk(ks[2]), "wo": mk(ks[3]),
        "bq": zeros, "bk": zeros, "bv": zeros, "bo": zeros,
        "gamma": jnp.ones((1, d_model), jnp.float32),
        "beta": jnp.zeros((1, d_model), jnp.float32),
    }


def init_decoder_layer_params(key, d_model):
    k_self, k_glob, k_det, k_lin = jax.random.split(key, 4)
    return {
        "self_attention": init_mha_params(k_self, d_model),
        "enc_attention_global": init_mha_params(k_glob, d_model),
        "enc_attention_detail": init_mha_params(k_det, d_model),
        "linear_w": (0.02 * jax.random.normal(k_lin, (2 * d_model, d_model))).astype(jnp.float32),
        "linear_b": jnp.zeros((1, d_model), jnp.float32),
        # pos_feedforward_global / pos_feedforward_detail: unused in forward().
    }


def pack_decoder_params(params, n_heads):
    """Host-side, one-time repack: stack the 3 attention blocks, fold the 1/sqrt(dh)
    attention scale into Wq/bq, cast matmul weights to bf16 (f32 accumulation in-kernel),
    and split the final Linear weight into its detail/global halves (concat-free GEMM)."""
    d_model = params["linear_b"].shape[-1]
    dh = d_model // n_heads
    scale = jnp.float32(1.0 / math.sqrt(dh))
    names = ("self_attention", "enc_attention_global", "enc_attention_detail")
    bf16 = lambda x: x.astype(jnp.bfloat16)
    return {
        "wq": bf16(jnp.stack([params[n]["wq"] for n in names]) * scale),   # (3,D,D) pre-scaled
        "wk": bf16(jnp.stack([params[n]["wk"] for n in names])),
        "wv": bf16(jnp.stack([params[n]["wv"] for n in names])),
        "wo": bf16(jnp.stack([params[n]["wo"] for n in names])),
        "bq": (jnp.stack([params[n]["bq"] for n in names]) * scale).astype(jnp.float32),
        "bk": jnp.stack([params[n]["bk"] for n in names]),                  # (3,1,D) f32
        "bv": jnp.stack([params[n]["bv"] for n in names]),
        "bo": jnp.stack([params[n]["bo"] for n in names]),
        "gamma": jnp.stack([params[n]["gamma"] for n in names]),
        "beta": jnp.stack([params[n]["beta"] for n in names]),
        # concat order is [detail, global]: first D rows hit detail, last D hit global
        "lin_w_det": bf16(params["linear_w"][:d_model]),                    # (D, D)
        "lin_w_glob": bf16(params["linear_w"][d_model:]),                   # (D, D)
        "lin_b": params["linear_b"],                                        # (1, D) f32
    }


# --------------------------------------------------------------------------
# Main
# --------------------------------------------------------------------------
if __name__ == "__main__":
    B, Sq, Sk = 2, 8, 12
    d_model, d_hidden, n_heads = 32, 128, 4

    key = jax.random.PRNGKey(0)
    k_params, k_dec, k_glob, k_det = jax.random.split(key, 4)

    params = init_decoder_layer_params(k_params, d_model)
    packed = pack_decoder_params(params, n_heads)

    decoder_input = jax.random.normal(k_dec, (B, Sq, d_model), jnp.float32)
    global_feats = jax.random.normal(k_glob, (B, Sk, d_model), jnp.float32)
    detail_feats = jax.random.normal(k_det, (B, Sk, d_model), jnp.float32)

    # causal mask for decoder self-attention, full mask for encoder attention
    self_attn_mask = jnp.tril(jnp.ones((Sq, Sq), jnp.float32))
    enc_attn_mask = jnp.ones((Sq, Sk), jnp.float32)

    out, _, _ = decoder_layer_forward(
        packed, (global_feats, detail_feats), decoder_input,
        self_attn_mask, enc_attn_mask, n_heads=n_heads)
    out = jax.block_until_ready(out)
    assert out.shape == (B, Sq, d_model), out.shape
    assert bool(jnp.all(jnp.isfinite(out)))
    print("KERNEL_OK")
</pallas_src>

<mosaic_0001>
module attributes {stable_mosaic.version = 11 : i64} {
  func.func @_decoder_layer_kernel(%arg0: i32, %arg1: memref<1x8x32xf32, #tpu.memory_space<vmem>>, %arg2: memref<1x16x32xf32, #tpu.memory_space<vmem>>, %arg3: memref<1x16x32xf32, #tpu.memory_space<vmem>>, %arg4: memref<8x8xf32, #tpu.memory_space<vmem>>, %arg5: memref<8x16xf32, #tpu.memory_space<vmem>>, %arg6: memref<3x32x32xbf16, #tpu.memory_space<vmem>>, %arg7: memref<3x32x32xbf16, #tpu.memory_space<vmem>>, %arg8: memref<3x32x32xbf16, #tpu.memory_space<vmem>>, %arg9: memref<3x32x32xbf16, #tpu.memory_space<vmem>>, %arg10: memref<3x1x32xf32, #tpu.memory_space<vmem>>, %arg11: memref<3x1x32xf32, #tpu.memory_space<vmem>>, %arg12: memref<3x1x32xf32, #tpu.memory_space<vmem>>, %arg13: memref<3x1x32xf32, #tpu.memory_space<vmem>>, %arg14: memref<3x1x32xf32, #tpu.memory_space<vmem>>, %arg15: memref<3x1x32xf32, #tpu.memory_space<vmem>>, %arg16: memref<32x32xbf16, #tpu.memory_space<vmem>>, %arg17: memref<32x32xbf16, #tpu.memory_space<vmem>>, %arg18: memref<1x32xf32, #tpu.memory_space<vmem>>, %arg19: memref<1x8x32xf32, #tpu.memory_space<vmem>>, %arg20: memref<8x32xf32, #tpu.memory_space<vmem>>) attributes {dimension_semantics = [#tpu.dimension_semantics<parallel>], iteration_bounds = array<i64: 2>, scalar_prefetch = 0 : i64, scratch_operands = 1 : i64, tpu.core_type = #tpu.core_type<tc>, window_params = [{transform_indices = @transform_0, window_bounds = array<i64: 1, 8, 32>}, {transform_indices = @transform_1, window_bounds = array<i64: 1, 16, 32>}, {transform_indices = @transform_2, window_bounds = array<i64: 1, 16, 32>}, {pipeline_mode = #tpu.pipeline_mode<synchronous>, transform_indices = @transform_3, window_bounds = array<i64: 8, 8>}, {pipeline_mode = #tpu.pipeline_mode<synchronous>, transform_indices = @transform_4, window_bounds = array<i64: 8, 16>}, {pipeline_mode = #tpu.pipeline_mode<synchronous>, transform_indices = @transform_5, window_bounds = array<i64: 3, 32, 32>}, {pipeline_mode = #tpu.pipeline_mode<synchronous>, transform_indices = @transform_6, window_bounds = array<i64: 3, 32, 32>}, {pipeline_mode = #tpu.pipeline_mode<synchronous>, transform_indices = @transform_7, window_bounds = array<i64: 3, 32, 32>}, {pipeline_mode = #tpu.pipeline_mode<synchronous>, transform_indices = @transform_8, window_bounds = array<i64: 3, 32, 32>}, {pipeline_mode = #tpu.pipeline_mode<synchronous>, transform_indices = @transform_9, window_bounds = array<i64: 3, 1, 32>}, {pipeline_mode = #tpu.pipeline_mode<synchronous>, transform_indices = @transform_10, window_bounds = array<i64: 3, 1, 32>}, {pipeline_mode = #tpu.pipeline_mode<synchronous>, transform_indices = @transform_11, window_bounds = array<i64: 3, 1, 32>}, {pipeline_mode = #tpu.pipeline_mode<synchronous>, transform_indices = @transform_12, window_bounds = array<i64: 3, 1, 32>}, {pipeline_mode = #tpu.pipeline_mode<synchronous>, transform_indices = @transform_13, window_bounds = array<i64: 3, 1, 32>}, {pipeline_mode = #tpu.pipeline_mode<synchronous>, transform_indices = @transform_14, window_bounds = array<i64: 3, 1, 32>}, {pipeline_mode = #tpu.pipeline_mode<synchronous>, transform_indices = @transform_15, window_bounds = array<i64: 32, 32>}, {pipeline_mode = #tpu.pipeline_mode<synchronous>, transform_indices = @transform_16, window_bounds = array<i64: 32, 32>}, {pipeline_mode = #tpu.pipeline_mode<synchronous>, transform_indices = @transform_17, window_bounds = array<i64: 1, 32>}, {transform_indices = @transform_18, window_bounds = array<i64: 1, 8, 32>}]} {
    %c0 = arith.constant 0 : index
    %c0_0 = arith.constant 0 : index
    %c0_1 = arith.constant 0 : index
    %0 = vector.load %arg1[%c0, %c0_0, %c0_1] : memref<1x8x32xf32, #tpu.memory_space<vmem>>, vector<1x8x32xf32>
    %1 = vector.shape_cast %0 : vector<1x8x32xf32> to vector<8x32xf32>
    %2 = arith.truncf %1 : vector<8x32xf32> to vector<8x32xbf16>
    %c0_2 = arith.constant 0 : index
    %c0_3 = arith.constant 0 : index
    %c0_4 = arith.constant 0 : index
    %3 = vector.load %arg2[%c0_2, %c0_3, %c0_4] : memref<1x16x32xf32, #tpu.memory_space<vmem>>, vector<1x16x32xf32>
    %4 = vector.shape_cast %3 : vector<1x16x32xf32> to vector<16x32xf32>
    %5 = arith.truncf %4 : vector<16x32xf32> to vector<16x32xbf16>
    %c0_5 = arith.constant 0 : index
    %c0_6 = arith.constant 0 : index
    %c0_7 = arith.constant 0 : index
    %6 = vector.load %arg3[%c0_5, %c0_6, %c0_7] : memref<1x16x32xf32, #tpu.memory_space<vmem>>, vector<1x16x32xf32>
    %7 = vector.shape_cast %6 : vector<1x16x32xf32> to vector<16x32xf32>
    %8 = arith.truncf %7 : vector<16x32xf32> to vector<16x32xbf16>
    %c0_8 = arith.constant 0 : index
    %c0_9 = arith.constant 0 : index
    %9 = vector.load %arg4[%c0_8, %c0_9] : memref<8x8xf32, #tpu.memory_space<vmem>>, vector<8x8xf32>
    %c0_10 = arith.constant 0 : index
    %c0_11 = arith.constant 0 : index
    %10 = vector.load %arg5[%c0_10, %c0_11] : memref<8x16xf32, #tpu.memory_space<vmem>>, vector<8x16xf32>
    %c0_12 = arith.constant 0 : index
    %c0_13 = arith.constant 0 : index
    %c0_14 = arith.constant 0 : index
    %11 = vector.load %arg6[%c0_12, %c0_13, %c0_14] : memref<3x32x32xbf16, #tpu.memory_space<vmem>>, vector<1x32x32xbf16>
    %12 = vector.shape_cast %11 : vector<1x32x32xbf16> to vector<32x32xbf16>
    %cst = arith.constant dense<0.000000e+00> : vector<8x32xf32>
    %13 = tpu.matmul %2, %12, %cst {dimension_numbers = #tpu.dot_dimension_numbers<[1], [0], [0], [1], [0, 0, 1, 1], [], []>} : vector<8x32xbf16>, vector<32x32xbf16>, vector<8x32xf32> -> vector<8x32xf32>
    %c0_15 = arith.constant 0 : index
    %c0_16 = arith.constant 0 : index
    %c0_17 = arith.constant 0 : index
    %14 = vector.load %arg10[%c0_15, %c0_16, %c0_17] : memref<3x1x32xf32, #tpu.memory_space<vmem>>, vector<1x1x32xf32>
    %15 = vector.shape_cast %14 : vector<1x1x32xf32> to vector<1x32xf32>
    %16 = vector.broadcast %15 : vector<1x32xf32> to vector<8x32xf32>
    %17 = arith.addf %13, %16 : vector<8x32xf32>
    %c0_18 = arith.constant 0 : index
    %c0_19 = arith.constant 0 : index
    %c0_20 = arith.constant 0 : index
    %18 = vector.load %arg7[%c0_18, %c0_19, %c0_20] : memref<3x32x32xbf16, #tpu.memory_space<vmem>>, vector<1x32x32xbf16>
    %19 = vector.shape_cast %18 : vector<1x32x32xbf16> to vector<32x32xbf16>
    %cst_21 = arith.constant dense<0.000000e+00> : vector<8x32xf32>
    %20 = tpu.matmul %2, %19, %cst_21 {dimension_numbers = #tpu.dot_dimension_numbers<[1], [0], [0], [1], [0, 0, 1, 1], [], []>} : vector<8x32xbf16>, vector<32x32xbf16>, vector<8x32xf32> -> vector<8x32xf32>
    %c0_22 = arith.constant 0 : index
    %c0_23 = arith.constant 0 : index
    %c0_24 = arith.constant 0 : index
    %21 = vector.load %arg11[%c0_22, %c0_23, %c0_24] : memref<3x1x32xf32, #tpu.memory_space<vmem>>, vector<1x1x32xf32>
    %22 = vector.shape_cast %21 : vector<1x1x32xf32> to vector<1x32xf32>
    %23 = vector.broadcast %22 : vector<1x32xf32> to vector<8x32xf32>
    %24 = arith.addf %20, %23 : vector<8x32xf32>
    %c0_25 = arith.constant 0 : index
    %c0_26 = arith.constant 0 : index
    %c0_27 = arith.constant 0 : index
    %25 = vector.load %arg8[%c0_25, %c0_26, %c0_27] : memref<3x32x32xbf16, #tpu.memory_space<vmem>>, vector<1x32x32xbf16>
    %26 = vector.shape_cast %25 : vector<1x32x32xbf16> to vector<32x32xbf16>
    %cst_28 = arith.constant dense<0.000000e+00> : vector<8x32xf32>
    %27 = tpu.matmul %2, %26, %cst_28 {dimension_numbers = #tpu.dot_dimension_numbers<[1], [0], [0], [1], [0, 0, 1, 1], [], []>} : vector<8x32xbf16>, vector<32x32xbf16>, vector<8x32xf32> -> vector<8x32xf32>
    %c0_29 = arith.constant 0 : index
    %c0_30 = arith.constant 0 : index
    %c0_31 = arith.constant 0 : index
    %28 = vector.load %arg12[%c0_29, %c0_30, %c0_31] : memref<3x1x32xf32, #tpu.memory_space<vmem>>, vector<1x1x32xf32>
    %29 = vector.shape_cast %28 : vector<1x1x32xf32> to vector<1x32xf32>
    %30 = vector.broadcast %29 : vector<1x32xf32> to vector<8x32xf32>
    %31 = arith.addf %27, %30 : vector<8x32xf32>
    %32 = vector.extract_strided_slice %17 {offsets = [0, 0], sizes = [8, 8], strides = [1, 1]} : vector<8x32xf32> to vector<8x8xf32>
    %33 = arith.truncf %32 : vector<8x8xf32> to vector<8x8xbf16>
    %34 = vector.extract_strided_slice %24 {offsets = [0, 0], sizes = [8, 8], strides = [1, 1]} : vector<8x32xf32> to vector<8x8xf32>
    %35 = arith.truncf %34 : vector<8x8xf32> to vector<8x8xbf16>
    %36 = vector.extract_strided_slice %31 {offsets = [0, 0], sizes = [8, 8], strides = [1, 1]} : vector<8x32xf32> to vector<8x8xf32>
    %37 = arith.truncf %36 : vector<8x8xf32> to vector<8x8xbf16>
    %cst_32 = arith.constant dense<0.000000e+00> : vector<8x8xf32>
    %38 = tpu.matmul %33, %35, %cst_32 {dimension_numbers = #tpu.dot_dimension_numbers<[1], [1], [0], [0], [0, 0, 1, 0], [], []>} : vector<8x8xbf16>, vector<8x8xbf16>, vector<8x8xf32> -> vector<8x8xf32>
    %39 = arith.addf %38, %9 : vector<8x8xf32>
    %cst_33 = arith.constant dense<0xFF800000> : vector<8xf32>
    %40 = vector.multi_reduction <maximumf>, %39, %cst_33 [1] : vector<8x8xf32> to vector<8xf32>
    %41 = vector.shape_cast %40 : vector<8xf32> to vector<8x1xf32>
    %42 = vector.broadcast %41 : vector<8x1xf32> to vector<8x8xf32>
    %43 = arith.subf %39, %42 : vector<8x8xf32>
    %44 = math.exp %43 : vector<8x8xf32>
    %cst_34 = arith.constant dense<0.000000e+00> : vector<8xf32>
    %45 = vector.multi_reduction <add>, %44, %cst_34 [1] : vector<8x8xf32> to vector<8xf32>
    %46 = vector.shape_cast %45 : vector<8xf32> to vector<8x1xf32>
    %47 = tpu.reciprocal %46 {approx = true} : vector<8x1xf32> -> vector<8x1xf32>
    %48 = vector.broadcast %47 : vector<8x1xf32> to vector<8x8xf32>
    %49 = arith.mulf %44, %48 : vector<8x8xf32>
    %50 = arith.truncf %49 : vector<8x8xf32> to vector<8x8xbf16>
    %cst_35 = arith.constant dense<0.000000e+00> : vector<8x8xf32>
    %51 = tpu.matmul %50, %37, %cst_35 {dimension_numbers = #tpu.dot_dimension_numbers<[1], [0], [0], [1], [0, 0, 1, 1], [], []>} : vector<8x8xbf16>, vector<8x8xbf16>, vector<8x8xf32> -> vector<8x8xf32>
    %c0_36 = arith.constant 0 : index
    %c0_37 = arith.constant 0 : index
    %52 = vector.load %arg20[%c0_36, %c0_37] : memref<8x32xf32, #tpu.memory_space<vmem>>, vector<8x8xf32>
    tpu.vector_store %arg20[%c0_36, %c0_37], %51 {strides = array<i32>} : memref<8x32xf32, #tpu.memory_space<vmem>>, vector<8x8xf32>,
    %53 = vector.extract_strided_slice %17 {offsets = [0, 8], sizes = [8, 8], strides = [1, 1]} : vector<8x32xf32> to vector<8x8xf32>
    %54 = arith.truncf %53 : vector<8x8xf32> to vector<8x8xbf16>
    %55 = vector.extract_strided_slice %24 {offsets = [0, 8], sizes = [8, 8], strides = [1, 1]} : vector<8x32xf32> to vector<8x8xf32>
    %56 = arith.truncf %55 : vector<8x8xf32> to vector<8x8xbf16>
    %57 = vector.extract_strided_slice %31 {offsets = [0, 8], sizes = [8, 8], strides = [1, 1]} : vector<8x32xf32> to vector<8x8xf32>
    %58 = arith.truncf %57 : vector<8x8xf32> to vector<8x8xbf16>
    %cst_38 = arith.constant dense<0.000000e+00> : vector<8x8xf32>
    %59 = tpu.matmul %54, %56, %cst_38 {dimension_numbers = #tpu.dot_dimension_numbers<[1], [1], [0], [0], [0, 0, 1, 0], [], []>} : vector<8x8xbf16>, vector<8x8xbf16>, vector<8x8xf32> -> vector<8x8xf32>
    %60 = arith.addf %59, %9 : vector<8x8xf32>
    %cst_39 = arith.constant dense<0xFF800000> : vector<8xf32>
    %61 = vector.multi_reduction <maximumf>, %60, %cst_39 [1] : vector<8x8xf32> to vector<8xf32>
    %62 = vector.shape_cast %61 : vector<8xf32> to vector<8x1xf32>
    %63 = vector.broadcast %62 : vector<8x1xf32> to vector<8x8xf32>
    %64 = arith.subf %60, %63 : vector<8x8xf32>
    %65 = math.exp %64 : vector<8x8xf32>
    %cst_40 = arith.constant dense<0.000000e+00> : vector<8xf32>
    %66 = vector.multi_reduction <add>, %65, %cst_40 [1] : vector<8x8xf32> to vector<8xf32>
    %67 = vector.shape_cast %66 : vector<8xf32> to vector<8x1xf32>
    %68 = tpu.reciprocal %67 {approx = true} : vector<8x1xf32> -> vector<8x1xf32>
    %69 = vector.broadcast %68 : vector<8x1xf32> to vector<8x8xf32>
    %70 = arith.mulf %65, %69 : vector<8x8xf32>
    %71 = arith.truncf %70 : vector<8x8xf32> to vector<8x8xbf16>
    %cst_41 = arith.constant dense<0.000000e+00> : vector<8x8xf32>
    %72 = tpu.matmul %71, %58, %cst_41 {dimension_numbers = #tpu.dot_dimension_numbers<[1], [0], [0], [1], [0, 0, 1, 1], [], []>} : vector<8x8xbf16>, vector<8x8xbf16>, vector<8x8xf32> -> vector<8x8xf32>
    %c0_42 = arith.constant 0 : index
    %c8 = arith.constant 8 : index
    %73 = vector.load %arg20[%c0_42, %c8] : memref<8x32xf32, #tpu.memory_space<vmem>>, vector<8x8xf32>
    tpu.vector_store %arg20[%c0_42, %c8], %72 {strides = array<i32>} : memref<8x32xf32, #tpu.memory_space<vmem>>, vector<8x8xf32>,
    %74 = vector.extract_strided_slice %17 {offsets = [0, 16], sizes = [8, 8], strides = [1, 1]} : vector<8x32xf32> to vector<8x8xf32>
    %75 = arith.truncf %74 : vector<8x8xf32> to vector<8x8xbf16>
    %76 = vector.extract_strided_slice %24 {offsets = [0, 16], sizes = [8, 8], strides = [1, 1]} : vector<8x32xf32> to vector<8x8xf32>
    %77 = arith.truncf %76 : vector<8x8xf32> to vector<8x8xbf16>
    %78 = vector.extract_strided_slice %31 {offsets = [0, 16], sizes = [8, 8], strides = [1, 1]} : vector<8x32xf32> to vector<8x8xf32>
    %79 = arith.truncf %78 : vector<8x8xf32> to vector<8x8xbf16>
    %cst_43 = arith.constant dense<0.000000e+00> : vector<8x8xf32>
    %80 = tpu.matmul %75, %77, %cst_43 {dimension_numbers = #tpu.dot_dimension_numbers<[1], [1], [0], [0], [0, 0, 1, 0], [], []>} : vector<8x8xbf16>, vector<8x8xbf16>, vector<8x8xf32> -> vector<8x8xf32>
    %81 = arith.addf %80, %9 : vector<8x8xf32>
    %cst_44 = arith.constant dense<0xFF800000> : vector<8xf32>
    %82 = vector.multi_reduction <maximumf>, %81, %cst_44 [1] : vector<8x8xf32> to vector<8xf32>
    %83 = vector.shape_cast %82 : vector<8xf32> to vector<8x1xf32>
    %84 = vector.broadcast %83 : vector<8x1xf32> to vector<8x8xf32>
    %85 = arith.subf %81, %84 : vector<8x8xf32>
    %86 = math.exp %85 : vector<8x8xf32>
    %cst_45 = arith.constant dense<0.000000e+00> : vector<8xf32>
    %87 = vector.multi_reduction <add>, %86, %cst_45 [1] : vector<8x8xf32> to vector<8xf32>
    %88 = vector.shape_cast %87 : vector<8xf32> to vector<8x1xf32>
    %89 = tpu.reciprocal %88 {approx = true} : vector<8x1xf32> -> vector<8x1xf32>
    %90 = vector.broadcast %89 : vector<8x1xf32> to vector<8x8xf32>
    %91 = arith.mulf %86, %90 : vector<8x8xf32>
    %92 = arith.truncf %91 : vector<8x8xf32> to vector<8x8xbf16>
    %cst_46 = arith.constant dense<0.000000e+00> : vector<8x8xf32>
    %93 = tpu.matmul %92, %79, %cst_46 {dimension_numbers = #tpu.dot_dimension_numbers<[1], [0], [0], [1], [0, 0, 1, 1], [], []>} : vector<8x8xbf16>, vector<8x8xbf16>, vector<8x8xf32> -> vector<8x8xf32>
    %c0_47 = arith.constant 0 : index
    %c16 = arith.constant 16 : index
    %94 = vector.load %arg20[%c0_47, %c16] : memref<8x32xf32, #tpu.memory_space<vmem>>, vector<8x8xf32>
    tpu.vector_store %arg20[%c0_47, %c16], %93 {strides = array<i32>} : memref<8x32xf32, #tpu.memory_space<vmem>>, vector<8x8xf32>,
    %95 = vector.extract_strided_slice %17 {offsets = [0, 24], sizes = [8, 8], strides = [1, 1]} : vector<8x32xf32> to vector<8x8xf32>
    %96 = arith.truncf %95 : vector<8x8xf32> to vector<8x8xbf16>
    %97 = vector.extract_strided_slice %24 {offsets = [0, 24], sizes = [8, 8], strides = [1, 1]} : vector<8x32xf32> to vector<8x8xf32>
    %98 = arith.truncf %97 : vector<8x8xf32> to vector<8x8xbf16>
    %99 = vector.extract_strided_slice %31 {offsets = [0, 24], sizes = [8, 8], strides = [1, 1]} : vector<8x32xf32> to vector<8x8xf32>
    %100 = arith.truncf %99 : vector<8x8xf32> to vector<8x8xbf16>
    %cst_48 = arith.constant dense<0.000000e+00> : vector<8x8xf32>
    %101 = tpu.matmul %96, %98, %cst_48 {dimension_numbers = #tpu.dot_dimension_numbers<[1], [1], [0], [0], [0, 0, 1, 0], [], []>} : vector<8x8xbf16>, vector<8x8xbf16>, vector<8x8xf32> -> vector<8x8xf32>
    %102 = arith.addf %101, %9 : vector<8x8xf32>
    %cst_49 = arith.constant dense<0xFF800000> : vector<8xf32>
    %103 = vector.multi_reduction <maximumf>, %102, %cst_49 [1] : vector<8x8xf32> to vector<8xf32>
    %104 = vector.shape_cast %103 : vector<8xf32> to vector<8x1xf32>
    %105 = vector.broadcast %104 : vector<8x1xf32> to vector<8x8xf32>
    %106 = arith.subf %102, %105 : vector<8x8xf32>
    %107 = math.exp %106 : vector<8x8xf32>
    %cst_50 = arith.constant dense<0.000000e+00> : vector<8xf32>
    %108 = vector.multi_reduction <add>, %107, %cst_50 [1] : vector<8x8xf32> to vector<8xf32>
    %109 = vector.shape_cast %108 : vector<8xf32> to vector<8x1xf32>
    %110 = tpu.reciprocal %109 {approx = true} : vector<8x1xf32> -> vector<8x1xf32>
    %111 = vector.broadcast %110 : vector<8x1xf32> to vector<8x8xf32>
    %112 = arith.mulf %107, %111 : vector<8x8xf32>
    %113 = arith.truncf %112 : vector<8x8xf32> to vector<8x8xbf16>
    %cst_51 = arith.constant dense<0.000000e+00> : vector<8x8xf32>
    %114 = tpu.matmul %113, %100, %cst_51 {dimension_numbers = #tpu.dot_dimension_numbers<[1], [0], [0], [1], [0, 0, 1, 1], [], []>} : vector<8x8xbf16>, vector<8x8xbf16>, vector<8x8xf32> -> vector<8x8xf32>
    %c0_52 = arith.constant 0 : index
    %c24 = arith.constant 24 : index
    %115 = vector.load %arg20[%c0_52, %c24] : memref<8x32xf32, #tpu.memory_space<vmem>>, vector<8x8xf32>
    tpu.vector_store %arg20[%c0_52, %c24], %114 {strides = array<i32>} : memref<8x32xf32, #tpu.memory_space<vmem>>, vector<8x8xf32>,
    %c0_53 = arith.constant 0 : index
    %c0_54 = arith.constant 0 : index
    %116 = vector.load %arg20[%c0_53, %c0_54] : memref<8x32xf32, #tpu.memory_space<vmem>>, vector<8x32xf32>
    %117 = arith.truncf %116 : vector<8x32xf32> to vector<8x32xbf16>
    %c0_55 = arith.constant 0 : index
    %c0_56 = arith.constant 0 : index
    %c0_57 = arith.constant 0 : index
    %118 = vector.load %arg9[%c0_55, %c0_56, %c0_57] : memref<3x32x32xbf16, #tpu.memory_space<vmem>>, vector<1x32x32xbf16>
    %119 = vector.shape_cast %118 : vector<1x32x32xbf16> to vector<32x32xbf16>
    %cst_58 = arith.constant dense<0.000000e+00> : vector<8x32xf32>
    %120 = tpu.matmul %117, %119, %cst_58 {dimension_numbers = #tpu.dot_dimension_numbers<[1], [0], [0], [1], [0, 0, 1, 1], [], []>} : vector<8x32xbf16>, vector<32x32xbf16>, vector<8x32xf32> -> vector<8x32xf32>
    %c0_59 = arith.constant 0 : index
    %c0_60 = arith.constant 0 : index
    %c0_61 = arith.constant 0 : index
    %121 = vector.load %arg13[%c0_59, %c0_60, %c0_61] : memref<3x1x32xf32, #tpu.memory_space<vmem>>, vector<1x1x32xf32>
    %122 = vector.shape_cast %121 : vector<1x1x32xf32> to vector<1x32xf32>
    %123 = vector.broadcast %122 : vector<1x32xf32> to vector<8x32xf32>
    %124 = arith.addf %120, %123 : vector<8x32xf32>
    %125 = arith.addf %124, %1 : vector<8x32xf32>
    %cst_62 = arith.constant dense<0.000000e+00> : vector<8xf32>
    %126 = vector.multi_reduction <add>, %125, %cst_62 [1] : vector<8x32xf32> to vector<8xf32>
    %127 = vector.shape_cast %126 : vector<8xf32> to vector<8x1xf32>
    %cst_63 = arith.constant 3.200000e+01 : f32
    %128 = vector.broadcast %cst_63 : f32 to vector<8x1xf32>
    %129 = arith.divf %127, %128 : vector<8x1xf32>
    %130 = arith.mulf %125, %125 : vector<8x32xf32>
    %cst_64 = arith.constant dense<0.000000e+00> : vector<8xf32>
    %131 = vector.multi_reduction <add>, %130, %cst_64 [1] : vector<8x32xf32> to vector<8xf32>
    %132 = vector.shape_cast %131 : vector<8xf32> to vector<8x1xf32>
    %cst_65 = arith.constant 3.200000e+01 : f32
    %133 = vector.broadcast %cst_65 : f32 to vector<8x1xf32>
    %134 = arith.divf %132, %133 : vector<8x1xf32>
    %135 = arith.mulf %129, %129 : vector<8x1xf32>
    %136 = arith.subf %134, %135 : vector<8x1xf32>
    %137 = vector.broadcast %129 : vector<8x1xf32> to vector<8x32xf32>
    %138 = arith.subf %125, %137 : vector<8x32xf32>
    %cst_66 = arith.constant 9.99999974E-6 : f32
    %139 = vector.broadcast %cst_66 : f32 to vector<8x1xf32>
    %140 = arith.addf %136, %139 : vector<8x1xf32>
    %141 = math.rsqrt %140 : vector<8x1xf32>
    %142 = vector.broadcast %141 : vector<8x1xf32> to vector<8x32xf32>
    %143 = arith.mulf %138, %142 : vector<8x32xf32>
    %c0_67 = arith.constant 0 : index
    %c0_68 = arith.constant 0 : index
    %c0_69 = arith.constant 0 : index
    %144 = vector.load %arg14[%c0_67, %c0_68, %c0_69] : memref<3x1x32xf32, #tpu.memory_space<vmem>>, vector<1x1x32xf32>
    %145 = vector.shape_cast %144 : vector<1x1x32xf32> to vector<1x32xf32>
    %146 = vector.broadcast %145 : vector<1x32xf32> to vector<8x32xf32>
    %147 = arith.mulf %143, %146 : vector<8x32xf32>
    %c0_70 = arith.constant 0 : index
    %c0_71 = arith.constant 0 : index
    %c0_72 = arith.constant 0 : index
    %148 = vector.load %arg15[%c0_70, %c0_71, %c0_72] : memref<3x1x32xf32, #tpu.memory_space<vmem>>, vector<1x1x32xf32>
    %149 = vector.shape_cast %148 : vector<1x1x32xf32> to vector<1x32xf32>
    %150 = vector.broadcast %149 : vector<1x32xf32> to vector<8x32xf32>
    %151 = arith.addf %147, %150 : vector<8x32xf32>
    %152 = arith.truncf %151 : vector<8x32xf32> to vector<8x32xbf16>
    %c1 = arith.constant 1 : index
    %c0_73 = arith.constant 0 : index
    %c0_74 = arith.constant 0 : index
    %153 = vector.load %arg6[%c1, %c0_73, %c0_74] : memref<3x32x32xbf16, #tpu.memory_space<vmem>>, vector<1x32x32xbf16>
    %154 = vector.shape_cast %153 : vector<1x32x32xbf16> to vector<32x32xbf16>
    %cst_75 = arith.constant dense<0.000000e+00> : vector<8x32xf32>
    %155 = tpu.matmul %152, %154, %cst_75 {dimension_numbers = #tpu.dot_dimension_numbers<[1], [0], [0], [1], [0, 0, 1, 1], [], []>} : vector<8x32xbf16>, vector<32x32xbf16>, vector<8x32xf32> -> vector<8x32xf32>
    %c1_76 = arith.constant 1 : index
    %c0_77 = arith.constant 0 : index
    %c0_78 = arith.constant 0 : index
    %156 = vector.load %arg10[%c1_76, %c0_77, %c0_78] : memref<3x1x32xf32, #tpu.memory_space<vmem>>, vector<1x1x32xf32>
    %157 = vector.shape_cast %156 : vector<1x1x32xf32> to vector<1x32xf32>
    %158 = vector.broadcast %157 : vector<1x32xf32> to vector<8x32xf32>
    %159 = arith.addf %155, %158 : vector<8x32xf32>
    %c1_79 = arith.constant 1 : index
    %c0_80 = arith.constant 0 : index
    %c0_81 = arith.constant 0 : index
    %160 = vector.load %arg7[%c1_79, %c0_80, %c0_81] : memref<3x32x32xbf16, #tpu.memory_space<vmem>>, vector<1x32x32xbf16>
    %161 = vector.shape_cast %160 : vector<1x32x32xbf16> to vector<32x32xbf16>
    %cst_82 = arith.constant dense<0.000000e+00> : vector<16x32xf32>
    %162 = tpu.matmul %5, %161, %cst_82 {dimension_numbers = #tpu.dot_dimension_numbers<[1], [0], [0], [1], [0, 0, 1, 1], [], []>} : vector<16x32xbf16>, vector<32x32xbf16>, vector<16x32xf32> -> vector<16x32xf32>
    %c1_83 = arith.constant 1 : index
    %c0_84 = arith.constant 0 : index
    %c0_85 = arith.constant 0 : index
    %163 = vector.load %arg11[%c1_83, %c0_84, %c0_85] : memref<3x1x32xf32, #tpu.memory_space<vmem>>, vector<1x1x32xf32>
    %164 = vector.shape_cast %163 : vector<1x1x32xf32> to vector<1x32xf32>
    %165 = vector.broadcast %164 : vector<1x32xf32> to vector<16x32xf32>
    %166 = arith.addf %162, %165 : vector<16x32xf32>
    %c1_86 = arith.constant 1 : index
    %c0_87 = arith.constant 0 : index
    %c0_88 = arith.constant 0 : index
    %167 = vector.load %arg8[%c1_86, %c0_87, %c0_88] : memref<3x32x32xbf16, #tpu.memory_space<vmem>>, vector<1x32x32xbf16>
    %168 = vector.shape_cast %167 : vector<1x32x32xbf16> to vector<32x32xbf16>
    %cst_89 = arith.constant dense<0.000000e+00> : vector<16x32xf32>
    %169 = tpu.matmul %5, %168, %cst_89 {dimension_numbers = #tpu.dot_dimension_numbers<[1], [0], [0], [1], [0, 0, 1, 1], [], []>} : vector<16x32xbf16>, vector<32x32xbf16>, vector<16x32xf32> -> vector<16x32xf32>
    %c1_90 = arith.constant 1 : index
    %c0_91 = arith.constant 0 : index
    %c0_92 = arith.constant 0 : index
    %170 = vector.load %arg12[%c1_90, %c0_91, %c0_92] : memref<3x1x32xf32, #tpu.memory_space<vmem>>, vector<1x1x32xf32>
    %171 = vector.shape_cast %170 : vector<1x1x32xf32> to vector<1x32xf32>
    %172 = vector.broadcast %171 : vector<1x32xf32> to vector<16x32xf32>
    %173 = arith.addf %169, %172 : vector<16x32xf32>
    %174 = vector.extract_strided_slice %159 {offsets = [0, 0], sizes = [8, 8], strides = [1, 1]} : vector<8x32xf32> to vector<8x8xf32>
    %175 = arith.truncf %174 : vector<8x8xf32> to vector<8x8xbf16>
    %176 = vector.extract_strided_slice %166 {offsets = [0, 0], sizes = [16, 8], strides = [1, 1]} : vector<16x32xf32> to vector<16x8xf32>
    %177 = arith.truncf %176 : vector<16x8xf32> to vector<16x8xbf16>
    %178 = vector.extract_strided_slice %173 {offsets = [0, 0], sizes = [16, 8], strides = [1, 1]} : vector<16x32xf32> to vector<16x8xf32>
    %179 = arith.truncf %178 : vector<16x8xf32> to vector<16x8xbf16>
    %cst_93 = arith.constant dense<0.000000e+00> : vector<8x16xf32>
    %180 = tpu.matmul %175, %177, %cst_93 {dimension_numbers = #tpu.dot_dimension_numbers<[1], [1], [0], [0], [0, 0, 1, 0], [], []>} : vector<8x8xbf16>, vector<16x8xbf16>, vector<8x16xf32> -> vector<8x16xf32>
    %181 = arith.addf %180, %10 : vector<8x16xf32>
    %cst_94 = arith.constant dense<0xFF800000> : vector<8xf32>
    %182 = vector.multi_reduction <maximumf>, %181, %cst_94 [1] : vector<8x16xf32> to vector<8xf32>
    %183 = vector.shape_cast %182 : vector<8xf32> to vector<8x1xf32>
    %184 = vector.broadcast %183 : vector<8x1xf32> to vector<8x16xf32>
    %185 = arith.subf %181, %184 : vector<8x16xf32>
    %186 = math.exp %185 : vector<8x16xf32>
    %cst_95 = arith.constant dense<0.000000e+00> : vector<8xf32>
    %187 = vector.multi_reduction <add>, %186, %cst_95 [1] : vector<8x16xf32> to vector<8xf32>
    %188 = vector.shape_cast %187 : vector<8xf32> to vector<8x1xf32>
    %189 = tpu.reciprocal %188 {approx = true} : vector<8x1xf32> -> vector<8x1xf32>
    %190 = vector.broadcast %189 : vector<8x1xf32> to vector<8x16xf32>
    %191 = arith.mulf %186, %190 : vector<8x16xf32>
    %192 = arith.truncf %191 : vector<8x16xf32> to vector<8x16xbf16>
    %cst_96 = arith.constant dense<0.000000e+00> : vector<8x8xf32>
    %193 = tpu.matmul %192, %179, %cst_96 {dimension_numbers = #tpu.dot_dimension_numbers<[1], [0], [0], [1], [0, 0, 1, 1], [], []>} : vector<8x16xbf16>, vector<16x8xbf16>, vector<8x8xf32> -> vector<8x8xf32>
    %c0_97 = arith.constant 0 : index
    %c0_98 = arith.constant 0 : index
    %194 = vector.load %arg20[%c0_97, %c0_98] : memref<8x32xf32, #tpu.memory_space<vmem>>, vector<8x8xf32>
    tpu.vector_store %arg20[%c0_97, %c0_98], %193 {strides = array<i32>} : memref<8x32xf32, #tpu.memory_space<vmem>>, vector<8x8xf32>,
    %195 = vector.extract_strided_slice %159 {offsets = [0, 8], sizes = [8, 8], strides = [1, 1]} : vector<8x32xf32> to vector<8x8xf32>
    %196 = arith.truncf %195 : vector<8x8xf32> to vector<8x8xbf16>
    %197 = vector.extract_strided_slice %166 {offsets = [0, 8], sizes = [16, 8], strides = [1, 1]} : vector<16x32xf32> to vector<16x8xf32>
    %198 = arith.truncf %197 : vector<16x8xf32> to vector<16x8xbf16>
    %199 = vector.extract_strided_slice %173 {offsets = [0, 8], sizes = [16, 8], strides = [1, 1]} : vector<16x32xf32> to vector<16x8xf32>
    %200 = arith.truncf %199 : vector<16x8xf32> to vector<16x8xbf16>
    %cst_99 = arith.constant dense<0.000000e+00> : vector<8x16xf32>
    %201 = tpu.matmul %196, %198, %cst_99 {dimension_numbers = #tpu.dot_dimension_numbers<[1], [1], [0], [0], [0, 0, 1, 0], [], []>} : vector<8x8xbf16>, vector<16x8xbf16>, vector<8x16xf32> -> vector<8x16xf32>
    %202 = arith.addf %201, %10 : vector<8x16xf32>
    %cst_100 = arith.constant dense<0xFF800000> : vector<8xf32>
    %203 = vector.multi_reduction <maximumf>, %202, %cst_100 [1] : vector<8x16xf32> to vector<8xf32>
    %204 = vector.shape_cast %203 : vector<8xf32> to vector<8x1xf32>
    %205 = vector.broadcast %204 : vector<8x1xf32> to vector<8x16xf32>
    %206 = arith.subf %202, %205 : vector<8x16xf32>
    %207 = math.exp %206 : vector<8x16xf32>
    %cst_101 = arith.constant dense<0.000000e+00> : vector<8xf32>
    %208 = vector.multi_reduction <add>, %207, %cst_101 [1] : vector<8x16xf32> to vector<8xf32>
    %209 = vector.shape_cast %208 : vector<8xf32> to vector<8x1xf32>
    %210 = tpu.reciprocal %209 {approx = true} : vector<8x1xf32> -> vector<8x1xf32>
    %211 = vector.broadcast %210 : vector<8x1xf32> to vector<8x16xf32>
    %212 = arith.mulf %207, %211 : vector<8x16xf32>
    %213 = arith.truncf %212 : vector<8x16xf32> to vector<8x16xbf16>
    %cst_102 = arith.constant dense<0.000000e+00> : vector<8x8xf32>
    %214 = tpu.matmul %213, %200, %cst_102 {dimension_numbers = #tpu.dot_dimension_numbers<[1], [0], [0], [1], [0, 0, 1, 1], [], []>} : vector<8x16xbf16>, vector<16x8xbf16>, vector<8x8xf32> -> vector<8x8xf32>
    %c0_103 = arith.constant 0 : index
    %c8_104 = arith.constant 8 : index
    %215 = vector.load %arg20[%c0_103, %c8_104] : memref<8x32xf32, #tpu.memory_space<vmem>>, vector<8x8xf32>
    tpu.vector_store %arg20[%c0_103, %c8_104], %214 {strides = array<i32>} : memref<8x32xf32, #tpu.memory_space<vmem>>, vector<8x8xf32>,
    %216 = vector.extract_strided_slice %159 {offsets = [0, 16], sizes = [8, 8], strides = [1, 1]} : vector<8x32xf32> to vector<8x8xf32>
    %217 = arith.truncf %216 : vector<8x8xf32> to vector<8x8xbf16>
    %218 = vector.extract_strided_slice %166 {offsets = [0, 16], sizes = [16, 8], strides = [1, 1]} : vector<16x32xf32> to vector<16x8xf32>
    %219 = arith.truncf %218 : vector<16x8xf32> to vector<16x8xbf16>
    %220 = vector.extract_strided_slice %173 {offsets = [0, 16], sizes = [16, 8], strides = [1, 1]} : vector<16x32xf32> to vector<16x8xf32>
    %221 = arith.truncf %220 : vector<16x8xf32> to vector<16x8xbf16>
    %cst_105 = arith.constant dense<0.000000e+00> : vector<8x16xf32>
    %222 = tpu.matmul %217, %219, %cst_105 {dimension_numbers = #tpu.dot_dimension_numbers<[1], [1], [0], [0], [0, 0, 1, 0], [], []>} : vector<8x8xbf16>, vector<16x8xbf16>, vector<8x16xf32> -> vector<8x16xf32>
    %223 = arith.addf %222, %10 : vector<8x16xf32>
    %cst_106 = arith.constant dense<0xFF800000> : vector<8xf32>
    %224 = vector.multi_reduction <maximumf>, %223, %cst_106 [1] : vector<8x16xf32> to vector<8xf32>
    %225 = vector.shape_cast %224 : vector<8xf32> to vector<8x1xf32>
    %226 = vector.broadcast %225 : vector<8x1xf32> to vector<8x16xf32>
    %227 = arith.subf %223, %226 : vector<8x16xf32>
    %228 = math.exp %227 : vector<8x16xf32>
    %cst_107 = arith.constant dense<0.000000e+00> : vector<8xf32>
    %229 = vector.multi_reduction <add>, %228, %cst_107 [1] : vector<8x16xf32> to vector<8xf32>
    %230 = vector.shape_cast %229 : vector<8xf32> to vector<8x1xf32>
    %231 = tpu.reciprocal %230 {approx = true} : vector<8x1xf32> -> vector<8x1xf32>
    %232 = vector.broadcast %231 : vector<8x1xf32> to vector<8x16xf32>
    %233 = arith.mulf %228, %232 : vector<8x16xf32>
    %234 = arith.truncf %233 : vector<8x16xf32> to vector<8x16xbf16>
    %cst_108 = arith.constant dense<0.000000e+00> : vector<8x8xf32>
    %235 = tpu.matmul %234, %221, %cst_108 {dimension_numbers = #tpu.dot_dimension_numbers<[1], [0], [0], [1], [0, 0, 1, 1], [], []>} : vector<8x16xbf16>, vector<16x8xbf16>, vector<8x8xf32> -> vector<8x8xf32>
    %c0_109 = arith.constant 0 : index
    %c16_110 = arith.constant 16 : index
    %236 = vector.load %arg20[%c0_109, %c16_110] : memref<8x32xf32, #tpu.memory_space<vmem>>, vector<8x8xf32>
    tpu.vector_store %arg20[%c0_109, %c16_110], %235 {strides = array<i32>} : memref<8x32xf32, #tpu.memory_space<vmem>>, vector<8x8xf32>,
    %237 = vector.extract_strided_slice %159 {offsets = [0, 24], sizes = [8, 8], strides = [1, 1]} : vector<8x32xf32> to vector<8x8xf32>
    %238 = arith.truncf %237 : vector<8x8xf32> to vector<8x8xbf16>
    %239 = vector.extract_strided_slice %166 {offsets = [0, 24], sizes = [16, 8], strides = [1, 1]} : vector<16x32xf32> to vector<16x8xf32>
    %240 = arith.truncf %239 : vector<16x8xf32> to vector<16x8xbf16>
    %241 = vector.extract_strided_slice %173 {offsets = [0, 24], sizes = [16, 8], strides = [1, 1]} : vector<16x32xf32> to vector<16x8xf32>
    %242 = arith.truncf %241 : vector<16x8xf32> to vector<16x8xbf16>
    %cst_111 = arith.constant dense<0.000000e+00> : vector<8x16xf32>
    %243 = tpu.matmul %238, %240, %cst_111 {dimension_numbers = #tpu.dot_dimension_numbers<[1], [1], [0], [0], [0, 0, 1, 0], [], []>} : vector<8x8xbf16>, vector<16x8xbf16>, vector<8x16xf32> -> vector<8x16xf32>
    %244 = arith.addf %243, %10 : vector<8x16xf32>
    %cst_112 = arith.constant dense<0xFF800000> : vector<8xf32>
    %245 = vector.multi_reduction <maximumf>, %244, %cst_112 [1] : vector<8x16xf32> to vector<8xf32>
    %246 = vector.shape_cast %245 : vector<8xf32> to vector<8x1xf32>
    %247 = vector.broadcast %246 : vector<8x1xf32> to vector<8x16xf32>
    %248 = arith.subf %244, %247 : vector<8x16xf32>
    %249 = math.exp %248 : vector<8x16xf32>
    %cst_113 = arith.constant dense<0.000000e+00> : vector<8xf32>
    %250 = vector.multi_reduction <add>, %249, %cst_113 [1] : vector<8x16xf32> to vector<8xf32>
    %251 = vector.shape_cast %250 : vector<8xf32> to vector<8x1xf32>
    %252 = tpu.reciprocal %251 {approx = true} : vector<8x1xf32> -> vector<8x1xf32>
    %253 = vector.broadcast %252 : vector<8x1xf32> to vector<8x16xf32>
    %254 = arith.mulf %249, %253 : vector<8x16xf32>
    %255 = arith.truncf %254 : vector<8x16xf32> to vector<8x16xbf16>
    %cst_114 = arith.constant dense<0.000000e+00> : vector<8x8xf32>
    %256 = tpu.matmul %255, %242, %cst_114 {dimension_numbers = #tpu.dot_dimension_numbers<[1], [0], [0], [1], [0, 0, 1, 1], [], []>} : vector<8x16xbf16>, vector<16x8xbf16>, vector<8x8xf32> -> vector<8x8xf32>
    %c0_115 = arith.constant 0 : index
    %c24_116 = arith.constant 24 : index
    %257 = vector.load %arg20[%c0_115, %c24_116] : memref<8x32xf32, #tpu.memory_space<vmem>>, vector<8x8xf32>
    tpu.vector_store %arg20[%c0_115, %c24_116], %256 {strides = array<i32>} : memref<8x32xf32, #tpu.memory_space<vmem>>, vector<8x8xf32>,
    %c0_117 = arith.constant 0 : index
    %c0_118 = arith.constant 0 : index
    %258 = vector.load %arg20[%c0_117, %c0_118] : memref<8x32xf32, #tpu.memory_space<vmem>>, vector<8x32xf32>
    %259 = arith.truncf %258 : vector<8x32xf32> to vector<8x32xbf16>
    %c1_119 = arith.constant 1 : index
    %c0_120 = arith.constant 0 : index
    %c0_121 = arith.constant 0 : index
    %260 = vector.load %arg9[%c1_119, %c0_120, %c0_121] : memref<3x32x32xbf16, #tpu.memory_space<vmem>>, vector<1x32x32xbf16>
    %261 = vector.shape_cast %260 : vector<1x32x32xbf16> to vector<32x32xbf16>
    %cst_122 = arith.constant dense<0.000000e+00> : vector<8x32xf32>
    %262 = tpu.matmul %259, %261, %cst_122 {dimension_numbers = #tpu.dot_dimension_numbers<[1], [0], [0], [1], [0, 0, 1, 1], [], []>} : vector<8x32xbf16>, vector<32x32xbf16>, vector<8x32xf32> -> vector<8x32xf32>
    %c1_123 = arith.constant 1 : index
    %c0_124 = arith.constant 0 : index
    %c0_125 = arith.constant 0 : index
    %263 = vector.load %arg13[%c1_123, %c0_124, %c0_125] : memref<3x1x32xf32, #tpu.memory_space<vmem>>, vector<1x1x32xf32>
    %264 = vector.shape_cast %263 : vector<1x1x32xf32> to vector<1x32xf32>
    %265 = vector.broadcast %264 : vector<1x32xf32> to vector<8x32xf32>
    %266 = arith.addf %262, %265 : vector<8x32xf32>
    %267 = arith.addf %266, %151 : vector<8x32xf32>
    %cst_126 = arith.constant dense<0.000000e+00> : vector<8xf32>
    %268 = vector.multi_reduction <add>, %267, %cst_126 [1] : vector<8x32xf32> to vector<8xf32>
    %269 = vector.shape_cast %268 : vector<8xf32> to vector<8x1xf32>
    %cst_127 = arith.constant 3.200000e+01 : f32
    %270 = vector.broadcast %cst_127 : f32 to vector<8x1xf32>
    %271 = arith.divf %269, %270 : vector<8x1xf32>
    %272 = arith.mulf %267, %267 : vector<8x32xf32>
    %cst_128 = arith.constant dense<0.000000e+00> : vector<8xf32>
    %273 = vector.multi_reduction <add>, %272, %cst_128 [1] : vector<8x32xf32> to vector<8xf32>
    %274 = vector.shape_cast %273 : vector<8xf32> to vector<8x1xf32>
    %cst_129 = arith.constant 3.200000e+01 : f32
    %275 = vector.broadcast %cst_129 : f32 to vector<8x1xf32>
    %276 = arith.divf %274, %275 : vector<8x1xf32>
    %277 = arith.mulf %271, %271 : vector<8x1xf32>
    %278 = arith.subf %276, %277 : vector<8x1xf32>
    %279 = vector.broadcast %271 : vector<8x1xf32> to vector<8x32xf32>
    %280 = arith.subf %267, %279 : vector<8x32xf32>
    %cst_130 = arith.constant 9.99999974E-6 : f32
    %281 = vector.broadcast %cst_130 : f32 to vector<8x1xf32>
    %282 = arith.addf %278, %281 : vector<8x1xf32>
    %283 = math.rsqrt %282 : vector<8x1xf32>
    %284 = vector.broadcast %283 : vector<8x1xf32> to vector<8x32xf32>
    %285 = arith.mulf %280, %284 : vector<8x32xf32>
    %c1_131 = arith.constant 1 : index
    %c0_132 = arith.constant 0 : index
    %c0_133 = arith.constant 0 : index
    %286 = vector.load %arg14[%c1_131, %c0_132, %c0_133] : memref<3x1x32xf32, #tpu.memory_space<vmem>>, vector<1x1x32xf32>
    %287 = vector.shape_cast %286 : vector<1x1x32xf32> to vector<1x32xf32>
    %288 = vector.broadcast %287 : vector<1x32xf32> to vector<8x32xf32>
    %289 = arith.mulf %285, %288 : vector<8x32xf32>
    %c1_134 = arith.constant 1 : index
    %c0_135 = arith.constant 0 : index
    %c0_136 = arith.constant 0 : index
    %290 = vector.load %arg15[%c1_134, %c0_135, %c0_136] : memref<3x1x32xf32, #tpu.memory_space<vmem>>, vector<1x1x32xf32>
    %291 = vector.shape_cast %290 : vector<1x1x32xf32> to vector<1x32xf32>
    %292 = vector.broadcast %291 : vector<1x32xf32> to vector<8x32xf32>
    %293 = arith.addf %289, %292 : vector<8x32xf32>
    %c2 = arith.constant 2 : index
    %c0_137 = arith.constant 0 : index
    %c0_138 = arith.constant 0 : index
    %294 = vector.load %arg6[%c2, %c0_137, %c0_138] : memref<3x32x32xbf16, #tpu.memory_space<vmem>>, vector<1x32x32xbf16>
    %295 = vector.shape_cast %294 : vector<1x32x32xbf16> to vector<32x32xbf16>
    %cst_139 = arith.constant dense<0.000000e+00> : vector<8x32xf32>
    %296 = tpu.matmul %152, %295, %cst_139 {dimension_numbers = #tpu.dot_dimension_numbers<[1], [0], [0], [1], [0, 0, 1, 1], [], []>} : vector<8x32xbf16>, vector<32x32xbf16>, vector<8x32xf32> -> vector<8x32xf32>
    %c2_140 = arith.constant 2 : index
    %c0_141 = arith.constant 0 : index
    %c0_142 = arith.constant 0 : index
    %297 = vector.load %arg10[%c2_140, %c0_141, %c0_142] : memref<3x1x32xf32, #tpu.memory_space<vmem>>, vector<1x1x32xf32>
    %298 = vector.shape_cast %297 : vector<1x1x32xf32> to vector<1x32xf32>
    %299 = vector.broadcast %298 : vector<1x32xf32> to vector<8x32xf32>
    %300 = arith.addf %296, %299 : vector<8x32xf32>
    %c2_143 = arith.constant 2 : index
    %c0_144 = arith.constant 0 : index
    %c0_145 = arith.constant 0 : index
    %301 = vector.load %arg7[%c2_143, %c0_144, %c0_145] : memref<3x32x32xbf16, #tpu.memory_space<vmem>>, vector<1x32x32xbf16>
    %302 = vector.shape_cast %301 : vector<1x32x32xbf16> to vector<32x32xbf16>
    %cst_146 = arith.constant dense<0.000000e+00> : vector<16x32xf32>
    %303 = tpu.matmul %8, %302, %cst_146 {dimension_numbers = #tpu.dot_dimension_numbers<[1], [0], [0], [1], [0, 0, 1, 1], [], []>} : vector<16x32xbf16>, vector<32x32xbf16>, vector<16x32xf32> -> vector<16x32xf32>
    %c2_147 = arith.constant 2 : index
    %c0_148 = arith.constant 0 : index
    %c0_149 = arith.constant 0 : index
    %304 = vector.load %arg11[%c2_147, %c0_148, %c0_149] : memref<3x1x32xf32, #tpu.memory_space<vmem>>, vector<1x1x32xf32>
    %305 = vector.shape_cast %304 : vector<1x1x32xf32> to vector<1x32xf32>
    %306 = vector.broadcast %305 : vector<1x32xf32> to vector<16x32xf32>
    %307 = arith.addf %303, %306 : vector<16x32xf32>
    %c2_150 = arith.constant 2 : index
    %c0_151 = arith.constant 0 : index
    %c0_152 = arith.constant 0 : index
    %308 = vector.load %arg8[%c2_150, %c0_151, %c0_152] : memref<3x32x32xbf16, #tpu.memory_space<vmem>>, vector<1x32x32xbf16>
    %309 = vector.shape_cast %308 : vector<1x32x32xbf16> to vector<32x32xbf16>
    %cst_153 = arith.constant dense<0.000000e+00> : vector<16x32xf32>
    %310 = tpu.matmul %8, %309, %cst_153 {dimension_numbers = #tpu.dot_dimension_numbers<[1], [0], [0], [1], [0, 0, 1, 1], [], []>} : vector<16x32xbf16>, vector<32x32xbf16>, vector<16x32xf32> -> vector<16x32xf32>
    %c2_154 = arith.constant 2 : index
    %c0_155 = arith.constant 0 : index
    %c0_156 = arith.constant 0 : index
    %311 = vector.load %arg12[%c2_154, %c0_155, %c0_156] : memref<3x1x32xf32, #tpu.memory_space<vmem>>, vector<1x1x32xf32>
    %312 = vector.shape_cast %311 : vector<1x1x32xf32> to vector<1x32xf32>
    %313 = vector.broadcast %312 : vector<1x32xf32> to vector<16x32xf32>
    %314 = arith.addf %310, %313 : vector<16x32xf32>
    %315 = vector.extract_strided_slice %300 {offsets = [0, 0], sizes = [8, 8], strides = [1, 1]} : vector<8x32xf32> to vector<8x8xf32>
    %316 = arith.truncf %315 : vector<8x8xf32> to vector<8x8xbf16>
    %317 = vector.extract_strided_slice %307 {offsets = [0, 0], sizes = [16, 8], strides = [1, 1]} : vector<16x32xf32> to vector<16x8xf32>
    %318 = arith.truncf %317 : vector<16x8xf32> to vector<16x8xbf16>
    %319 = vector.extract_strided_slice %314 {offsets = [0, 0], sizes = [16, 8], strides = [1, 1]} : vector<16x32xf32> to vector<16x8xf32>
    %320 = arith.truncf %319 : vector<16x8xf32> to vector<16x8xbf16>
    %cst_157 = arith.constant dense<0.000000e+00> : vector<8x16xf32>
    %321 = tpu.matmul %316, %318, %cst_157 {dimension_numbers = #tpu.dot_dimension_numbers<[1], [1], [0], [0], [0, 0, 1, 0], [], []>} : vector<8x8xbf16>, vector<16x8xbf16>, vector<8x16xf32> -> vector<8x16xf32>
    %322 = arith.addf %321, %10 : vector<8x16xf32>
    %cst_158 = arith.constant dense<0xFF800000> : vector<8xf32>
    %323 = vector.multi_reduction <maximumf>, %322, %cst_158 [1] : vector<8x16xf32> to vector<8xf32>
    %324 = vector.shape_cast %323 : vector<8xf32> to vector<8x1xf32>
    %325 = vector.broadcast %324 : vector<8x1xf32> to vector<8x16xf32>
    %326 = arith.subf %322, %325 : vector<8x16xf32>
    %327 = math.exp %326 : vector<8x16xf32>
    %cst_159 = arith.constant dense<0.000000e+00> : vector<8xf32>
    %328 = vector.multi_reduction <add>, %327, %cst_159 [1] : vector<8x16xf32> to vector<8xf32>
    %329 = vector.shape_cast %328 : vector<8xf32> to vector<8x1xf32>
    %330 = tpu.reciprocal %329 {approx = true} : vector<8x1xf32> -> vector<8x1xf32>
    %331 = vector.broadcast %330 : vector<8x1xf32> to vector<8x16xf32>
    %332 = arith.mulf %327, %331 : vector<8x16xf32>
    %333 = arith.truncf %332 : vector<8x16xf32> to vector<8x16xbf16>
    %cst_160 = arith.constant dense<0.000000e+00> : vector<8x8xf32>
    %334 = tpu.matmul %333, %320, %cst_160 {dimension_numbers = #tpu.dot_dimension_numbers<[1], [0], [0], [1], [0, 0, 1, 1], [], []>} : vector<8x16xbf16>, vector<16x8xbf16>, vector<8x8xf32> -> vector<8x8xf32>
    %c0_161 = arith.constant 0 : index
    %c0_162 = arith.constant 0 : index
    %335 = vector.load %arg20[%c0_161, %c0_162] : memref<8x32xf32, #tpu.memory_space<vmem>>, vector<8x8xf32>
    tpu.vector_store %arg20[%c0_161, %c0_162], %334 {strides = array<i32>} : memref<8x32xf32, #tpu.memory_space<vmem>>, vector<8x8xf32>,
    %336 = vector.extract_strided_slice %300 {offsets = [0, 8], sizes = [8, 8], strides = [1, 1]} : vector<8x32xf32> to vector<8x8xf32>
    %337 = arith.truncf %336 : vector<8x8xf32> to vector<8x8xbf16>
    %338 = vector.extract_strided_slice %307 {offsets = [0, 8], sizes = [16, 8], strides = [1, 1]} : vector<16x32xf32> to vector<16x8xf32>
    %339 = arith.truncf %338 : vector<16x8xf32> to vector<16x8xbf16>
    %340 = vector.extract_strided_slice %314 {offsets = [0, 8], sizes = [16, 8], strides = [1, 1]} : vector<16x32xf32> to vector<16x8xf32>
    %341 = arith.truncf %340 : vector<16x8xf32> to vector<16x8xbf16>
    %cst_163 = arith.constant dense<0.000000e+00> : vector<8x16xf32>
    %342 = tpu.matmul %337, %339, %cst_163 {dimension_numbers = #tpu.dot_dimension_numbers<[1], [1], [0], [0], [0, 0, 1, 0], [], []>} : vector<8x8xbf16>, vector<16x8xbf16>, vector<8x16xf32> -> vector<8x16xf32>
    %343 = arith.addf %342, %10 : vector<8x16xf32>
    %cst_164 = arith.constant dense<0xFF800000> : vector<8xf32>
    %344 = vector.multi_reduction <maximumf>, %343, %cst_164 [1] : vector<8x16xf32> to vector<8xf32>
    %345 = vector.shape_cast %344 : vector<8xf32> to vector<8x1xf32>
    %346 = vector.broadcast %345 : vector<8x1xf32> to vector<8x16xf32>
    %347 = arith.subf %343, %346 : vector<8x16xf32>
    %348 = math.exp %347 : vector<8x16xf32>
    %cst_165 = arith.constant dense<0.000000e+00> : vector<8xf32>
    %349 = vector.multi_reduction <add>, %348, %cst_165 [1] : vector<8x16xf32> to vector<8xf32>
    %350 = vector.shape_cast %349 : vector<8xf32> to vector<8x1xf32>
    %351 = tpu.reciprocal %350 {approx = true} : vector<8x1xf32> -> vector<8x1xf32>
    %352 = vector.broadcast %351 : vector<8x1xf32> to vector<8x16xf32>
    %353 = arith.mulf %348, %352 : vector<8x16xf32>
    %354 = arith.truncf %353 : vector<8x16xf32> to vector<8x16xbf16>
    %cst_166 = arith.constant dense<0.000000e+00> : vector<8x8xf32>
    %355 = tpu.matmul %354, %341, %cst_166 {dimension_numbers = #tpu.dot_dimension_numbers<[1], [0], [0], [1], [0, 0, 1, 1], [], []>} : vector<8x16xbf16>, vector<16x8xbf16>, vector<8x8xf32> -> vector<8x8xf32>
    %c0_167 = arith.constant 0 : index
    %c8_168 = arith.constant 8 : index
    %356 = vector.load %arg20[%c0_167, %c8_168] : memref<8x32xf32, #tpu.memory_space<vmem>>, vector<8x8xf32>
    tpu.vector_store %arg20[%c0_167, %c8_168], %355 {strides = array<i32>} : memref<8x32xf32, #tpu.memory_space<vmem>>, vector<8x8xf32>,
    %357 = vector.extract_strided_slice %300 {offsets = [0, 16], sizes = [8, 8], strides = [1, 1]} : vector<8x32xf32> to vector<8x8xf32>
    %358 = arith.truncf %357 : vector<8x8xf32> to vector<8x8xbf16>
    %359 = vector.extract_strided_slice %307 {offsets = [0, 16], sizes = [16, 8], strides = [1, 1]} : vector<16x32xf32> to vector<16x8xf32>
    %360 = arith.truncf %359 : vector<16x8xf32> to vector<16x8xbf16>
    %361 = vector.extract_strided_slice %314 {offsets = [0, 16], sizes = [16, 8], strides = [1, 1]} : vector<16x32xf32> to vector<16x8xf32>
    %362 = arith.truncf %361 : vector<16x8xf32> to vector<16x8xbf16>
    %cst_169 = arith.constant dense<0.000000e+00> : vector<8x16xf32>
    %363 = tpu.matmul %358, %360, %cst_169 {dimension_numbers = #tpu.dot_dimension_numbers<[1], [1], [0], [0], [0, 0, 1, 0], [], []>} : vector<8x8xbf16>, vector<16x8xbf16>, vector<8x16xf32> -> vector<8x16xf32>
    %364 = arith.addf %363, %10 : vector<8x16xf32>
    %cst_170 = arith.constant dense<0xFF800000> : vector<8xf32>
    %365 = vector.multi_reduction <maximumf>, %364, %cst_170 [1] : vector<8x16xf32> to vector<8xf32>
    %366 = vector.shape_cast %365 : vector<8xf32> to vector<8x1xf32>
    %367 = vector.broadcast %366 : vector<8x1xf32> to vector<8x16xf32>
    %368 = arith.subf %364, %367 : vector<8x16xf32>
    %369 = math.exp %368 : vector<8x16xf32>
    %cst_171 = arith.constant dense<0.000000e+00> : vector<8xf32>
    %370 = vector.multi_reduction <add>, %369, %cst_171 [1] : vector<8x16xf32> to vector<8xf32>
    %371 = vector.shape_cast %370 : vector<8xf32> to vector<8x1xf32>
    %372 = tpu.reciprocal %371 {approx = true} : vector<8x1xf32> -> vector<8x1xf32>
    %373 = vector.broadcast %372 : vector<8x1xf32> to vector<8x16xf32>
    %374 = arith.mulf %369, %373 : vector<8x16xf32>
    %375 = arith.truncf %374 : vector<8x16xf32> to vector<8x16xbf16>
    %cst_172 = arith.constant dense<0.000000e+00> : vector<8x8xf32>
    %376 = tpu.matmul %375, %362, %cst_172 {dimension_numbers = #tpu.dot_dimension_numbers<[1], [0], [0], [1], [0, 0, 1, 1], [], []>} : vector<8x16xbf16>, vector<16x8xbf16>, vector<8x8xf32> -> vector<8x8xf32>
    %c0_173 = arith.constant 0 : index
    %c16_174 = arith.constant 16 : index
    %377 = vector.load %arg20[%c0_173, %c16_174] : memref<8x32xf32, #tpu.memory_space<vmem>>, vector<8x8xf32>
    tpu.vector_store %arg20[%c0_173, %c16_174], %376 {strides = array<i32>} : memref<8x32xf32, #tpu.memory_space<vmem>>, vector<8x8xf32>,
    %378 = vector.extract_strided_slice %300 {offsets = [0, 24], sizes = [8, 8], strides = [1, 1]} : vector<8x32xf32> to vector<8x8xf32>
    %379 = arith.truncf %378 : vector<8x8xf32> to vector<8x8xbf16>
    %380 = vector.extract_strided_slice %307 {offsets = [0, 24], sizes = [16, 8], strides = [1, 1]} : vector<16x32xf32> to vector<16x8xf32>
    %381 = arith.truncf %380 : vector<16x8xf32> to vector<16x8xbf16>
    %382 = vector.extract_strided_slice %314 {offsets = [0, 24], sizes = [16, 8], strides = [1, 1]} : vector<16x32xf32> to vector<16x8xf32>
    %383 = arith.truncf %382 : vector<16x8xf32> to vector<16x8xbf16>
    %cst_175 = arith.constant dense<0.000000e+00> : vector<8x16xf32>
    %384 = tpu.matmul %379, %381, %cst_175 {dimension_numbers = #tpu.dot_dimension_numbers<[1], [1], [0], [0], [0, 0, 1, 0], [], []>} : vector<8x8xbf16>, vector<16x8xbf16>, vector<8x16xf32> -> vector<8x16xf32>
    %385 = arith.addf %384, %10 : vector<8x16xf32>
    %cst_176 = arith.constant dense<0xFF800000> : vector<8xf32>
    %386 = vector.multi_reduction <maximumf>, %385, %cst_176 [1] : vector<8x16xf32> to vector<8xf32>
    %387 = vector.shape_cast %386 : vector<8xf32> to vector<8x1xf32>
    %388 = vector.broadcast %387 : vector<8x1xf32> to vector<8x16xf32>
    %389 = arith.subf %385, %388 : vector<8x16xf32>
    %390 = math.exp %389 : vector<8x16xf32>
    %cst_177 = arith.constant dense<0.000000e+00> : vector<8xf32>
    %391 = vector.multi_reduction <add>, %390, %cst_177 [1] : vector<8x16xf32> to vector<8xf32>
    %392 = vector.shape_cast %391 : vector<8xf32> to vector<8x1xf32>
    %393 = tpu.reciprocal %392 {approx = true} : vector<8x1xf32> -> vector<8x1xf32>
    %394 = vector.broadcast %393 : vector<8x1xf32> to vector<8x16xf32>
    %395 = arith.mulf %390, %394 : vector<8x16xf32>
    %396 = arith.truncf %395 : vector<8x16xf32> to vector<8x16xbf16>
    %cst_178 = arith.constant dense<0.000000e+00> : vector<8x8xf32>
    %397 = tpu.matmul %396, %383, %cst_178 {dimension_numbers = #tpu.dot_dimension_numbers<[1], [0], [0], [1], [0, 0, 1, 1], [], []>} : vector<8x16xbf16>, vector<16x8xbf16>, vector<8x8xf32> -> vector<8x8xf32>
    %c0_179 = arith.constant 0 : index
    %c24_180 = arith.constant 24 : index
    %398 = vector.load %arg20[%c0_179, %c24_180] : memref<8x32xf32, #tpu.memory_space<vmem>>, vector<8x8xf32>
    tpu.vector_store %arg20[%c0_179, %c24_180], %397 {strides = array<i32>} : memref<8x32xf32, #tpu.memory_space<vmem>>, vector<8x8xf32>,
    %c0_181 = arith.constant 0 : index
    %c0_182 = arith.constant 0 : index
    %399 = vector.load %arg20[%c0_181, %c0_182] : memref<8x32xf32, #tpu.memory_space<vmem>>, vector<8x32xf32>
    %400 = arith.truncf %399 : vector<8x32xf32> to vector<8x32xbf16>
    %c2_183 = arith.constant 2 : index
    %c0_184 = arith.constant 0 : index
    %c0_185 = arith.constant 0 : index
    %401 = vector.load %arg9[%c2_183, %c0_184, %c0_185] : memref<3x32x32xbf16, #tpu.memory_space<vmem>>, vector<1x32x32xbf16>
    %402 = vector.shape_cast %401 : vector<1x32x32xbf16> to vector<32x32xbf16>
    %cst_186 = arith.constant dense<0.000000e+00> : vector<8x32xf32>
    %403 = tpu.matmul %400, %402, %cst_186 {dimension_numbers = #tpu.dot_dimension_numbers<[1], [0], [0], [1], [0, 0, 1, 1], [], []>} : vector<8x32xbf16>, vector<32x32xbf16>, vector<8x32xf32> -> vector<8x32xf32>
    %c2_187 = arith.constant 2 : index
    %c0_188 = arith.constant 0 : index
    %c0_189 = arith.constant 0 : index
    %404 = vector.load %arg13[%c2_187, %c0_188, %c0_189] : memref<3x1x32xf32, #tpu.memory_space<vmem>>, vector<1x1x32xf32>
    %405 = vector.shape_cast %404 : vector<1x1x32xf32> to vector<1x32xf32>
    %406 = vector.broadcast %405 : vector<1x32xf32> to vector<8x32xf32>
    %407 = arith.addf %403, %406 : vector<8x32xf32>
    %408 = arith.addf %407, %151 : vector<8x32xf32>
    %cst_190 = arith.constant dense<0.000000e+00> : vector<8xf32>
    %409 = vector.multi_reduction <add>, %408, %cst_190 [1] : vector<8x32xf32> to vector<8xf32>
    %410 = vector.shape_cast %409 : vector<8xf32> to vector<8x1xf32>
    %cst_191 = arith.constant 3.200000e+01 : f32
    %411 = vector.broadcast %cst_191 : f32 to vector<8x1xf32>
    %412 = arith.divf %410, %411 : vector<8x1xf32>
    %413 = arith.mulf %408, %408 : vector<8x32xf32>
    %cst_192 = arith.constant dense<0.000000e+00> : vector<8xf32>
    %414 = vector.multi_reduction <add>, %413, %cst_192 [1] : vector<8x32xf32> to vector<8xf32>
    %415 = vector.shape_cast %414 : vector<8xf32> to vector<8x1xf32>
    %cst_193 = arith.constant 3.200000e+01 : f32
    %416 = vector.broadcast %cst_193 : f32 to vector<8x1xf32>
    %417 = arith.divf %415, %416 : vector<8x1xf32>
    %418 = arith.mulf %412, %412 : vector<8x1xf32>
    %419 = arith.subf %417, %418 : vector<8x1xf32>
    %420 = vector.broadcast %412 : vector<8x1xf32> to vector<8x32xf32>
    %421 = arith.subf %408, %420 : vector<8x32xf32>
    %cst_194 = arith.constant 9.99999974E-6 : f32
    %422 = vector.broadcast %cst_194 : f32 to vector<8x1xf32>
    %423 = arith.addf %419, %422 : vector<8x1xf32>
    %424 = math.rsqrt %423 : vector<8x1xf32>
    %425 = vector.broadcast %424 : vector<8x1xf32> to vector<8x32xf32>
    %426 = arith.mulf %421, %425 : vector<8x32xf32>
    %c2_195 = arith.constant 2 : index
    %c0_196 = arith.constant 0 : index
    %c0_197 = arith.constant 0 : index
    %427 = vector.load %arg14[%c2_195, %c0_196, %c0_197] : memref<3x1x32xf32, #tpu.memory_space<vmem>>, vector<1x1x32xf32>
    %428 = vector.shape_cast %427 : vector<1x1x32xf32> to vector<1x32xf32>
    %429 = vector.broadcast %428 : vector<1x32xf32> to vector<8x32xf32>
    %430 = arith.mulf %426, %429 : vector<8x32xf32>
    %c2_198 = arith.constant 2 : index
    %c0_199 = arith.constant 0 : index
    %c0_200 = arith.constant 0 : index
    %431 = vector.load %arg15[%c2_198, %c0_199, %c0_200] : memref<3x1x32xf32, #tpu.memory_space<vmem>>, vector<1x1x32xf32>
    %432 = vector.shape_cast %431 : vector<1x1x32xf32> to vector<1x32xf32>
    %433 = vector.broadcast %432 : vector<1x32xf32> to vector<8x32xf32>
    %434 = arith.addf %430, %433 : vector<8x32xf32>
    %435 = arith.truncf %434 : vector<8x32xf32> to vector<8x32xbf16>
    %c0_201 = arith.constant 0 : index
    %c0_202 = arith.constant 0 : index
    %436 = vector.load %arg16[%c0_201, %c0_202] : memref<32x32xbf16, #tpu.memory_space<vmem>>, vector<32x32xbf16>
    %cst_203 = arith.constant dense<0.000000e+00> : vector<8x32xf32>
    %437 = tpu.matmul %435, %436, %cst_203 {dimension_numbers = #tpu.dot_dimension_numbers<[1], [0], [0], [1], [0, 0, 1, 1], [], []>} : vector<8x32xbf16>, vector<32x32xbf16>, vector<8x32xf32> -> vector<8x32xf32>
    %438 = arith.truncf %293 : vector<8x32xf32> to vector<8x32xbf16>
    %c0_204 = arith.constant 0 : index
    %c0_205 = arith.constant 0 : index
    %439 = vector.load %arg17[%c0_204, %c0_205] : memref<32x32xbf16, #tpu.memory_space<vmem>>, vector<32x32xbf16>
    %cst_206 = arith.constant dense<0.000000e+00> : vector<8x32xf32>
    %440 = tpu.matmul %438, %439, %cst_206 {dimension_numbers = #tpu.dot_dimension_numbers<[1], [0], [0], [1], [0, 0, 1, 1], [], []>} : vector<8x32xbf16>, vector<32x32xbf16>, vector<8x32xf32> -> vector<8x32xf32>
    %441 = arith.addf %437, %440 : vector<8x32xf32>
    %c0_207 = arith.constant 0 : index
    %c0_208 = arith.constant 0 : index
    %442 = vector.load %arg18[%c0_207, %c0_208] : memref<1x32xf32, #tpu.memory_space<vmem>>, vector<1x32xf32>
    %443 = vector.broadcast %442 : vector<1x32xf32> to vector<8x32xf32>
    %444 = arith.addf %441, %443 : vector<8x32xf32>
    %c0_209 = arith.constant 0 : index
    %c0_210 = arith.constant 0 : index
    %c0_211 = arith.constant 0 : index
    %445 = vector.load %arg19[%c0_209, %c0_210, %c0_211] : memref<1x8x32xf32, #tpu.memory_space<vmem>>, vector<1x8x32xf32>
    %446 = vector.shape_cast %445 : vector<1x8x32xf32> to vector<8x32xf32>
    %447 = vector.shape_cast %444 : vector<8x32xf32> to vector<1x8x32xf32>
    tpu.vector_store %arg19[%c0_209, %c0_210, %c0_211], %447 {strides = array<i32>} : memref<1x8x32xf32, #tpu.memory_space<vmem>>, vector<1x8x32xf32>,
    return
  }
  func.func @transform_0(%arg0: i32) -> (i32, i32, i32) {
    %c0_i32 = arith.constant 0 : i32
    %c0_i32_0 = arith.constant 0 : i32
    %c0_i32_1 = arith.constant 0 : i32
    return %arg0, %c0_i32, %c0_i32_0 : i32, i32, i32
  }
  func.func @transform_1(%arg0: i32) -> (i32, i32, i32) {
    %c0_i32 = arith.constant 0 : i32
    %c0_i32_0 = arith.constant 0 : i32
    %c0_i32_1 = arith.constant 0 : i32
    return %arg0, %c0_i32, %c0_i32_0 : i32, i32, i32
  }
  func.func @transform_2(%arg0: i32) -> (i32, i32, i32) {
    %c0_i32 = arith.constant 0 : i32
    %c0_i32_0 = arith.constant 0 : i32
    %c0_i32_1 = arith.constant 0 : i32
    return %arg0, %c0_i32, %c0_i32_0 : i32, i32, i32
  }
  func.func @transform_3(%arg0: i32) -> (i32, i32) {
    %c0_i32 = arith.constant 0 : i32
    %c0_i32_0 = arith.constant 0 : i32
    %c0_i32_1 = arith.constant 0 : i32
    return %c0_i32, %c0_i32_0 : i32, i32
  }
  func.func @transform_4(%arg0: i32) -> (i32, i32) {
    %c0_i32 = arith.constant 0 : i32
    %c0_i32_0 = arith.constant 0 : i32
    %c0_i32_1 = arith.constant 0 : i32
    return %c0_i32, %c0_i32_0 : i32, i32
  }
  func.func @transform_5(%arg0: i32) -> (i32, i32, i32) {
    %c0_i32 = arith.constant 0 : i32
    %c0_i32_0 = arith.constant 0 : i32
    %c0_i32_1 = arith.constant 0 : i32
    %c0_i32_2 = arith.constant 0 : i32
    return %c0_i32, %c0_i32_0, %c0_i32_1 : i32, i32, i32
  }
  func.func @transform_6(%arg0: i32) -> (i32, i32, i32) {
    %c0_i32 = arith.constant 0 : i32
    %c0_i32_0 = arith.constant 0 : i32
    %c0_i32_1 = arith.constant 0 : i32
    %c0_i32_2 = arith.constant 0 : i32
    return %c0_i32, %c0_i32_0, %c0_i32_1 : i32, i32, i32
  }
  func.func @transform_7(%arg0: i32) -> (i32, i32, i32) {
    %c0_i32 = arith.constant 0 : i32
    %c0_i32_0 = arith.constant 0 : i32
    %c0_i32_1 = arith.constant 0 : i32
    %c0_i32_2 = arith.constant 0 : i32
    return %c0_i32, %c0_i32_0, %c0_i32_1 : i32, i32, i32
  }
  func.func @transform_8(%arg0: i32) -> (i32, i32, i32) {
    %c0_i32 = arith.constant 0 : i32
    %c0_i32_0 = arith.constant 0 : i32
    %c0_i32_1 = arith.constant 0 : i32
    %c0_i32_2 = arith.constant 0 : i32
    return %c0_i32, %c0_i32_0, %c0_i32_1 : i32, i32, i32
  }
  func.func @transform_9(%arg0: i32) -> (i32, i32, i32) {
    %c0_i32 = arith.constant 0 : i32
    %c0_i32_0 = arith.constant 0 : i32
    %c0_i32_1 = arith.constant 0 : i32
    %c0_i32_2 = arith.constant 0 : i32
    return %c0_i32, %c0_i32_0, %c0_i32_1 : i32, i32, i32
  }
  func.func @transform_10(%arg0: i32) -> (i32, i32, i32) {
    %c0_i32 = arith.constant 0 : i32
    %c0_i32_0 = arith.constant 0 : i32
    %c0_i32_1 = arith.constant 0 : i32
    %c0_i32_2 = arith.constant 0 : i32
    return %c0_i32, %c0_i32_0, %c0_i32_1 : i32, i32, i32
  }
  func.func @transform_11(%arg0: i32) -> (i32, i32, i32) {
    %c0_i32 = arith.constant 0 : i32
    %c0_i32_0 = arith.constant 0 : i32
    %c0_i32_1 = arith.constant 0 : i32
    %c0_i32_2 = arith.constant 0 : i32
    return %c0_i32, %c0_i32_0, %c0_i32_1 : i32, i32, i32
  }
  func.func @transform_12(%arg0: i32) -> (i32, i32, i32) {
    %c0_i32 = arith.constant 0 : i32
    %c0_i32_0 = arith.constant 0 : i32
    %c0_i32_1 = arith.constant 0 : i32
    %c0_i32_2 = arith.constant 0 : i32
    return %c0_i32, %c0_i32_0, %c0_i32_1 : i32, i32, i32
  }
  func.func @transform_13(%arg0: i32) -> (i32, i32, i32) {
    %c0_i32 = arith.constant 0 : i32
    %c0_i32_0 = arith.constant 0 : i32
    %c0_i32_1 = arith.constant 0 : i32
    %c0_i32_2 = arith.constant 0 : i32
    return %c0_i32, %c0_i32_0, %c0_i32_1 : i32, i32, i32
  }
  func.func @transform_14(%arg0: i32) -> (i32, i32, i32) {
    %c0_i32 = arith.constant 0 : i32
    %c0_i32_0 = arith.constant 0 : i32
    %c0_i32_1 = arith.constant 0 : i32
    %c0_i32_2 = arith.constant 0 : i32
    return %c0_i32, %c0_i32_0, %c0_i32_1 : i32, i32, i32
  }
  func.func @transform_15(%arg0: i32) -> (i32, i32) {
    %c0_i32 = arith.constant 0 : i32
    %c0_i32_0 = arith.constant 0 : i32
    %c0_i32_1 = arith.constant 0 : i32
    return %c0_i32, %c0_i32_0 : i32, i32
  }
  func.func @transform_16(%arg0: i32) -> (i32, i32) {
    %c0_i32 = arith.constant 0 : i32
    %c0_i32_0 = arith.constant 0 : i32
    %c0_i32_1 = arith.constant 0 : i32
    return %c0_i32, %c0_i32_0 : i32, i32
  }
  func.func @transform_17(%arg0: i32) -> (i32, i32) {
    %c0_i32 = arith.constant 0 : i32
    %c0_i32_0 = arith.constant 0 : i32
    %c0_i32_1 = arith.constant 0 : i32
    return %c0_i32, %c0_i32_0 : i32, i32
  }
  func.func @transform_18(%arg0: i32) -> (i32, i32, i32) {
    %c0_i32 = arith.constant 0 : i32
    %c0_i32_0 = arith.constant 0 : i32
    %c0_i32_1 = arith.constant 0 : i32
    return %arg0, %c0_i32, %c0_i32_0 : i32, i32, i32
  }
}

</mosaic_0001>

<bundles_post_ra>
// kernel: tpu_custom_call.1
= control target key start
LH: loop header
LB: loop body
LE: loop exit
PB: predicated region body
PF: predicated region fallthrough
CT: control target
= control target key end

     0   :  { %s5350_s0 = inlined_call_operand.hbm [shape: f32[2,8,32], index: 0, kind: input, shape index: {}]   ;;  %s5351_s1 = inlined_call_operand.hbm [shape: f32[2,16,32], index: 1, kind: input, shape index: {}]   ;;  %s5352_s2 = inlined_call_operand.hbm [shape: f32[2,16,32], index: 2, kind: input, shape index: {}]   ;;  %s5353_s3 = inlined_call_operand.hbm [shape: f32[8,8], index: 3, kind: input, shape index: {}]   ;;  %s5354_s4 = inlined_call_operand.hbm [shape: f32[8,16], index: 4, kind: input, shape index: {}]   ;;  %s5355_s5 = inlined_call_operand.hbm [shape: bf16[3,32,32], index: 5, kind: input, shape index: {}]   ;;  %s5356_s6 = inlined_call_operand.hbm [shape: bf16[3,32,32], index: 6, kind: input, shape index: {}]   ;;  %s5357_s7 = inlined_call_operand.hbm [shape: bf16[3,32,32], index: 7, kind: input, shape index: {}]   ;;  %s5358_s8 = inlined_call_operand.hbm [shape: bf16[3,32,32], index: 8, kind: input, shape index: {}]   ;;  %s5359_s9 = inlined_call_operand.hbm [shape: f32[3,1,32], index: 9, kind: input, shape index: {}]   ;;  %s5360_s10 = inlined_call_operand.vmem [shape: f32[3,1,32], index: 10, kind: input, shape index: {}]   ;;  %s5361_s11 = inlined_call_operand.vmem [shape: f32[3,1,32], index: 11, kind: input, shape index: {}]   ;;  %s5362_s12 = inlined_call_operand.vmem [shape: f32[3,1,32], index: 12, kind: input, shape index: {}]   ;;  %s5363_s13 = inlined_call_operand.vmem [shape: f32[3,1,32], index: 13, kind: input, shape index: {}]   ;;  %s5364_s14 = inlined_call_operand.vmem [shape: f32[3,1,32], index: 14, kind: input, shape index: {}]   ;;  %s5365_s15 = inlined_call_operand.vmem [shape: bf16[32,32], index: 15, kind: input, shape index: {}]   ;;  %s5366_s16 = inlined_call_operand.vmem [shape: bf16[32,32], index: 16, kind: input, shape index: {}]   ;;  %s5367_s17 = inlined_call_operand.vmem [shape: f32[1,32], index: 17, kind: input, shape index: {}]   ;;  %s5368_s18 = inlined_call_operand.hbm [shape: f32[2,8,32], index: 18, kind: output, shape index: {}]  }
   0x1   :  { %5412 = sst [smem:[#allocation36_spill]] %s5350_s0 }
   0x2   :  { %5413 = sst [smem:[#allocation37_spill]] %s5351_s1 }
   0x3   :  { %5414 = sst [smem:[#allocation38_spill]] %s5352_s2 }
   0x4   :  { %5415 = sst [smem:[#allocation39_spill]] %s5353_s3 }
   0x5   :  { %5416 = sst [smem:[#allocation40_spill]] %s5355_s5 }
   0x6   :  { %5417 = sst [smem:[#allocation41_spill]] %s5357_s7 }
   0x7   :  { %5418 = sst [smem:[#allocation42_spill]] %s5360_s10 }
   0x8   :  { %5419 = sst [smem:[#allocation43_spill]] %s5361_s11 }
   0x9   :  { %5420 = sst [smem:[#allocation44_spill]] %s5362_s12 }
   0xa   :  { %5421 = sst [smem:[#allocation45_spill]] %s5363_s13 }
   0xb   :  { %5422 = sst [smem:[#allocation46_spill]] %s5364_s14 }
   0xc   :  { %5423 = sst [smem:[#allocation47_spill]] %s5365_s15 }
   0xd   :  { %5424 = sst [smem:[#allocation48_spill]] %s5366_s16 }
   0xe   :  { %5425 = sst [smem:[#allocation49_spill]] %s5367_s17 }
   0xf   :  { %5426 = sst [smem:[#allocation50_spill]] %s5368_s18 }
  0x10   :  { %23 = vsyncpa [#allocation4], 0 }
  0x11   :  { %25 = vsyncpa [#allocation4 + $0x1], 0 }
  0x12   :  { %26 = vsyncpa [#allocation7], 0 }
  0x13   :  { %28 = vsyncpa [#allocation7 + $0x1], 0 }
  0x14   :  { %29 = vsyncpa [#allocation10], 0 }
  0x15   :  { %30 = vsyncpa [#allocation13], 0 }
  0x16   :  { %31 = vsyncpa [#allocation16], 0 }
  0x17   :  { %32 = vsyncpa [#allocation19], 0 }
  0x18   :  { %33 = vsyncpa [#allocation5], 0 }
  0x19   :  { %35 = vsyncpa [#allocation5 + $0x1], 0  ;;  %s4556_s27 = smov 0   ;;  %s4558_s28 = smov 0  }
  0x1a   :  { %s4560_s29 = smov 0   ;;  %s4562_s30 = smov 0  }
  0x1b LB: > { %5427 = sst [smem:[#allocation28_spill]] %s4422_s27  ;;  %s4436_s0 = smov [#allocation9]   ;;  %s4434_s30 = sphi %s4562_s30, %s5488_s30   ;;  %s4430_s29 = sphi %s4560_s29, %s5490_s29   ;;  %s4426_s28 = sphi %s4558_s28, %s5492_s28   ;;  %s4422_s27 = sphi %s4556_s27, %s5491_s27  }
  0x1c   : > { %5428 = sst [smem:[#allocation29_spill]] %s4430_s29  ;;  %s478_s19 = sshll.u32 %s4436_s0, 4  ;;  %s479_s19 = int_to_ptr.vmem [resolvable:$true] %s478_s19 }
  0x1d   : > { %s4577_s1 = sadd.s32 4294967295, %s4434_s30   ;;  %p3363_p0 = scmp.ge.s32.totalorder %s4434_s30, 1 }
  0x1e   : > { %5429 = sst [smem:[#allocation30_spill]] %s4577_s1  ;;  %p5374_p1 = scmp.eq.s32.totalorder %s4577_s1, 0 }
  0x1f   : > { %p465_p2 = scmp.lt.s32.totalorder %s4434_s30, 3  ;;  %s4437_s21 = smov [#allocation12]  }
  0x20   : > { %s499_s22 = sshll.u32 %s4437_s21, 4  ;;  %s4438_s23 = smov [#allocation15]   ;;  %s4589_s22 = int_to_ptr.vmem [resolvable:$true] %s499_s22 }
  0x21   : > { %p4582_p3 = pnand %p3363_p0, %p465_p2  ;;  %s525_s24 = sshll.u32 %s4438_s23, 4  ;;  %s4597_s24 = int_to_ptr.vmem [resolvable:$true] %s525_s24 }
  0x22   : > { %s5432_s3 = sld [smem:[#allocation39_spill]] }
  0x23   : > { %s5430_s20 = scalar_select %p4582_p3, 1, 0 }
  0x24   : > { %p3875_p5 = pneg %p4582_p3 }
  0x26   : > { %p4593_p6 = pnand %p3875_p5, %p5374_p1 }
  0x28   : > { %s5431_s2 = scalar_select %p4593_p6, 1, 0 }
  0x29   : > { %s4062_s0 = scalar_lea.hbm %s5432_s3, 128  ;;  %p4607_p8 = pneg %p4593_p6 }
  0x2a   : > { %p4063_p7 = scmp.ne.s32.totalorder %s5432_s3, %s4062_s0  ;;  %p4069_p11 = scmp.lt.u32.totalorder %s4062_s0, %s5432_s3 }
  0x2b   : > { %s5433_s21 = scalar_select %p4607_p8, 1, 0 }
  0x2c   : > { %p4065_p9 = pnand %p4607_p8, %p4063_p7 }
  0x2e   : > { %p4066_p10 = pneg %p4065_p9 }
  0x30   : > { %p4071_p12 = pnand %p4069_p11, %p4066_p10 }
  0x32   : > { %4074 = shalt.err (!%p4071_p12)
}
  0x33   : > { %s4075_s25 = scalar_lea.vmem %s479_s19, 128  ;;  %p4083_p5 = scmp.lt.s32.totalorder %s479_s19, %s479_s19 }
  0x34   : > { %p4076_p13 = scmp.ne.s32.totalorder %s479_s19, %s4075_s25  ;;  %p4084_p4 = scmp.lt.s32.totalorder %s4075_s25, %s4075_s25 }
  0x36   : > { %p4078_p0 = pnand %p4076_p13, %p4607_p8  ;;  %p4085_p1 = por %p4084_p4, %p4083_p5 }
  0x38   : > { %p4079_p2 = pneg %p4078_p0 }
  0x3a   : > { %p4086_p3 = pnand %p4085_p1, %p4079_p2 }
  0x3c   : > { %4089 = shalt.err (!%p4086_p3)
}
  0x3d   : > { %3878 = dma.hbm_to_vmem [thread:$0]  (!%p4593_p6), %s5432_s3, 128, %s479_s19, [#allocation10]  }
  0x3e   : > { %s5434_s5 = sld [smem:[#allocation40_spill]] }
  0x44   : > { %s4090_s0 = scalar_lea.hbm %s5434_s5, 768 }
  0x45   : > { %p4091_p7 = scmp.ne.s32.totalorder %s5434_s5, %s4090_s0  ;;  %p4097_p1 = scmp.lt.u32.totalorder %s4090_s0, %s5434_s5 }
  0x47   : > { %p4093_p9 = pnand %p4091_p7, %p4607_p8 }
  0x49   : > { %p4094_p4 = pneg %p4093_p9 }
  0x4b   : > { %p4099_p3 = pnand %p4097_p1, %p4094_p4 }
  0x4d   : > { %4102 = shalt.err (!%p4099_p3)
}
  0x4e   : > { %s4103_s19 = scalar_lea.vmem %s4589_s22, 768  ;;  %p4111_p13 = scmp.lt.s32.totalorder %s4589_s22, %s4589_s22 }
  0x4f   : > { %p4104_p10 = scmp.ne.s32.totalorder %s4589_s22, %s4103_s19  ;;  %p4112_p0 = scmp.lt.s32.totalorder %s4103_s19, %s4103_s19 }
  0x51   : > { %p4106_p11 = pnand %p4104_p10, %p4607_p8  ;;  %p4113_p2 = por %p4112_p0, %p4111_p13 }
  0x53   : > { %p4107_p12 = pneg %p4106_p11 }
  0x55   : > { %p4114_p5 = pnand %p4113_p2, %p4107_p12 }
  0x57   : > { %4117 = shalt.err (!%p4114_p5)
}
  0x58   : > { %s5378_s16 = smov 64   ;;  %s5380_s14 = smov 4  }
  0x59   : > { %3884 = dma.hbm_to_vmem [thread:$0]  (!%p4593_p6), %s5434_s5, 768, %s4589_s22, [#allocation13], %s5378_s16, %s5378_s16, %s5380_s14  }
  0x5a   : > { %s5435_s7 = sld [smem:[#allocation41_spill]] }
  0x60   : > { %s4118_s0 = scalar_lea.hbm %s5435_s7, 768 }
  0x61   : > { %p4119_p7 = scmp.ne.s32.totalorder %s5435_s7, %s4118_s0  ;;  %p4125_p1 = scmp.lt.u32.totalorder %s4118_s0, %s5435_s7 }
  0x63   : > { %p4121_p9 = pnand %p4119_p7, %p4607_p8 }
  0x65   : > { %p4122_p4 = pneg %p4121_p9 }
  0x67   : > { %p4127_p3 = pnand %p4125_p1, %p4122_p4 }
  0x69   : > { %4130 = shalt.err (!%p4127_p3)
}
  0x6a   : > { %s4131_s22 = scalar_lea.vmem %s4597_s24, 768  ;;  %p4139_p13 = scmp.lt.s32.totalorder %s4597_s24, %s4597_s24 }
  0x6b   : > { %p4132_p10 = scmp.ne.s32.totalorder %s4597_s24, %s4131_s22  ;;  %p4140_p0 = scmp.lt.s32.totalorder %s4131_s22, %s4131_s22 }
  0x6d   : > { %p4134_p11 = pnand %p4132_p10, %p4607_p8  ;;  %p4141_p2 = por %p4140_p0, %p4139_p13 }
  0x6f   : > { %p4135_p12 = pneg %p4134_p11 }
  0x71   : > { %p4142_p5 = pnand %p4141_p2, %p4135_p12 }
  0x73   : > { %4145 = shalt.err (!%p4142_p5)
}
  0x74   : > { %3890 = dma.hbm_to_vmem [thread:$0]  (!%p4593_p6), %s5435_s7, 768, %s4597_s24, [#allocation16], %s5378_s16, %s5378_s16, %s5380_s14  }
  0x75   : > { %s3362_s18 = sadd.s32 4294967294, %s4434_s30   ;;  %s4677_s15 = sadd.s32 1, %s4434_s30  }
  0x76   : > { %5436 = sst [smem:[#allocation31_spill]] %s4677_s15  ;;  %s48_s26 = sadd.s32 1, %s4430_s29 }
  0x77   : > { %s45_s0 = ssub.s32 %s4434_s30, %s4677_s15  ;;  %p55_p7 = scmp.ne.s32.totalorder %s4430_s29, %s4426_s28 }
  0x78   : > { %p46_p9 = scmp.eq.s32.totalorder %s45_s0, 0  ;;  %p56_p4 = scmp.eq.s32.totalorder %s4434_s30, 0 }
  0x79   : > { %p61_p1 = scmp.ne.s32.totalorder %s4426_s28, %s4422_s27  ;;  %p452_p3 = scmp.eq.s32.totalorder %s4577_s1, 1 }
  0x7a   : > { %s4689_s23 = scalar_select %p46_p9, %s4430_s29, %s48_s26  }
  0x7b   : > { %p57_p10 = por %p56_p4, %p55_p7  ;;  %p5438_p11 = scmp.eq.s32.totalorder %s4577_s1, 0 }
  0x7c   : > { %5437 = sst [smem:[#allocation32_spill]] %s4689_s23  ;;  %p4697_p13 = por %p452_p3, %p55_p7 }
  0x7d   : > { %p4693_p12 = por %p5438_p11, %p61_p1  ;;  %p458_p0 = scmp.eq.s32.totalorder %s3362_s18, 1 }
  0x7e   : > { %s5441_s25 = scalar_select %p4697_p13, 1, 0 }
  0x7f   : > { %s5439_s24 = scalar_select %p4693_p12, 1, 0 }
  0x80   : > { %5442 = sst [smem:[#allocation34_spill]] %s5441_s25  ;;  %p3918_p2 = scmp.lt.s32.totalorder %s4434_s30, 2 }
  0x81   : > { %5440 = sst [smem:[#allocation33_spill]] %s5439_s24  ;;  %s4703_s19 = sand.u32 1, %s4430_s29  }
  0x82   : > { %p4705_p5 = por %p458_p0, %p61_p1  ;;  %s607_s3 = sand.u32 1, %s4434_s30  }
  0x83   : > { %p4710_p9 = pnand %p3918_p2, %p57_p10  ;;  %s5386_s26 = sshll.u32 %s4703_s19, 4 }
  0x84   : > { %s5443_s22 = scalar_select %p4705_p5, 1, 0 }
  0x85   : > { %s5445_s17 = scalar_select %p4710_p9, 1, 0 }
  0x86   : > { %5444 = sst [smem:[#allocation35_spill]] %s5443_s22  ;;  %s5387_s0 = sshll.u32 %s4434_s30, 8 }
  0x87   : > { %s5446_s14 = sld [smem:[#allocation37_spill]]  ;;  %s611_s7 = scalar_lea.vmem [#allocation6], %s5386_s26 }
  0x88   : > { %s618_s23 = sshll.u32 %s611_s7, 4  ;;  %s4727_s29 = scalar_lea.sflag [#allocation7], %s607_s3  ;;  %s4725_s23 = int_to_ptr.vmem [resolvable:$true] %s618_s23 }
  0x89   : > { %p4733_p4 = pneg %p4710_p9 }
  0x8b   : > { %s5447_s22 = scalar_select %p4733_p4, 1, 0 }
  0x8d   : > { %s4721_s5 = scalar_lea.hbm %s5446_s14, %s5387_s0  ;;  %s4151_s26 = scalar_lea.hbm %s5446_s14, 512 }
  0x8e   : > { %s4146_s15 = scalar_lea.hbm %s4721_s5, 256  ;;  %p4152_p10 = scmp.lt.u32.totalorder %s4721_s5, %s5446_s14 }
  0x8f   : > { %p4147_p7 = scmp.ne.s32.totalorder %s4721_s5, %s4146_s15  ;;  %p4153_p11 = scmp.lt.u32.totalorder %s4151_s26, %s4146_s15 }
  0x90   : > { %p4155_p2 = scmp.lt.u32.totalorder %s4146_s15, %s4721_s5 }
  0x91   : > { %p4149_p1 = pnand %p4733_p4, %p4147_p7  ;;  %p4154_p0 = por %p4153_p11, %p4152_p10 }
  0x93   : > { %p4150_p3 = pneg %p4149_p1  ;;  %p4156_p5 = por %p4155_p2, %p4154_p0 }
  0x95   : > { %p4157_p13 = pnand %p4156_p5, %p4150_p3 }
  0x97   : > { %4160 = shalt.err (!%p4157_p13)
}
  0x98   : > { %s4161_s3 = scalar_lea.vmem %s4725_s23, 256  ;;  %s4441_s16 = smov [#allocation6]  }
  0x99   : > { %p4162_p7 = scmp.ne.s32.totalorder %s4725_s23, %s4161_s3  ;;  %s4166_s18 = sshll.u32 %s4441_s16, 4  ;;  %s4167_s18 = int_to_ptr.vmem [resolvable:$false] %s4166_s18 }
  0x9a   : > { %s4168_s0 = scalar_lea.vmem %s4167_s18, 512  ;;  %p4169_p6 = scmp.lt.s32.totalorder %s4725_s23, %s4167_s18 }
  0x9b   : > { %p4164_p1 = pnand %p4162_p7, %p4733_p4  ;;  %p4170_p8 = scmp.lt.s32.totalorder %s4168_s0, %s4161_s3 }
  0x9d   : > { %p4165_p12 = pneg %p4164_p1  ;;  %p4171_p10 = por %p4170_p8, %p4169_p6 }
  0x9f   : > { %p4172_p11 = pnand %p4171_p10, %p4165_p12 }
  0xa1   : > { %4175 = shalt.err (!%p4172_p11)
}
  0xa2   : > { %s5406_s15 = smov 128   ;;  %s5411_s26 = smov 8  }
  0xa3   : > { %3903 = dma.hbm_to_vmem [thread:$0]  (!%p4710_p9), %s4721_s5, 256, %s4725_s23, %s4727_s29, %s5406_s15, %s5406_s15, %s5411_s26  }
  0xa4   : > { %s5448_s7 = sshll.u32 %s4434_s30, 8  ;;  %s5449_s18 = sld [smem:[#allocation38_spill]] }
  0xa5   : > { %s5450_s14 = sshll.u32 %s4703_s19, 4  ;;  %s4444_s13 = smov [#allocation11]  }
  0xa6   : > { %s4769_s27 = scalar_lea.vmem [#allocation8], %s5450_s14  ;;  %s489_s12 = sshll.u32 %s4444_s13, 4  ;;  %s490_s12 = int_to_ptr.vmem [resolvable:$true] %s489_s12 }
  0xa7   : > { %s4445_s11 = smov [#allocation14]   ;;  %s4176_s5 = scalar_lea.hbm %s5354_s4, 128 }
  0xa8   : > { %s512_s10 = sshll.u32 %s4445_s11, 4  ;;  %p4177_p6 = scmp.ne.s32.totalorder %s5354_s4, %s4176_s5  ;;  %s513_s10 = int_to_ptr.vmem [resolvable:$true] %s512_s10 }
  0xa9   : > { %p5451_p8 = scmp.ne.s32.totalorder %s5433_s21, 0  ;;  %p4183_p5 = scmp.lt.u32.totalorder %s4176_s5, %s5354_s4 }
  0xaa   : > { %s4765_s0 = scalar_lea.hbm %s5449_s18, %s5448_s7 }
  0xab   : > { %p4179_p12 = pnand %p4177_p6, %p5451_p8 }
  0xad   : > { %p4180_p13 = pneg %p4179_p12 }
  0xaf   : > { %p4185_p3 = pnand %p4183_p5, %p4180_p13 }
  0xb1   : > { %4188 = shalt.err (!%p4185_p3)
}
  0xb2   : > { %s4189_s13 = scalar_lea.vmem %s490_s12, 128  ;;  %p4197_p1 = scmp.lt.s32.totalorder %s490_s12, %s490_s12 }
  0xb3   : > { %p4190_p0 = scmp.ne.s32.totalorder %s490_s12, %s4189_s13  ;;  %p4198_p10 = scmp.lt.s32.totalorder %s4189_s13, %s4189_s13 }
  0xb5   : > { %p4192_p2 = pnand %p4190_p0, %p5451_p8  ;;  %p4199_p11 = por %p4198_p10, %p4197_p1 }
  0xb7   : > { %p4193_p7 = pneg %p4192_p2 }
  0xb9   : > { %p4200_p9 = pnand %p4199_p11, %p4193_p7 }
  0xbb   : > { %4203 = shalt.err (!%p4200_p9)
}
  0xbc   : > { %p5452_p6 = scmp.ne.s32.totalorder %s5431_s2, 0  ;;  %s4204_s16 = scalar_lea.hbm %s5356_s6, 768 }
  0xbd   : > { %p4205_p12 = scmp.ne.s32.totalorder %s5356_s6, %s4204_s16  ;;  %p4211_p9 = scmp.lt.u32.totalorder %s4204_s16, %s5356_s6 }
  0xbe   : > { %3881 = dma.hbm_to_vmem [thread:$0]  (!%p5452_p6), %s5354_s4, 128, %s490_s12, [#allocation10]  }
  0xbf   : > { %p4207_p13 = pnand %p4205_p12, %p5451_p8 }
  0xc1   : > { %p4208_p5 = pneg %p4207_p13 }
  0xc3   : > { %p4213_p3 = pnand %p4211_p9, %p4208_p5 }
  0xc5   : > { %4216 = shalt.err (!%p4213_p3)
}
  0xc6   : > { %s4217_s7 = scalar_lea.vmem %s513_s10, 768  ;;  %p4225_p1 = scmp.lt.s32.totalorder %s513_s10, %s513_s10 }
  0xc7   : > { %p4218_p0 = scmp.ne.s32.totalorder %s513_s10, %s4217_s7  ;;  %p4226_p10 = scmp.lt.s32.totalorder %s4217_s7, %s4217_s7 }
  0xc9   : > { %p4220_p2 = pnand %p4218_p0, %p5451_p8  ;;  %p4227_p11 = por %p4226_p10, %p4225_p1 }
  0xcb   : > { %p4221_p7 = pneg %p4220_p2 }
  0xcd   : > { %p4228_p4 = pnand %p4227_p11, %p4221_p7 }
  0xcf   : > { %4231 = shalt.err (!%p4228_p4)
}
  0xd0   : > { %s5453_s12 = smov 4   ;;  %s5454_s13 = smov 64  }
  0xd1   : > { %3887 = dma.hbm_to_vmem [thread:$0]  (!%p5452_p6), %s5356_s6, 768, %s513_s10, [#allocation13], %s5454_s13, %s5454_s13, %s5453_s12  }
  0xd2   : > { %s4446_s24 = smov [#allocation17]   ;;  %s4447_s16 = smov [#allocation18]  }
  0xd3   : > { %s538_s15 = sshll.u32 %s4446_s24, 4  ;;  %s551_s3 = sshll.u32 %s4447_s16, 4  ;;  %s539_s15 = int_to_ptr.vmem [resolvable:$true] %s538_s15  ;;  %s552_s3 = int_to_ptr.vmem [resolvable:$true] %s551_s3 }
  0xd4   : > { %s4232_s14 = scalar_lea.hbm %s5358_s8, 768 }
  0xd5   : > { %p4233_p4 = scmp.ne.s32.totalorder %s5358_s8, %s4232_s14  ;;  %p4239_p5 = scmp.lt.u32.totalorder %s4232_s14, %s5358_s8 }
  0xd7   : > { %p4235_p12 = pnand %p4233_p4, %p5451_p8 }
  0xd9   : > { %p4236_p13 = pneg %p4235_p12 }
  0xdb   : > { %p4241_p9 = pnand %p4239_p5, %p4236_p13 }
  0xdd   : > { %4244 = shalt.err (!%p4241_p9)
}
  0xde   : > { %s4245_s10 = scalar_lea.vmem %s539_s15, 768  ;;  %p4253_p7 = scmp.lt.s32.totalorder %s539_s15, %s539_s15 }
  0xdf   : > { %p4246_p3 = scmp.ne.s32.totalorder %s539_s15, %s4245_s10  ;;  %p4254_p1 = scmp.lt.s32.totalorder %s4245_s10, %s4245_s10 }
  0xe1   : > { %p4248_p0 = pnand %p4246_p3, %p5451_p8  ;;  %p4255_p10 = por %p4254_p1, %p4253_p7 }
  0xe3   : > { %p4249_p2 = pneg %p4248_p0 }
  0xe5   : > { %p4256_p11 = pnand %p4255_p10, %p4249_p2 }
  0xe7   : > { %4259 = shalt.err (!%p4256_p11)
}
  0xe8   : > { %3893 = dma.hbm_to_vmem [thread:$0]  (!%p5452_p6), %s5358_s8, 768, %s539_s15, [#allocation16], %s5454_s13, %s5454_s13, %s5453_s12  }
  0xe9   : > { %s4260_s16 = scalar_lea.hbm %s5359_s9, 48 }
  0xea   : > { %p4261_p4 = scmp.ne.s32.totalorder %s5359_s9, %s4260_s16  ;;  %p4267_p5 = scmp.lt.u32.totalorder %s4260_s16, %s5359_s9 }
  0xec   : > { %p4263_p12 = pnand %p4261_p4, %p5451_p8 }
  0xee   : > { %p4264_p13 = pneg %p4263_p12 }
  0xf0   : > { %p4269_p9 = pnand %p4267_p5, %p4264_p13 }
  0xf2   : > { %4272 = shalt.err (!%p4269_p9)
}
  0xf3   : > { %s4273_s11 = scalar_lea.vmem %s552_s3, 48  ;;  %s4280_s12 = scalar_lea.vmem %s552_s3, 64 }
  0xf4   : > { %p4274_p3 = scmp.ne.s32.totalorder %s552_s3, %s4273_s11  ;;  %p4281_p7 = scmp.lt.s32.totalorder %s552_s3, %s552_s3 }
  0xf5   : > { %p4282_p1 = scmp.lt.s32.totalorder %s4280_s12, %s4273_s11 }
  0xf6   : > { %p4276_p0 = pnand %p4274_p3, %p5451_p8 }
  0xf7   : > { %p4283_p10 = por %p4282_p1, %p4281_p7 }
  0xf8   : > { %p4277_p2 = pneg %p4276_p0 }
  0xfa   : > { %p4284_p11 = pnand %p4283_p10, %p4277_p2 }
  0xfc   : > { %4287 = shalt.err (!%p4284_p11)
}
  0xfd   : > { %s4448_s13 = smov 16   ;;  %s4449_s15 = smov 1  }
  0xfe   : > { %3896 = dma.hbm_to_vmem [thread:$0]  (!%p5452_p6), %s5359_s9, 48, %s552_s3, [#allocation19], %s4448_s13, %s4448_s13, %s4449_s15  }
  0xff   : > { %s3372_s21 = sshll.u32 %s4703_s19, 3  ;;  %s3373_s26 = sshll.u32 %s4434_s30, 7 }
 0x100   : > { %s5455_s16 = sld [smem:[#allocation36_spill]]  ;;  %s5456_s23 = sshll.u32 %s4769_s27, 4  ;;  %s4859_s23 = int_to_ptr.vmem [resolvable:$true] %s5456_s23 }
 0x101   : > { %s593_s14 = scalar_lea.vmem [#allocation3], %s3372_s21  ;;  %s590_s7 = scalar_lea.sflag [#allocation4], %s4703_s19 }
 0x102   : > { %s600_s2 = sshll.u32 %s593_s14, 4  ;;  %p5457_p6 = scmp.ne.s32.totalorder %s5447_s22, 0  ;;  %s601_s2 = int_to_ptr.vmem [resolvable:$true] %s600_s2 }
 0x106   : > { %s4855_s5 = scalar_lea.hbm %s5455_s16, %s3373_s26  ;;  %s4293_s13 = scalar_lea.hbm %s5455_s16, 256 }
 0x107   : > { %s4288_s11 = scalar_lea.hbm %s4855_s5, 128  ;;  %p4294_p13 = scmp.lt.u32.totalorder %s4855_s5, %s5455_s16 }
 0x108   : > { %p4289_p8 = scmp.ne.s32.totalorder %s4855_s5, %s4288_s11  ;;  %p4295_p5 = scmp.lt.u32.totalorder %s4293_s13, %s4288_s11 }
 0x109   : > { %p4297_p3 = scmp.lt.u32.totalorder %s4288_s11, %s4855_s5 }
 0x10a   : > { %p4291_p4 = pnand %p4289_p8, %p5457_p6  ;;  %p4296_p9 = por %p4295_p5, %p4294_p13 }
 0x10c   : > { %p4292_p12 = pneg %p4291_p4  ;;  %p4298_p0 = por %p4297_p3, %p4296_p9 }
 0x10e   : > { %p4299_p2 = pnand %p4298_p0, %p4292_p12 }
 0x110   : > { %4302 = shalt.err (!%p4299_p2)
}
 0x111   : > { %s4303_s19 = scalar_lea.vmem %s601_s2, 128  ;;  %s4450_s10 = smov [#allocation3]  }
 0x112   : > { %p4304_p7 = scmp.ne.s32.totalorder %s601_s2, %s4303_s19  ;;  %s4308_s25 = sshll.u32 %s4450_s10, 4  ;;  %s4309_s25 = int_to_ptr.vmem [resolvable:$false] %s4308_s25 }
 0x113   : > { %s4310_s21 = scalar_lea.vmem %s4309_s25, 256  ;;  %p4311_p11 = scmp.lt.s32.totalorder %s601_s2, %s4309_s25 }
 0x114   : > { %p4306_p1 = pnand %p4304_p7, %p5457_p6  ;;  %p4312_p8 = scmp.lt.s32.totalorder %s4310_s21, %s4303_s19 }
 0x116   : > { %p4307_p10 = pneg %p4306_p1  ;;  %p4313_p4 = por %p4312_p8, %p4311_p11 }
 0x118   : > { %p4314_p5 = pnand %p4313_p4, %p4307_p10 }
 0x11a   : > { %4317 = shalt.err (!%p4314_p5)
}
 0x11b   : > { %p5458_p13 = scmp.ne.s32.totalorder %s5445_s17, 0  ;;  %s4318_s26 = scalar_lea.hbm %s4765_s0, 256 }
 0x11c   : > { %p4319_p12 = scmp.ne.s32.totalorder %s4765_s0, %s4318_s26  ;;  %s4323_s14 = scalar_lea.hbm %s5449_s18, 512 }
 0x11d   : > { %3900 = dma.hbm_to_vmem [thread:$0]  (!%p5458_p13), %s4855_s5, 128, %s601_s2, %s590_s7  }
 0x11e   : > { %p4321_p9 = pnand %p4319_p12, %p5457_p6  ;;  %p4324_p0 = scmp.lt.u32.totalorder %s4765_s0, %s5449_s18 }
 0x11f   : > { %p4325_p2 = scmp.lt.u32.totalorder %s4323_s14, %s4318_s26  ;;  %p4327_p1 = scmp.lt.u32.totalorder %s4318_s26, %s4765_s0 }
 0x120   : > { %p4322_p3 = pneg %p4321_p9 }
 0x121   : > { %p4326_p7 = por %p4325_p2, %p4324_p0 }
 0x123   : > { %p4328_p10 = por %p4327_p1, %p4326_p7 }
 0x125   : > { %p4329_p11 = pnand %p4328_p10, %p4322_p3 }
 0x127   : > { %4332 = shalt.err (!%p4329_p11)
}
 0x128   : > { %s4333_s5 = scalar_lea.vmem %s4859_s23, 256  ;;  %s4451_s2 = smov [#allocation8]  }
 0x129   : > { %p4334_p8 = scmp.ne.s32.totalorder %s4859_s23, %s4333_s5  ;;  %s4338_s7 = sshll.u32 %s4451_s2, 4  ;;  %s4339_s7 = int_to_ptr.vmem [resolvable:$false] %s4338_s7 }
 0x12a   : > { %s4340_s12 = scalar_lea.vmem %s4339_s7, 512  ;;  %p4341_p12 = scmp.lt.s32.totalorder %s4859_s23, %s4339_s7 }
 0x12b   : > { %p4336_p4 = pnand %p4334_p8, %p5457_p6  ;;  %p4342_p9 = scmp.lt.s32.totalorder %s4340_s12, %s4333_s5 }
 0x12d   : > { %p4337_p5 = pneg %p4336_p4  ;;  %p4343_p0 = por %p4342_p9, %p4341_p12 }
 0x12f   : > { %p4344_p2 = pnand %p4343_p0, %p4337_p5 }
 0x131   : > { %4347 = shalt.err (!%p4344_p2)
}
 0x132   : > { %s5459_s13 = smov 8   ;;  %s5460_s27 = smov 128  }
 0x133   : > { %3906 = dma.hbm_to_vmem [thread:$0]  (!%p5458_p13), %s4765_s0, 256, %s4859_s23, %s4727_s29, %s5460_s27, %s5460_s27, %s5459_s13  }
 0x134   : > { %p5461_p6 = scmp.ne.s32.totalorder %s5430_s20, 0 }
 0x135   : > { %s5462_s22 = sld [smem:[#allocation33_spill]] (!%p5461_p6)  ;;  %s4907_s15 = sand.u32 (!%p5461_p6), 1, %s4426_s28  }
 0x136   : > { %651 = sbr.rel (%p5461_p6) target bundleno = 5021 (0x139d), region = 92  ;;  %s3381_s19 = sshll.u32 (!%p5461_p6), %s4907_s15, 3 }
 0x137   : > { %s654_s10 = scalar_lea.sflag (!%p5461_p6), [#allocation4], %s4907_s15  ;;  %s657_s17 = scalar_lea.vmem (!%p5461_p6), [#allocation3], %s3381_s19 }
 0x13b   : > { %p5463_p3 = scmp.ne.s32.totalorder (!%p5461_p6), %s5462_s22, 0 }
 0x13d   : > { %4393 = dma.done.wait (%p5463_p3), %s654_s10, 128  }
 0x13e   : > { %4395 = vsyncadd (%p5463_p3), %s654_s10, 4294967168  ;;  %s5464_s29 = sld [smem:[#allocation30_spill]]  ;;  %s3382_s0 = sshll.u32 %s4907_s15, 4 }
 0x13f   : > { %s4919_s25 = scalar_lea.vmem [#allocation6], %s3382_s0 }
 0x144   : > { %s662_s20 = sand.u32 1, %s5464_s29  }
 0x145   : > { %s663_s23 = scalar_lea.sflag [#allocation7], %s662_s20 }
 0x146   : > { %4397 = dma.done.wait (%p5463_p3), %s663_s23, 512  }
 0x147   : > { %4399 = vsyncadd (%p5463_p3), %s663_s23, 4294966784  ;;  %s4925_s21 = scalar_lea.vmem [#allocation8], %s3382_s0  ;;  %p5465_p13 = scmp.eq.s32.totalorder %s5464_s29, 0 }
 0x149   : > { %4401 = dma.done.wait (%p5465_p13), [#allocation10], 256   ;;  %p5466_p7 = pmov %p5465_p13 }
 0x14b   : > { %4403 = vsyncadd (%p5466_p7), [#allocation10], 4294967040  ;;  %p5467_p1 = pmov %p5466_p7 }
 0x14d   : > { %4405 = dma.done.wait (%p5467_p1), [#allocation13], 1536   ;;  %p5468_p10 = pmov %p5467_p1 }
 0x14e   : > { %p5469_p11 = pmov %p5467_p1 }
 0x14f   : > { %4407 = vsyncadd (%p5468_p10), [#allocation13], 4294965760 }
 0x150   : > { %4409 = dma.done.wait (%p5469_p11), [#allocation16], 1536   ;;  %p5470_p8 = pmov %p5467_p1 }
 0x151   : > { %p5471_p4 = pmov %p5467_p1 }
 0x152   : > { %4411 = vsyncadd (%p5470_p8), [#allocation16], 4294965760 }
 0x153   : > { %4413 = dma.done.wait (%p5471_p4), [#allocation19], 48   ;;  %p5472_p5 = pmov %p5467_p1 }
 0x154   : > { %v4452_v0 = vmov 0.0   ;;  %vm4453_vm0 = vmmov 0   ;;  %v3980_v1 = vld [vmem:[#allocation14] sm:$0xff]   ;;  %v3981_v2 = vld [vmem:[#allocation12] sm:$0xff]   ;;  %v3982_v3 = vld [vmem:[#allocation14 + $0x8] sm:$0xff]   ;;  %vm800_vm1 = vcmask 261120  }
 0x155   : > { %4415 = vsyncadd (%p5472_p5), [#allocation19], 4294967248  ;;  %3591 = vmatprep.subr.bf16.mxu1 %v4452_v0  ;;  %3583 = vmatprep.subr.bf16.mxu0 %v4452_v0  ;;  %v4950_v4 = vld [vmem:[%s657_s17] sm:$0xff]  ;;  %s5473_s24 = sld [smem:[#allocation42_spill]]  ;;  %vm973_vm2 = vcmask 64512   ;;  %s4454_s14 = smov 112  }
 0x156   : > { %3595 = vmatprep.mubr.msk.bf16.mxu1 %vm4453_vm0, %v4452_v0  ;;  %3587 = vmatprep.mubr.msk.bf16.mxu0 %vm4453_vm0, %v4452_v0  ;;  %v3983_v5 = vld [vmem:[#allocation12 + $0x8] sm:$0xff]   ;;  %v768_v6 = vpack.c.bf16 %v4950_v4, %v4950_v4  ;;  %v3392_v8 = vld [vmem:[#allocation18] ss:$0 sm:$0xff]  ;;  %s4455_s11 = smov 120   ;;  %s4456_s3 = smov 104   ;;  %v775_v33 = vld [vmem:[#allocation9] sm:$0xff] }
 0x157   : > { %3592 = vmatpush3.bf16.msra.mxu1 %v3980_v1  ;;  %3584 = vmatpush3.bf16.msra.mxu0 %v3981_v2  ;;  %v3984_v22 = vld [vmem:[#allocation15] sm:$0xff]   ;;  %v3985_v23 = vld [vmem:[#allocation15 + $0x8] sm:$0xff]   ;;  %s5474_s7 = sld [smem:[#allocation43_spill]]  ;;  %vm1035_vm3 = vcmask 1043456   ;;  %s4457_s12 = smov 8   ;;  %vm1197_vm4 = vcmask 130112  }
 0x158   : > { %3593 = vmatprep.subr.bf16.mxu1 %v4452_v0  ;;  %3585 = vmatprep.subr.bf16.mxu0 %v4452_v0  ;;  %s4458_s13 = smov 16   ;;  %s4459_s27 = smov 24   ;;  %vm1313_vm5 = vcmask 195712   ;;  %vm1429_vm6 = vcmask 261312   ;;  %vm1785_vm7 = vcmask 130048  }
 0x159   : > { %s5475_s17 = sld [smem:[#allocation44_spill]]  ;;  %s5476_s23 = sld [smem:[#allocation45_spill]] }
 0x15a   : > { %s5477_s1 = sld [smem:[#allocation46_spill]]  ;;  %s5480_s10 = sld [smem:[#allocation49_spill]] }
 0x15b   : > { %3594 = vmatpush3.bf16.msra.mxu1 %v3982_v3  ;;  %3586 = vmatpush3.bf16.msra.mxu0 %v3983_v5  ;;  %v3396_v7 = vld [vmem:[%s5473_s24] ss:$0 sm:$0xff]  ;;  %s5481_s20 = sld [smem:[#allocation34_spill]]  ;;  %s3488_s0 = sshll.u32 %s5464_s29, 7 }
 0x15c   : > { %3607 = vmatprep.subr.bf16.mxu1 %v4452_v0  ;;  %3599 = vmatprep.subr.bf16.mxu0 %v4452_v0  ;;  %s3169_s29 = scalar_lea.sflag [#allocation5], %s4907_s15  ;;  %s4460_s26 = smov [#allocation20]  }
 0x15d   : > { %v3400_v40 = vld [vmem:[%s5474_s7] ss:$0 sm:$0xff]  ;;  %s4352_s5 = sshll.u32 %s4460_s26, 4  ;;  %s4353_s5 = int_to_ptr.vmem [resolvable:$false] %s4352_s5 }
 0x15e   : > { %3596 = vmatmul.mubr.msk.bf16.vlgmr.msra.gmra.mrb[0].mxu1 %vm800_vm1, %v768_v6  ;;  %3588 = vmatmul.mubr.msk.bf16.vlgmr.msra.gmra.mrb[0].mxu0 %vm800_vm1, %v768_v6  ;;  %s4354_s2 = scalar_lea.vmem %s4353_s5, 256 }
 0x15f   : > { %3609 = vmatprep.mubr.msk.bf16.mxu1 %vm4453_vm0, %v4452_v0  ;;  %3603 = vmatprep.mubr.msk.bf16.mxu0 %vm4453_vm0, %v4452_v0 }
 0x160   : > { %3600 = vmatpush3.bf16.msra.mxu0 %v3984_v22 }
 0x161   : > { %3601 = vmatprep.subr.bf16.mxu0 %v4452_v0  ;;  %p5483_p9 = scmp.ne.s32.totalorder %s5481_s20, 0 }
 0x164   : > { %3602 = vmatpush3.bf16.msra.mxu0 %v3985_v23 }
 0x165   : > { %3613 = vmatprep.subr.bf16.mxu0 %v4452_v0 }
 0x167   : > { %3604 = vmatmul.mubr.msk.bf16.vlgmr.msra.gmra.mrb[4].mxu0 %vm800_vm1, %v768_v6 }
 0x168   : > { %3615 = vmatprep.mubr.msk.bf16.mxu0 %vm4453_vm0, %v4452_v0 }
 0x231   : > { %v901_v9 = vpop.f32.mrb[0].mxu1  ;;  %v838_v12 = vpop.f32.mrb[0].mxu0 }
 0x232   : > { %v902_v10 = vadd.f32 %v3396_v7, %v901_v9  ;;  %v3597_v11 = vpop.f32.mrb[1].mxu1  ;;  %v839_v14 = vadd.f32 %v3392_v8, %v838_v12  ;;  %v3589_v15 = vpop.f32.mrb[1].mxu0 }
 0x233   : > { %v904_v13 = vpop.f32.mrb[2].mxu1  ;;  %v841_v18 = vpop.f32.mrb[2].mxu0 }
 0x234   : > { %v971_v16 = vpack.c.bf16 %v902_v10, %v902_v10  ;;  %v3598_v17 = vpop.f32.mrb[3].mxu1  ;;  %v3590_v19 = vpop.f32.mrb[3].mxu0  ;;  %v970_v20 = vpack.c.bf16 %v839_v14, %v839_v14 }
 0x236   : > { %1201 = vrot.lane.b32.xlu1 %v971_v16, %s4454_s14  ;;  %1084 = vrot.lane.b32.xlu0 %v971_v16, %s4455_s11  ;;  %v978_v21 = vsel %vm973_vm2, %v971_v16, 0 }
 0x237   : > { %3608 = vmatpush3.bf16.xpose.msra.mxu1 %v978_v21 }
 0x238   : > { %3619 = vmatprep.subr.bf16.mxu1 %v4452_v0 }
 0x23a   : > { %1199 = vrot.lane.b32.xlu1 %v970_v20, %s4454_s14  ;;  %1081 = vrot.lane.b32.xlu0 %v970_v20, %s4455_s11  ;;  %v964_v41 = vpop.f32.mrb[4].mxu0 }
 0x23b   : > { %v965_v42 = vadd.f32 %v3400_v40, %v964_v41  ;;  %v3605_v43 = vpop.f32.mrb[5].mxu0 }
 0x23c   : > { %v967_v44 = vpop.f32.mrb[6].mxu0 }
 0x23d   : > { %v972_v45 = vpack.c.bf16 %v965_v42, %v965_v42  ;;  %v3606_v46 = vpop.f32.mrb[7].mxu0 }
 0x23e   : > { %1315 = vrot.lane.b32.xlu1 %v970_v20, %s4456_s3  ;;  %1317 = vrot.lane.b32.xlu0 %v971_v16, %s4456_s3 }
 0x23f   : > { %3610 = vmatmul.mubr.msk.bf16.vlgmr.msra.gmra.mrb[4].mxu1 %vm973_vm2, %v970_v20  ;;  %v1037_v47 = vsel %vm1035_vm3, %v972_v45, 0 }
 0x240   : > { %3621 = vmatprep.mubr.msk.bf16.mxu1 %vm4453_vm0, %v4452_v0  ;;  %3614 = vmatpush3.bf16.msra.mxu0 %v1037_v47 }
 0x241   : > { %3625 = vmatprep.subr.bf16.mxu0 %v4452_v0 }
 0x2a8   : > { %v1085_v24 = vpop.permute.xlu0 %1084  ;;  %v1202_v26 = vpop.permute.xlu1 %1201 }
 0x2a9   : > { %v1090_v25 = vsel %vm973_vm2, %v1085_v24, 0  ;;  %v1207_v28 = vsel %vm973_vm2, %v1202_v26, 0 }
 0x2aa   : > { %3620 = vmatpush3.bf16.xpose.msra.mxu1 %v1090_v25 }
 0x2ab   : > { %3631 = vmatprep.subr.bf16.mxu1 %v4452_v0 }
 0x2ac   : > { %v1082_v27 = vpop.permute.xlu0 %1081  ;;  %v1200_v30 = vpop.permute.xlu1 %1199 }
 0x2b0   : > { %v1318_v29 = vpop.permute.xlu0 %1317  ;;  %v1316_v32 = vpop.permute.xlu1 %1315 }
 0x2b1   : > { %3622 = vmatmul.mubr.msk.bf16.vlgmr.msra.gmra.mrb[8].mxu1 %vm973_vm2, %v1082_v27  ;;  %v1323_v31 = vsel %vm973_vm2, %v1318_v29, 0 }
 0x2b2   : > { %3632 = vmatpush3.bf16.xpose.msra.mxu1 %v1207_v28  ;;  %3633 = vmatprep.mubr.msk.bf16.mxu1 %vm4453_vm0, %v4452_v0 }
 0x2b3   : > { %3643 = vmatprep.subr.bf16.mxu1 %v4452_v0 }
 0x2b9   : > { %3634 = vmatmul.mubr.msk.bf16.vlgmr.msra.gmra.mrb[12].mxu1 %vm973_vm2, %v1200_v30 }
 0x2ba   : > { %3644 = vmatpush3.bf16.xpose.msra.mxu1 %v1323_v31  ;;  %3645 = vmatprep.mubr.msk.bf16.mxu1 %vm4453_vm0, %v4452_v0 }
 0x2bb   : > { %3655 = vmatprep.subr.bf16.mxu1 %v4452_v0 }
 0x2c1   : > { %3646 = vmatmul.mubr.msk.bf16.vlgmr.msra.gmra.mrb[16].mxu1 %vm973_vm2, %v1316_v32 }
 0x2c2   : > { %3659 = vmatprep.mubr.msk.bf16.mxu1 %vm4453_vm0, %v4452_v0 }
 0x312   : > { %v1014_v34 = vpop.f32.mrb[4].mxu1 }
 0x313   : > { %v1015_v35 = vadd.f32 %v1014_v34, %v775_v33  ;;  %v3611_v36 = vpop.f32.mrb[5].mxu1 }
 0x314   : > { %v1017_v37 = vpop.f32.mrb[6].mxu1 }
 0x315   : > { %v3612_v38 = vpop.f32.mrb[7].mxu1  ;;  %v1020_v39 = vsel %vm973_vm2, %v1015_v35, -inf }
 0x316   : > { %1021 = vmax.xlane.f32.xlu0 %v1020_v39 }
 0x384   : > { %v1126_v48 = vpop.f32.mrb[8].mxu1 }
 0x385   : > { %v1127_v49 = vadd.f32 %v1126_v48, %v775_v33  ;;  %v3623_v50 = vpop.f32.mrb[9].mxu1 }
 0x386   : > { %v1129_v51 = vpop.f32.mrb[10].mxu1 }
 0x387   : > { %v3624_v52 = vpop.f32.mrb[11].mxu1  ;;  %v1132_v53 = vsel %vm973_vm2, %v1127_v49, -inf }
 0x388   : > { %1133 = vmax.xlane.f32.xlu1 %v1132_v53 }
 0x38c   : > { %v1243_v54 = vpop.f32.mrb[12].mxu1 }
 0x38d   : > { %v1244_v55 = vadd.f32 %v1243_v54, %v775_v33  ;;  %v3635_v56 = vpop.f32.mrb[13].mxu1  ;;  %v3986_v54 = vld [vmem:[#allocation17] sm:$0xff]  }
 0x38e   : > { %v1246_v57 = vpop.f32.mrb[14].mxu1  ;;  %3656 = vmatpush3.bf16.msra.mxu1 %v3986_v54 }
 0x38f   : > { %v3636_v58 = vpop.f32.mrb[15].mxu1  ;;  %v1249_v59 = vsel %vm973_vm2, %v1244_v55, -inf  ;;  %3657 = vmatprep.subr.bf16.mxu1 %v4452_v0 }
 0x390   : > { %1250 = vmax.xlane.f32.xlu0 %v1249_v59 }
 0x394   : > { %v1359_v60 = vpop.f32.mrb[16].mxu1 }
 0x395   : > { %v1360_v61 = vadd.f32 %v1359_v60, %v775_v33  ;;  %v3647_v62 = vpop.f32.mrb[17].mxu1 }
 0x396   : > { %v1362_v63 = vpop.f32.mrb[18].mxu1 }
 0x397   : > { %v3648_v1 = vpop.f32.mrb[19].mxu1  ;;  %v1365_v2 = vsel %vm973_vm2, %v1360_v61, -inf }
 0x398   : > { %1366 = vmax.xlane.f32.xlu0 %v1365_v2 }
 0x3a3   : > { %v1022_v3 = vpop.xlane.xlu0 %1021 }
 0x3a4   : > { %v1023_v5 = vsub.f32 %v1015_v35, %v1022_v3 }
 0x3a6   : > { %v1024_v6 = vmul.f32 1.442695, %v1023_v5 }
 0x3a8   : > { %4008 = vpow2.f32 %v1024_v6 }
 0x3b2   : > { %v4009_v7 = vpop.eup %4008 }
 0x3b3   : > { %v1026_v8 = vsel %vm973_vm2, %v4009_v7, 0.0 }
 0x3b4   : > { %1027 = vadd.xlane.f32.xlu1 %v1026_v8 }
 0x3c5   : > { %1145 = vrot.lane.b32.xlu1 %v972_v45, %s4455_s11 }
 0x415   : > { %v1134_v9 = vpop.xlane.xlu1 %1133 }
 0x416   : > { %v1135_v10 = vsub.f32 %v1127_v49, %v1134_v9 }
 0x418   : > { %v1136_v11 = vmul.f32 1.442695, %v1135_v10 }
 0x41a   : > { %4010 = vpow2.f32 %v1136_v11 }
 0x41d   : > { %v1251_v12 = vpop.xlane.xlu0 %1250 }
 0x41e   : > { %v1252_v13 = vsub.f32 %v1244_v55, %v1251_v12  ;;  %v3987_v55 = vld [vmem:[#allocation17 + $0x8] sm:$0xff]  }
 0x41f   : > { %3658 = vmatpush3.bf16.msra.mxu1 %v3987_v55 }
 0x420   : > { %v1253_v14 = vmul.f32 1.442695, %v1252_v13  ;;  %3671 = vmatprep.subr.bf16.mxu1 %v4452_v0 }
 0x422   : > { %4012 = vpow2.f32 %v1253_v14 }
 0x424   : > { %v4011_v15 = vpop.eup %4010 }
 0x425   : > { %v1367_v16 = vpop.xlane.xlu0 %1366  ;;  %v1138_v17 = vsel %vm973_vm2, %v4011_v15, 0.0 }
 0x426   : > { %v1368_v18 = vsub.f32 %v1360_v61, %v1367_v16  ;;  %1139 = vadd.xlane.f32.xlu0 %v1138_v17  ;;  %v3988_v17 = vld [vmem:[#allocation14 + $0x10] sm:$0xff]  }
 0x428   : > { %v1369_v19 = vmul.f32 1.442695, %v1368_v18  ;;  %v3989_v18 = vld [vmem:[#allocation14 + $0x18] sm:$0xff]  }
 0x42a   : > { %4014 = vpow2.f32 %v1369_v19  ;;  %v769_v19 = vld [vmem:[%s4919_s25] sm:$0xff] }
 0x42c   : > { %v4013_v20 = vpop.eup %4012 }
 0x42d   : > { %v1255_v21 = vsel %vm973_vm2, %v4013_v20, 0.0 }
 0x42e   : > { %1256 = vadd.xlane.f32.xlu1 %v1255_v21 }
 0x434   : > { %v4015_v22 = vpop.eup %4014 }
 0x435   : > { %v1371_v23 = vsel %vm973_vm2, %v4015_v22, 0.0 }
 0x436   : > { %1372 = vadd.xlane.f32.xlu0 %v1371_v23 }
 0x43f   : > { %1377 = vrot.lane.b32.xlu1 %v972_v45, %s4456_s3 }
 0x441   : > { %v1028_v24 = vpop.xlane.xlu1 %1027 }
 0x442   : > { %4016 = vrcp.f32 %v1028_v24 }
 0x445   : > { %v1146_v26 = vpop.permute.xlu1 %1145 }
 0x446   : > { %v1151_v29 = vsel %vm1035_vm3, %v1146_v26, 0 }
 0x44c   : > { %v4017_v25 = vpop.eup %4016  ;;  %1261 = vrot.lane.b32.xlu0 %v972_v45, %s4454_s14 }
 0x44d   : > { %v1030_v27 = vmul.f32 %v4017_v25, %v4009_v7  ;;  %v3412_v7 = vld [vmem:[%s5475_s17] ss:$0 sm:$0xff] }
 0x44f   : > { %v1031_v28 = vpack.c.bf16 %v1030_v27, %v1030_v27 }
 0x451   : > { %3616 = vmatmul.mubr.msk.bf16.vlgmr.msra.gmra.mrb[8].mxu0 %vm973_vm2, %v1031_v28 }
 0x452   : > { %3626 = vmatpush3.bf16.msra.mxu0 %v1151_v29  ;;  %3627 = vmatprep.mubr.msk.bf16.mxu0 %vm4453_vm0, %v4452_v0 }
 0x453   : > { %3637 = vmatprep.subr.bf16.mxu0 %v4452_v0 }
 0x4b3   : > { %v1140_v30 = vpop.xlane.xlu0 %1139 }
 0x4b4   : > { %4018 = vrcp.f32 %v1140_v30 }
 0x4bb   : > { %v1257_v31 = vpop.xlane.xlu1 %1256 }
 0x4bc   : > { %4020 = vrcp.f32 %v1257_v31 }
 0x4be   : > { %v4019_v32 = vpop.eup %4018 }
 0x4bf   : > { %v1142_v33 = vmul.f32 %v4019_v32, %v4011_v15  ;;  %v1378_v40 = vpop.permute.xlu1 %1377  ;;  %v3416_v32 = vld [vmem:[%s5476_s23] ss:$0 sm:$0xff] }
 0x4c0   : > { %v1383_v42 = vsel %vm1035_vm3, %v1378_v40, 0 }
 0x4c1   : > { %v1143_v34 = vpack.c.bf16 %v1142_v33, %v1142_v33 }
 0x4c3   : > { %v1373_v35 = vpop.xlane.xlu0 %1372  ;;  %3628 = vmatmul.mubr.msk.bf16.vlgmr.msra.gmra.mrb[12].mxu0 %vm973_vm2, %v1143_v34  ;;  %v3417_v34 = vld [vmem:[%s5477_s1] ss:$0 sm:$0xff] }
 0x4c4   : > { %4022 = vrcp.f32 %v1373_v35  ;;  %3639 = vmatprep.mubr.msk.bf16.mxu0 %vm4453_vm0, %v4452_v0 }
 0x4c6   : > { %v4021_v36 = vpop.eup %4020 }
 0x4c7   : > { %v1259_v37 = vmul.f32 %v4021_v36, %v4013_v20  ;;  %v1262_v38 = vpop.permute.xlu0 %1261  ;;  %v770_v20 = vld [vmem:[%s4919_s25 + $0x8] sm:$0xff] }
 0x4c8   : > { %v1267_v39 = vsel %vm1035_vm3, %v1262_v38, 0  ;;  %v5052_v21 = vpack.c.bf16 %v770_v20, %v769_v19  ;;  %v3423_v38 = vld [vmem:[%s5473_s24 + $0x1] ss:$0 sm:$0xff] }
 0x4c9   : > { %3638 = vmatpush3.bf16.msra.mxu0 %v1267_v39  ;;  %v1260_v41 = vpack.c.bf16 %v1259_v37, %v1259_v37 }
 0x4ca   : > { %3649 = vmatprep.subr.bf16.mxu0 %v4452_v0 }
 0x4cc   : > { %3640 = vmatmul.mubr.msk.bf16.vlgmr.msra.gmra.mrb[16].mxu0 %vm973_vm2, %v1260_v41 }
 0x4cd   : > { %3650 = vmatpush3.bf16.msra.mxu0 %v1383_v42  ;;  %3651 = vmatprep.mubr.msk.bf16.mxu0 %vm4453_vm0, %v4452_v0 }
 0x4ce   : > { %v4023_v43 = vpop.eup %4022  ;;  %3663 = vmatprep.subr.bf16.mxu0 %v4452_v0 }
 0x4cf   : > { %v1375_v44 = vmul.f32 %v4023_v43, %v4015_v22  ;;  %v3991_v22 = vld [vmem:[#allocation12 + $0x18] sm:$0xff]  }
 0x4d1   : > { %v1376_v45 = vpack.c.bf16 %v1375_v44, %v1375_v44 }
 0x4d4   : > { %3652 = vmatmul.mubr.msk.bf16.vlgmr.msra.gmra.mrb[20].mxu0 %vm973_vm2, %v1376_v45 }
 0x4d5   : > { %3667 = vmatprep.mubr.msk.bf16.mxu0 %vm4453_vm0, %v4452_v0 }
 0x524   : > { %v1073_v46 = vpop.f32.mrb[8].mxu0 }
 0x525   : > { %1079 = vst.msk [vmem:[#allocation2] sm:$0xff] %vm973_vm2, %v1073_v46  ;;  %v3617_v47 = vpop.f32.mrb[9].mxu0 }
 0x526   : > { %v1076_v48 = vpop.f32.mrb[10].mxu0  ;;  %v3418_v47 = vld [vmem:[#allocation18 + $0x1] ss:$0 sm:$0xff] }
 0x527   : > { %v3618_v49 = vpop.f32.mrb[11].mxu0 }
 0x596   : > { %v1187_v50 = vpop.f32.mrb[12].mxu0 }
 0x597   : > { %1194 = vrot.lane.b32.xlu1 %v1187_v50, %s4457_s12  ;;  %v3629_v51 = vpop.f32.mrb[13].mxu0 }
 0x598   : > { %v1190_v52 = vpop.f32.mrb[14].mxu0 }
 0x599   : > { %v3630_v53 = vpop.f32.mrb[15].mxu0 }
 0x59f   : > { %v1303_v56 = vpop.f32.mrb[16].mxu0 }
 0x5a0   : > { %1310 = vrot.lane.b32.xlu0 %v1303_v56, %s4458_s13  ;;  %v3641_v57 = vpop.f32.mrb[17].mxu0  ;;  %v3992_v56 = vld [vmem:[#allocation15 + $0x10] sm:$0xff]  }
 0x5a1   : > { %v1306_v58 = vpop.f32.mrb[18].mxu0  ;;  %v3993_v57 = vld [vmem:[#allocation15 + $0x18] sm:$0xff]  }
 0x5a2   : > { %v3642_v59 = vpop.f32.mrb[19].mxu0 }
 0x5a7   : > { %v1419_v60 = vpop.f32.mrb[20].mxu0 }
 0x5a8   : > { %1426 = vrot.lane.b32.xlu1 %v1419_v60, %s4459_s27  ;;  %v3653_v61 = vpop.f32.mrb[21].mxu0 }
 0x5a9   : > { %v1422_v62 = vpop.f32.mrb[22].mxu0 }
 0x5aa   : > { %v3654_v63 = vpop.f32.mrb[23].mxu0 }
 0x609   : > { %v1195_v1 = vpop.permute.xlu1 %1194 }
 0x60a   : > { %1198 = vst.msk [vmem:[#allocation2] sm:$0xff] %vm1197_vm4, %v1195_v1 }
 0x612   : > { %v1311_v2 = vpop.permute.xlu0 %1310 }
 0x613   : > { %1314 = vst.msk [vmem:[#allocation2] sm:$0xff] %vm1313_vm5, %v1311_v2  ;;  %v5112_v2 = vld [vmem:[#allocation11] sm:$0xff] }
 0x61a   : > { %v1427_v3 = vpop.permute.xlu1 %1426 }
 0x61b   : > { %1430 = vst.msk [vmem:[#allocation2] sm:$0xff] %vm1429_vm6, %v1427_v3 }
 0x622   : > { %v1431_v5 = vld [vmem:[#allocation2] sm:$0xff] }
 0x623   : > { %v1432_v6 = vpack.c.bf16 %v1431_v5, %v1431_v5 }
 0x625   : > { %3660 = vmatmul.mubr.msk.bf16.vlgmr.msra.gmra.mrb[20].mxu1 %vm800_vm1, %v1432_v6 }
 0x626   : > { %3675 = vmatprep.mubr.msk.bf16.mxu1 %vm4453_vm0, %v4452_v0  ;;  %3672 = vmatpush3.bf16.msra.mxu1 %v3988_v17 }
 0x627   : > { %3673 = vmatprep.subr.bf16.mxu1 %v4452_v0 }
 0x62a   : > { %3674 = vmatpush3.bf16.msra.mxu1 %v3989_v18 }
 0x62b   : > { %3687 = vmatprep.subr.bf16.mxu1 %v4452_v0 }
 0x62d   : > { %3676 = vmatmul.mubr.msk.bf16.vlgmr.msra.gmra.mrb[24].mxu1 %vm800_vm1, %v5052_v21 }
 0x62e   : > { %3689 = vmatprep.mubr.msk.bf16.mxu1 %vm4453_vm0, %v4452_v0 }
 0x6f8   : > { %v1493_v8 = vpop.f32.mrb[20].mxu1 }
 0x6f9   : > { %v1494_v9 = vadd.f32 %v3412_v7, %v1493_v8  ;;  %v3661_v10 = vpop.f32.mrb[21].mxu1 }
 0x6fa   : > { %v1496_v11 = vpop.f32.mrb[22].mxu1  ;;  %v3428_v10 = vld [vmem:[%s5474_s7 + $0x1] ss:$0 sm:$0xff] }
 0x6fb   : > { %v1499_v12 = vadd.f32 %v1494_v9, %v4950_v4  ;;  %v3662_v13 = vpop.f32.mrb[23].mxu1  ;;  %v3990_v4 = vld [vmem:[#allocation12 + $0x10] sm:$0xff]  }
 0x6fc   : > { %3664 = vmatpush3.bf16.msra.mxu0 %v3990_v4 }
 0x6fd   : > { %v1500_v14 = vsel %vm800_vm1, %v1499_v12, 0.0  ;;  %v1505_v15 = vmul.f32 %v1499_v12, %v1499_v12  ;;  %3665 = vmatprep.subr.bf16.mxu0 %v4452_v0 }
 0x6fe   : > { %1501 = vadd.xlane.f32.xlu0 %v1500_v14 }
 0x6ff   : > { %v1506_v16 = vsel %vm800_vm1, %v1505_v15, 0.0 }
 0x700   : > { %1507 = vadd.xlane.f32.xlu1 %v1506_v16  ;;  %3666 = vmatpush3.bf16.msra.mxu0 %v3991_v22  ;;  %v1663_v39 = vpop.f32.mrb[24].mxu1 }
 0x701   : > { %3679 = vmatprep.subr.bf16.mxu0 %v4452_v0  ;;  %v1664_v40 = vadd.f32 %v3423_v38, %v1663_v39  ;;  %v3677_v41 = vpop.f32.mrb[25].mxu1 }
 0x702   : > { %v1666_v42 = vpop.f32.mrb[26].mxu1 }
 0x703   : > { %v1667_v43 = vadd.f32 %v3423_v38, %v1666_v42  ;;  %v3678_v44 = vpop.f32.mrb[27].mxu1 }
 0x705   : > { %v1737_v45 = vpack.c.bf16 %v1667_v43, %v1664_v40 }
 0x707   : > { %v1743_v46 = vsel %vm973_vm2, %v1737_v45, 0 }
 0x708   : > { %3688 = vmatpush3.bf16.xpose.msra.mxu1 %v1743_v46 }
 0x709   : > { %3699 = vmatprep.subr.bf16.mxu1 %v4452_v0 }
 0x714   : > { %1846 = vrot.lane.b32.xlu0 %v1737_v45, %s4455_s11 }
 0x718   : > { %1960 = vrot.lane.b32.xlu0 %v1737_v45, %s4454_s14 }
 0x71c   : > { %2073 = vrot.lane.b32.xlu0 %v1737_v45, %s4456_s3 }
 0x78b   : > { %v1502_v23 = vpop.xlane.xlu0 %1501 }
 0x78c   : > { %v1504_v24 = vmul.f32 0.03125, %v1502_v23 }
 0x78d   : > { %v1508_v25 = vpop.xlane.xlu1 %1507 }
 0x78e   : > { %v1510_v26 = vmul.f32 %v1504_v24, %v1504_v24  ;;  %v1509_v27 = vmul.f32 0.03125, %v1508_v25  ;;  %v1512_v30 = vsub.f32 %v1499_v12, %v1504_v24 }
 0x78f   : > { %v1847_v52 = vpop.permute.xlu0 %1846 }
 0x790   : > { %v1511_v28 = vsub.f32 %v1509_v27, %v1510_v26  ;;  %v1852_v55 = vsel %vm973_vm2, %v1847_v52, 0 }
 0x792   : > { %v1513_v29 = vadd.f32 1e-05, %v1511_v28 }
 0x793   : > { %v1961_v58 = vpop.permute.xlu0 %1960 }
 0x794   : > { %4024 = vrsqrt.f32 %v1513_v29  ;;  %v1966_v60 = vsel %vm973_vm2, %v1961_v58, 0 }
 0x797   : > { %v2074_v61 = vpop.permute.xlu0 %2073 }
 0x798   : > { %v2079_v63 = vsel %vm973_vm2, %v2074_v61, 0 }
 0x79e   : > { %v4025_v31 = vpop.eup %4024 }
 0x79f   : > { %v1515_v33 = vmul.f32 %v4025_v31, %v1512_v30 }
 0x7a1   : > { %v1523_v35 = vmul.f32 %v3416_v32, %v1515_v33 }
 0x7a3   : > { %v5067_v36 = vadd.f32 %v3417_v34, %v1523_v35 }
 0x7a5   : > { %v5071_v37 = vpack.c.bf16 %v5067_v36, %v5067_v36 }
 0x7a7   : > { %3668 = vmatmul.mubr.msk.bf16.vlgmr.msra.gmra.mrb[24].mxu0 %vm800_vm1, %v5071_v37 }
 0x7a8   : > { %3683 = vmatprep.mubr.msk.bf16.mxu0 %vm4453_vm0, %v4452_v0  ;;  %3680 = vmatpush3.bf16.msra.mxu0 %v3992_v56 }
 0x7a9   : > { %3681 = vmatprep.subr.bf16.mxu0 %v4452_v0 }
 0x7ac   : > { %3682 = vmatpush3.bf16.msra.mxu0 %v3993_v57 }
 0x7ad   : > { %3693 = vmatprep.subr.bf16.mxu0 %v4452_v0 }
 0x7af   : > { %3684 = vmatmul.mubr.msk.bf16.vlgmr.msra.gmra.mrb[28].mxu0 %vm800_vm1, %v5052_v21 }
 0x7b0   : > { %3695 = vmatprep.mubr.msk.bf16.mxu0 %vm4453_vm0, %v4452_v0 }
 0x87a   : > { %v1595_v48 = vpop.f32.mrb[24].mxu0 }
 0x87b   : > { %v1596_v49 = vadd.f32 %v3418_v47, %v1595_v48  ;;  %v3669_v50 = vpop.f32.mrb[25].mxu0 }
 0x87c   : > { %v1598_v51 = vpop.f32.mrb[26].mxu0 }
 0x87d   : > { %v1736_v53 = vpack.c.bf16 %v1596_v49, %v1596_v49  ;;  %v3670_v54 = vpop.f32.mrb[27].mxu0 }
 0x87f   : > { %1843 = vrot.lane.b32.xlu1 %v1736_v53, %s4455_s11  ;;  %3690 = vmatmul.mubr.msk.bf16.vlgmr.msra.gmra.mrb[28].mxu1 %vm973_vm2, %v1736_v53 }
 0x880   : > { %3700 = vmatpush3.bf16.xpose.msra.mxu1 %v1852_v55  ;;  %3701 = vmatprep.mubr.msk.bf16.mxu1 %vm4453_vm0, %v4452_v0 }
 0x881   : > { %3711 = vmatprep.subr.bf16.mxu1 %v4452_v0 }
 0x882   : > { %v1729_v11 = vpop.f32.mrb[28].mxu0 }
 0x883   : > { %1958 = vrot.lane.b32.xlu1 %v1736_v53, %s4454_s14  ;;  %v1730_v12 = vadd.f32 %v3428_v10, %v1729_v11  ;;  %v3685_v13 = vpop.f32.mrb[29].mxu0 }
 0x884   : > { %v1732_v14 = vpop.f32.mrb[30].mxu0 }
 0x885   : > { %v1733_v15 = vadd.f32 %v3428_v10, %v1732_v14  ;;  %v3686_v16 = vpop.f32.mrb[31].mxu0  ;;  %v3994_v14 = vld [vmem:[#allocation12 + $0x20] sm:$0xff]  }
 0x886   : > { %v3995_v16 = vld [vmem:[#allocation12 + $0x28] sm:$0xff]  }
 0x887   : > { %2071 = vrot.lane.b32.xlu1 %v1736_v53, %s4456_s3  ;;  %v1738_v17 = vpack.c.bf16 %v1733_v15, %v1730_v12 }
 0x889   : > { %3694 = vmatpush3.bf16.msra.mxu0 %v1738_v17 }
 0x88a   : > { %3705 = vmatprep.subr.bf16.mxu0 %v4452_v0 }
 0x8f1   : > { %v1844_v59 = vpop.permute.xlu1 %1843 }
 0x8f2   : > { %3702 = vmatmul.mubr.msk.bf16.vlgmr.msra.gmra.mrb[32].mxu1 %vm973_vm2, %v1844_v59 }
 0x8f3   : > { %3712 = vmatpush3.bf16.xpose.msra.mxu1 %v1966_v60  ;;  %3713 = vmatprep.mubr.msk.bf16.mxu1 %vm4453_vm0, %v4452_v0 }
 0x8f4   : > { %3723 = vmatprep.subr.bf16.mxu1 %v4452_v0 }
 0x8f5   : > { %v1959_v62 = vpop.permute.xlu1 %1958 }
 0x8f9   : > { %v2072_v1 = vpop.permute.xlu1 %2071 }
 0x8fa   : > { %3714 = vmatmul.mubr.msk.bf16.vlgmr.msra.gmra.mrb[36].mxu1 %vm973_vm2, %v1959_v62 }
 0x8fb   : > { %3724 = vmatpush3.bf16.xpose.msra.mxu1 %v2079_v63  ;;  %3725 = vmatprep.mubr.msk.bf16.mxu1 %vm4453_vm0, %v4452_v0 }
 0x8fc   : > { %3735 = vmatprep.subr.bf16.mxu1 %v4452_v0 }
 0x902   : > { %3726 = vmatmul.mubr.msk.bf16.vlgmr.msra.gmra.mrb[40].mxu1 %vm973_vm2, %v2072_v1 }
 0x903   : > { %3739 = vmatprep.mubr.msk.bf16.mxu1 %vm4453_vm0, %v4452_v0 }
 0x952   : > { %v1779_v3 = vpop.f32.mrb[28].mxu1 }
 0x953   : > { %v1780_v5 = vadd.f32 %v1779_v3, %v5112_v2  ;;  %v3691_v6 = vpop.f32.mrb[29].mxu1 }
 0x954   : > { %v1782_v7 = vpop.f32.mrb[30].mxu1 }
 0x955   : > { %v3692_v8 = vpop.f32.mrb[31].mxu1  ;;  %v1786_v9 = vsel %vm1785_vm7, %v1780_v5, -inf }
 0x956   : > { %1787 = vmax.xlane.f32.xlu0 %v1786_v9 }
 0x9c5   : > { %v1888_v18 = vpop.f32.mrb[32].mxu1 }
 0x9c6   : > { %v1889_v19 = vadd.f32 %v1888_v18, %v5112_v2  ;;  %v3703_v20 = vpop.f32.mrb[33].mxu1 }
 0x9c7   : > { %v1891_v21 = vpop.f32.mrb[34].mxu1 }
 0x9c8   : > { %v3704_v4 = vpop.f32.mrb[35].mxu1  ;;  %v1894_v22 = vsel %vm1785_vm7, %v1889_v19, -inf }
 0x9c9   : > { %1895 = vmax.xlane.f32.xlu1 %v1894_v22 }
 0x9cd   : > { %v2002_v23 = vpop.f32.mrb[36].mxu1 }
 0x9ce   : > { %v2003_v24 = vadd.f32 %v2002_v23, %v5112_v2  ;;  %v3715_v25 = vpop.f32.mrb[37].mxu1 }
 0x9cf   : > { %v2005_v26 = vpop.f32.mrb[38].mxu1  ;;  %v3997_v25 = vld [vmem:[#allocation17 + $0x18] sm:$0xff]  }
 0x9d0   : > { %v3716_v27 = vpop.f32.mrb[39].mxu1  ;;  %v2008_v28 = vsel %vm1785_vm7, %v2003_v24, -inf }
 0x9d1   : > { %2009 = vmax.xlane.f32.xlu0 %v2008_v28 }
 0x9d5   : > { %v2115_v29 = vpop.f32.mrb[40].mxu1 }
 0x9d6   : > { %v2116_v30 = vadd.f32 %v2115_v29, %v5112_v2  ;;  %v3727_v31 = vpop.f32.mrb[41].mxu1 }
 0x9d7   : > { %v2118_v32 = vpop.f32.mrb[42].mxu1 }
 0x9d8   : > { %v3728_v33 = vpop.f32.mrb[43].mxu1  ;;  %v2121_v34 = vsel %vm1785_vm7, %v2116_v30, -inf }
 0x9d9   : > { %2122 = vmax.xlane.f32.xlu0 %v2121_v34  ;;  %v3449_v33 = vld [vmem:[#allocation18 + $0x2] ss:$0 sm:$0xff] }
 0x9e3   : > { %v1788_v35 = vpop.xlane.xlu0 %1787 }
 0x9e4   : > { %v1789_v38 = vsub.f32 %v1780_v5, %v1788_v35 }
 0x9e6   : > { %v1790_v39 = vmul.f32 1.442695, %v1789_v38 }
 0x9e8   : > { %4026 = vpow2.f32 %v1790_v39 }
 0x9f2   : > { %v4027_v40 = vpop.eup %4026 }
 0x9f3   : > { %v1792_v41 = vsel %vm1785_vm7, %v4027_v40, 0.0 }
 0x9f4   : > { %1793 = vadd.xlane.f32.xlu1 %v1792_v41 }
 0xa05   : > { %1907 = vrot.lane.b32.xlu1 %v1738_v17, %s4455_s11 }
 0xa56   : > { %v1896_v42 = vpop.xlane.xlu1 %1895 }
 0xa57   : > { %v1897_v43 = vsub.f32 %v1889_v19, %v1896_v42 }
 0xa59   : > { %v1898_v44 = vmul.f32 1.442695, %v1897_v43 }
 0xa5b   : > { %4028 = vpow2.f32 %v1898_v44 }
 0xa5e   : > { %v2010_v45 = vpop.xlane.xlu0 %2009 }
 0xa5f   : > { %v2011_v46 = vsub.f32 %v2003_v24, %v2010_v45  ;;  %v3996_v24 = vld [vmem:[#allocation17 + $0x10] sm:$0xff]  }
 0xa60   : > { %3736 = vmatpush3.bf16.msra.mxu1 %v3996_v24 }
 0xa61   : > { %v2012_v47 = vmul.f32 1.442695, %v2011_v46  ;;  %3737 = vmatprep.subr.bf16.mxu1 %v4452_v0  ;;  %v3998_v46 = vld [vmem:[#allocation14 + $0x20] sm:$0xff]  }
 0xa63   : > { %4030 = vpow2.f32 %v2012_v47 }
 0xa64   : > { %3738 = vmatpush3.bf16.msra.mxu1 %v3997_v25 }
 0xa65   : > { %v4029_v48 = vpop.eup %4028  ;;  %3751 = vmatprep.subr.bf16.mxu1 %v4452_v0 }
 0xa66   : > { %v2123_v49 = vpop.xlane.xlu0 %2122  ;;  %v1900_v50 = vsel %vm1785_vm7, %v4029_v48, 0.0 }
 0xa67   : > { %v2124_v51 = vsub.f32 %v2116_v30, %v2123_v49  ;;  %1901 = vadd.xlane.f32.xlu0 %v1900_v50  ;;  %v772_v49 = vld [vmem:[%s4925_s21] sm:$0xff]  ;;  %v773_v50 = vld [vmem:[%s4925_s21 + $0x8] sm:$0xff]  ;;  %s765_s21 = scalar_lea.vmem [#allocation20], %s3381_s19 }
 0xa68   : > { %s3182_s25 = sshll.u32 %s765_s21, 4  ;;  %s5307_s25 = int_to_ptr.vmem [resolvable:$true] %s3182_s25 }
 0xa69   : > { %v2125_v52 = vmul.f32 1.442695, %v2124_v51  ;;  %v774_v51 = vpack.c.bf16 %v773_v50, %v772_v49  ;;  %s4348_s19 = scalar_lea.vmem %s5307_s25, 128  ;;  %p4355_p6 = scmp.lt.s32.totalorder %s5307_s25, %s4353_s5 }
 0xa6a   : > { %p4349_p12 = scmp.ne.s32.totalorder %s5307_s25, %s4348_s19  ;;  %p4356_p3 = scmp.lt.s32.totalorder %s4354_s2, %s4348_s19 }
 0xa6b   : > { %4032 = vpow2.f32 %v2125_v52 }
 0xa6c   : > { %p4350_p0 = pnand %p4349_p12, %p5483_p9  ;;  %p4357_p13 = por %p4356_p3, %p4355_p6 }
 0xa6d   : > { %v4031_v53 = vpop.eup %4030 }
 0xa6e   : > { %v2014_v54 = vsel %vm1785_vm7, %v4031_v53, 0.0  ;;  %p4351_p2 = pneg %p4350_p0 }
 0xa6f   : > { %2015 = vadd.xlane.f32.xlu1 %v2014_v54 }
 0xa70   : > { %p4358_p7 = pnand %p4357_p13, %p4351_p2 }
 0xa75   : > { %v4033_v55 = vpop.eup %4032 }
 0xa76   : > { %v2127_v56 = vsel %vm1785_vm7, %v4033_v55, 0.0 }
 0xa77   : > { %2128 = vadd.xlane.f32.xlu0 %v2127_v56  ;;  %v3454_v56 = vld [vmem:[%s5473_s24 + $0x2] ss:$0 sm:$0xff] }
 0xa80   : > { %2133 = vrot.lane.b32.xlu1 %v1738_v17, %s4456_s3 }
 0xa81   : > { %v1794_v57 = vpop.xlane.xlu1 %1793 }
 0xa82   : > { %4034 = vrcp.f32 %v1794_v57 }
 0xa85   : > { %v1908_v61 = vpop.permute.xlu1 %1907 }
 0xa8c   : > { %v4035_v58 = vpop.eup %4034 }
 0xa8d   : > { %v1796_v59 = vmul.f32 %v4035_v58, %v4027_v40  ;;  %2020 = vrot.lane.b32.xlu0 %v1738_v17, %s4454_s14 }
 0xa8f   : > { %v1797_v60 = vpack.c.bf16 %v1796_v59, %v1796_v59 }
 0xa91   : > { %3696 = vmatmul.mubr.msk.bf16.vlgmr.msra.gmra.mrb[32].mxu0 %vm1785_vm7, %v1797_v60 }
 0xa92   : > { %3706 = vmatpush3.bf16.msra.mxu0 %v1908_v61  ;;  %3707 = vmatprep.mubr.msk.bf16.mxu0 %vm4453_vm0, %v4452_v0 }
 0xa93   : > { %3717 = vmatprep.subr.bf16.mxu0 %v4452_v0 }
 0xaf4   : > { %v1902_v62 = vpop.xlane.xlu0 %1901 }
 0xaf5   : > { %4036 = vrcp.f32 %v1902_v62 }
 0xafc   : > { %v2016_v63 = vpop.xlane.xlu1 %2015 }
 0xafd   : > { %4038 = vrcp.f32 %v2016_v63 }
 0xaff   : > { %v4037_v1 = vpop.eup %4036 }
 0xb00   : > { %v1904_v3 = vmul.f32 %v4037_v1, %v4029_v48  ;;  %v2134_v11 = vpop.permute.xlu1 %2133  ;;  %v3999_v48 = vld [vmem:[#allocation14 + $0x28] sm:$0xff]  }
 0xb02   : > { %v1905_v5 = vpack.c.bf16 %v1904_v3, %v1904_v3  ;;  %v4000_v3 = vld [vmem:[#allocation15 + $0x20] sm:$0xff]  }
 0xb04   : > { %v2129_v6 = vpop.xlane.xlu0 %2128  ;;  %3708 = vmatmul.mubr.msk.bf16.vlgmr.msra.gmra.mrb[36].mxu0 %vm1785_vm7, %v1905_v5  ;;  %v4001_v5 = vld [vmem:[#allocation15 + $0x28] sm:$0xff]  }
 0xb05   : > { %4040 = vrcp.f32 %v2129_v6  ;;  %3719 = vmatprep.mubr.msk.bf16.mxu0 %vm4453_vm0, %v4452_v0 }
 0xb07   : > { %v4039_v7 = vpop.eup %4038 }
 0xb08   : > { %v2018_v8 = vmul.f32 %v4039_v7, %v4031_v53  ;;  %v2021_v9 = vpop.permute.xlu0 %2020 }
 0xb09   : > { %3718 = vmatpush3.bf16.msra.mxu0 %v2021_v9 }
 0xb0a   : > { %v2019_v10 = vpack.c.bf16 %v2018_v8, %v2018_v8  ;;  %3729 = vmatprep.subr.bf16.mxu0 %v4452_v0 }
 0xb0c   : > { %3720 = vmatmul.mubr.msk.bf16.vlgmr.msra.gmra.mrb[40].mxu0 %vm1785_vm7, %v2019_v10 }
 0xb0d   : > { %3730 = vmatpush3.bf16.msra.mxu0 %v2134_v11  ;;  %3731 = vmatprep.mubr.msk.bf16.mxu0 %vm4453_vm0, %v4452_v0 }
 0xb0e   : > { %3743 = vmatprep.subr.bf16.mxu0 %v4452_v0 }
 0xb0f   : > { %v4041_v12 = vpop.eup %4040 }
 0xb10   : > { %v2131_v13 = vmul.f32 %v4041_v12, %v4033_v55 }
 0xb12   : > { %v2132_v15 = vpack.c.bf16 %v2131_v13, %v2131_v13 }
 0xb14   : > { %3732 = vmatmul.mubr.msk.bf16.vlgmr.msra.gmra.mrb[44].mxu0 %vm1785_vm7, %v2132_v15 }
 0xb15   : > { %3744 = vmatpush3.bf16.msra.mxu0 %v3994_v14  ;;  %3747 = vmatprep.mubr.msk.bf16.mxu0 %vm4453_vm0, %v4452_v0 }
 0xb16   : > { %3745 = vmatprep.subr.bf16.mxu0 %v4452_v0 }
 0xb19   : > { %3746 = vmatpush3.bf16.msra.mxu0 %v3995_v16 }
 0xb1a   : > { %3759 = vmatprep.subr.bf16.mxu0 %v4452_v0 }
 0xb1c   : > { %3748 = vmatmul.mubr.msk.bf16.vlgmr.msra.gmra.mrb[48].mxu0 %vm800_vm1, %v5071_v37 }
 0xb1d   : > { %3763 = vmatprep.mubr.msk.bf16.mxu0 %vm4453_vm0, %v4452_v0  ;;  %3760 = vmatpush3.bf16.msra.mxu0 %v4000_v3 }
 0xb1e   : > { %3761 = vmatprep.subr.bf16.mxu0 %v4452_v0 }
 0xb21   : > { %3762 = vmatpush3.bf16.msra.mxu0 %v4001_v5 }
 0xb22   : > { %3773 = vmatprep.subr.bf16.mxu0 %v4452_v0 }
 0xb24   : > { %3764 = vmatmul.mubr.msk.bf16.vlgmr.msra.gmra.mrb[52].mxu0 %vm800_vm1, %v774_v51 }
 0xb25   : > { %3775 = vmatprep.mubr.msk.bf16.mxu0 %vm4453_vm0, %v4452_v0 }
 0xb64   : > { %v1835_v17 = vpop.f32.mrb[32].mxu0 }
 0xb65   : > { %1841 = vst.msk [vmem:[#allocation2] sm:$0xff] %vm973_vm2, %v1835_v17  ;;  %v3697_v18 = vpop.f32.mrb[33].mxu0 }
 0xb66   : > { %v1838_v19 = vpop.f32.mrb[34].mxu0 }
 0xb67   : > { %v3698_v20 = vpop.f32.mrb[35].mxu0 }
 0xbd7   : > { %v1947_v21 = vpop.f32.mrb[36].mxu0 }
 0xbd8   : > { %1954 = vrot.lane.b32.xlu1 %v1947_v21, %s4457_s12  ;;  %v3709_v4 = vpop.f32.mrb[37].mxu0  ;;  %v3459_v21 = vld [vmem:[%s5474_s7 + $0x2] ss:$0 sm:$0xff] }
 0xbd9   : > { %v1950_v22 = vpop.f32.mrb[38].mxu0 }
 0xbda   : > { %v3710_v23 = vpop.f32.mrb[39].mxu0 }
 0xbdf   : > { %v2060_v37 = vpop.f32.mrb[40].mxu0 }
 0xbe0   : > { %2067 = vrot.lane.b32.xlu0 %v2060_v37, %s4458_s13  ;;  %v3721_v26 = vpop.f32.mrb[41].mxu0 }
 0xbe1   : > { %v2063_v27 = vpop.f32.mrb[42].mxu0 }
 0xbe2   : > { %v3722_v28 = vpop.f32.mrb[43].mxu0 }
 0xbe7   : > { %v2173_v29 = vpop.f32.mrb[44].mxu0 }
 0xbe8   : > { %2180 = vrot.lane.b32.xlu1 %v2173_v29, %s4459_s27  ;;  %v3733_v30 = vpop.f32.mrb[45].mxu0 }
 0xbe9   : > { %v2176_v31 = vpop.f32.mrb[46].mxu0 }
 0xbea   : > { %v3734_v32 = vpop.f32.mrb[47].mxu0 }
 0xbef   : > { %v2347_v34 = vpop.f32.mrb[48].mxu0 }
 0xbf0   : > { %v2348_v35 = vadd.f32 %v3449_v33, %v2347_v34  ;;  %v3749_v38 = vpop.f32.mrb[49].mxu0 }
 0xbf1   : > { %v2350_v39 = vpop.f32.mrb[50].mxu0 }
 0xbf2   : > { %v2488_v40 = vpack.c.bf16 %v2348_v35, %v2348_v35  ;;  %v3750_v41 = vpop.f32.mrb[51].mxu0 }
 0xbf4   : > { %2594 = vrot.lane.b32.xlu1 %v2488_v40, %s4455_s11 }
 0xbf7   : > { %v2481_v4 = vpop.f32.mrb[52].mxu0 }
 0xbf8   : > { %2709 = vrot.lane.b32.xlu1 %v2488_v40, %s4454_s14  ;;  %v2482_v22 = vadd.f32 %v3459_v21, %v2481_v4  ;;  %v3765_v23 = vpop.f32.mrb[53].mxu0 }
 0xbf9   : > { %v2484_v24 = vpop.f32.mrb[54].mxu0 }
 0xbfa   : > { %v2485_v25 = vadd.f32 %v3459_v21, %v2484_v24  ;;  %v3766_v37 = vpop.f32.mrb[55].mxu0 }
 0xbfc   : > { %2822 = vrot.lane.b32.xlu1 %v2488_v40, %s4456_s3  ;;  %v2490_v26 = vpack.c.bf16 %v2485_v25, %v2482_v22 }
 0xbfe   : > { %3774 = vmatpush3.bf16.msra.mxu0 %v2490_v26 }
 0xbff   : > { %3785 = vmatprep.subr.bf16.mxu0 %v4452_v0 }
 0xc4a   : > { %v1955_v42 = vpop.permute.xlu1 %1954 }
 0xc4b   : > { %1957 = vst.msk [vmem:[#allocation2] sm:$0xff] %vm1197_vm4, %v1955_v42 }
 0xc52   : > { %v2068_v43 = vpop.permute.xlu0 %2067 }
 0xc53   : > { %2070 = vst.msk [vmem:[#allocation2] sm:$0xff] %vm1313_vm5, %v2068_v43 }
 0xc5a   : > { %v2181_v44 = vpop.permute.xlu1 %2180 }
 0xc5b   : > { %2183 = vst.msk [vmem:[#allocation2] sm:$0xff] %vm1429_vm6, %v2181_v44 }
 0xc62   : > { %v2184_v45 = vld [vmem:[#allocation2] sm:$0xff] }
 0xc63   : > { %v2185_v47 = vpack.c.bf16 %v2184_v45, %v2184_v45 }
 0xc65   : > { %3740 = vmatmul.mubr.msk.bf16.vlgmr.msra.gmra.mrb[44].mxu1 %vm800_vm1, %v2185_v47 }
 0xc66   : > { %3752 = vmatpush3.bf16.msra.mxu1 %v3998_v46  ;;  %3755 = vmatprep.mubr.msk.bf16.mxu1 %vm4453_vm0, %v4452_v0  ;;  %v2595_v9 = vpop.permute.xlu1 %2594 }
 0xc67   : > { %3753 = vmatprep.subr.bf16.mxu1 %v4452_v0 }
 0xc6a   : > { %3754 = vmatpush3.bf16.msra.mxu1 %v3999_v48  ;;  %v2710_v12 = vpop.permute.xlu1 %2709 }
 0xc6b   : > { %3767 = vmatprep.subr.bf16.mxu1 %v4452_v0 }
 0xc6d   : > { %3756 = vmatmul.mubr.msk.bf16.vlgmr.msra.gmra.mrb[48].mxu1 %vm800_vm1, %v774_v51 }
 0xc6e   : > { %3769 = vmatprep.mubr.msk.bf16.mxu1 %vm4453_vm0, %v4452_v0  ;;  %v2823_v14 = vpop.permute.xlu1 %2822 }
 0xd38   : > { %v5176_v52 = vpop.f32.mrb[44].mxu1 }
 0xd39   : > { %v3741_v53 = vpop.f32.mrb[45].mxu1 }
 0xd3a   : > { %v2251_v54 = vpop.f32.mrb[46].mxu1 }
 0xd3b   : > { %v3742_v55 = vpop.f32.mrb[47].mxu1 }
 0xd40   : > { %v2415_v57 = vpop.f32.mrb[48].mxu1 }
 0xd41   : > { %v3757_v58 = vpop.f32.mrb[49].mxu1  ;;  %v2416_v60 = vadd.f32 %v3454_v56, %v2415_v57 }
 0xd42   : > { %v2418_v59 = vpop.f32.mrb[50].mxu1 }
 0xd43   : > { %v2419_v61 = vadd.f32 %v3454_v56, %v2418_v59  ;;  %v3758_v62 = vpop.f32.mrb[51].mxu1 }
 0xd45   : > { %v2489_v63 = vpack.c.bf16 %v2419_v61, %v2416_v60 }
 0xd47   : > { %2597 = vrot.lane.b32.xlu0 %v2489_v63, %s4455_s11  ;;  %v2495_v1 = vsel %vm973_vm2, %v2489_v63, 0 }
 0xd48   : > { %3768 = vmatpush3.bf16.xpose.msra.mxu1 %v2495_v1 }
 0xd49   : > { %3779 = vmatprep.subr.bf16.mxu1 %v4452_v0 }
 0xd4b   : > { %2711 = vrot.lane.b32.xlu0 %v2489_v63, %s4454_s14 }
 0xd4f   : > { %2824 = vrot.lane.b32.xlu0 %v2489_v63, %s4456_s3  ;;  %3770 = vmatmul.mubr.msk.bf16.vlgmr.msra.gmra.mrb[52].mxu1 %vm973_vm2, %v2488_v40 }
 0xd50   : > { %3781 = vmatprep.mubr.msk.bf16.mxu1 %vm4453_vm0, %v4452_v0 }
 0xdb9   : > { %v2598_v6 = vpop.permute.xlu0 %2597 }
 0xdba   : > { %v2603_v7 = vsel %vm973_vm2, %v2598_v6, 0 }
 0xdbb   : > { %3780 = vmatpush3.bf16.xpose.msra.mxu1 %v2603_v7 }
 0xdbc   : > { %3791 = vmatprep.subr.bf16.mxu1 %v4452_v0 }
 0xdbd   : > { %v2712_v8 = vpop.permute.xlu0 %2711 }
 0xdbe   : > { %v2717_v10 = vsel %vm973_vm2, %v2712_v8, 0 }
 0xdc1   : > { %v2825_v11 = vpop.permute.xlu0 %2824 }
 0xdc2   : > { %3782 = vmatmul.mubr.msk.bf16.vlgmr.msra.gmra.mrb[56].mxu1 %vm973_vm2, %v2595_v9  ;;  %v2830_v13 = vsel %vm973_vm2, %v2825_v11, 0 }
 0xdc3   : > { %3792 = vmatpush3.bf16.xpose.msra.mxu1 %v2717_v10  ;;  %3793 = vmatprep.mubr.msk.bf16.mxu1 %vm4453_vm0, %v4452_v0 }
 0xdc4   : > { %3803 = vmatprep.subr.bf16.mxu1 %v4452_v0 }
 0xdca   : > { %3794 = vmatmul.mubr.msk.bf16.vlgmr.msra.gmra.mrb[60].mxu1 %vm973_vm2, %v2710_v12 }
 0xdcb   : > { %3804 = vmatpush3.bf16.xpose.msra.mxu1 %v2830_v13  ;;  %3805 = vmatprep.mubr.msk.bf16.mxu1 %vm4453_vm0, %v4452_v0 }
 0xdcc   : > { %3815 = vmatprep.subr.bf16.mxu1 %v4452_v0 }
 0xdd2   : > { %3806 = vmatmul.mubr.msk.bf16.vlgmr.msra.gmra.mrb[64].mxu1 %vm973_vm2, %v2823_v14 }
 0xdd3   : > { %3819 = vmatprep.mubr.msk.bf16.mxu1 %vm4453_vm0, %v4452_v0 }
 0xe22   : > { %v2531_v15 = vpop.f32.mrb[52].mxu1 }
 0xe23   : > { %v2532_v16 = vadd.f32 %v2531_v15, %v5112_v2  ;;  %v3771_v17 = vpop.f32.mrb[53].mxu1 }
 0xe24   : > { %v2534_v18 = vpop.f32.mrb[54].mxu1 }
 0xe25   : > { %v3772_v19 = vpop.f32.mrb[55].mxu1  ;;  %v2537_v20 = vsel %vm1785_vm7, %v2532_v16, -inf }
 0xe26   : > { %2538 = vmax.xlane.f32.xlu0 %v2537_v20 }
 0xe95   : > { %v2639_v27 = vpop.f32.mrb[56].mxu1 }
 0xe96   : > { %v2640_v28 = vadd.f32 %v2639_v27, %v5112_v2  ;;  %v3783_v29 = vpop.f32.mrb[57].mxu1 }
 0xe97   : > { %v2642_v30 = vpop.f32.mrb[58].mxu1 }
 0xe98   : > { %v3784_v31 = vpop.f32.mrb[59].mxu1  ;;  %v2645_v32 = vsel %vm1785_vm7, %v2640_v28, -inf }
 0xe99   : > { %2646 = vmax.xlane.f32.xlu1 %v2645_v32  ;;  %v4002_v31 = vld [vmem:[#allocation17 + $0x20] sm:$0xff]   ;;  %v4003_v32 = vld [vmem:[#allocation17 + $0x28] sm:$0xff]  }
 0xe9a   : > { %3816 = vmatpush3.bf16.msra.mxu1 %v4002_v31 }
 0xe9b   : > { %3817 = vmatprep.subr.bf16.mxu1 %v4452_v0 }
 0xe9d   : > { %v2753_v33 = vpop.f32.mrb[60].mxu1 }
 0xe9e   : > { %v2754_v34 = vadd.f32 %v2753_v33, %v5112_v2  ;;  %v3795_v35 = vpop.f32.mrb[61].mxu1  ;;  %3818 = vmatpush3.bf16.msra.mxu1 %v4003_v32  ;;  %v3479_v32 = vld [vmem:[%s5477_s1 + $0x2] ss:$0 sm:$0xff] }
 0xe9f   : > { %v2756_v38 = vpop.f32.mrb[62].mxu1  ;;  %3831 = vmatprep.subr.bf16.mxu1 %v4452_v0 }
 0xea0   : > { %v3796_v39 = vpop.f32.mrb[63].mxu1  ;;  %v2759_v40 = vsel %vm1785_vm7, %v2754_v34, -inf }
 0xea1   : > { %2760 = vmax.xlane.f32.xlu0 %v2759_v40 }
 0xea5   : > { %v2866_v41 = vpop.f32.mrb[64].mxu1 }
 0xea6   : > { %v2867_v42 = vadd.f32 %v2866_v41, %v5112_v2  ;;  %v3807_v43 = vpop.f32.mrb[65].mxu1 }
 0xea7   : > { %v2869_v44 = vpop.f32.mrb[66].mxu1  ;;  %v3441_v43 = vld [vmem:[%s5475_s17 + $0x1] ss:$0 sm:$0xff] }
 0xea8   : > { %v3808_v45 = vpop.f32.mrb[67].mxu1  ;;  %v2872_v46 = vsel %vm1785_vm7, %v2867_v42, -inf  ;;  %v2249_v44 = vadd.f32 %v3441_v43, %v5176_v52 }
 0xea9   : > { %2873 = vmax.xlane.f32.xlu0 %v2872_v46 }
 0xeaa   : > { %v2254_v45 = vadd.f32 %v2249_v44, %v5067_v36 }
 0xeac   : > { %v2255_v46 = vsel %vm800_vm1, %v2254_v45, 0.0 }
 0xeb3   : > { %v2539_v47 = vpop.xlane.xlu0 %2538 }
 0xeb4   : > { %v2540_v48 = vsub.f32 %v2532_v16, %v2539_v47  ;;  %v2259_v47 = vmul.f32 %v2254_v45, %v2254_v45 }
 0xeb6   : > { %v2541_v49 = vmul.f32 1.442695, %v2540_v48  ;;  %v2260_v48 = vsel %vm800_vm1, %v2259_v47, 0.0 }
 0xeb8   : > { %4042 = vpow2.f32 %v2541_v49 }
 0xec2   : > { %v4043_v50 = vpop.eup %4042 }
 0xec3   : > { %v2543_v51 = vsel %vm1785_vm7, %v4043_v50, 0.0 }
 0xec4   : > { %2544 = vadd.xlane.f32.xlu1 %v2543_v51 }
 0xed5   : > { %2658 = vrot.lane.b32.xlu1 %v2490_v26, %s4455_s11 }
 0xf26   : > { %v2647_v53 = vpop.xlane.xlu1 %2646 }
 0xf27   : > { %v2648_v54 = vsub.f32 %v2640_v28, %v2647_v53 }
 0xf29   : > { %v2649_v55 = vmul.f32 1.442695, %v2648_v54 }
 0xf2b   : > { %4044 = vpow2.f32 %v2649_v55 }
 0xf2e   : > { %v2761_v2 = vpop.xlane.xlu0 %2760 }
 0xf2f   : > { %v2762_v56 = vsub.f32 %v2754_v34, %v2761_v2 }
 0xf31   : > { %v2763_v57 = vmul.f32 1.442695, %v2762_v56 }
 0xf33   : > { %4046 = vpow2.f32 %v2763_v57 }
 0xf35   : > { %v4045_v58 = vpop.eup %4044 }
 0xf36   : > { %v2874_v59 = vpop.xlane.xlu0 %2873  ;;  %v2651_v60 = vsel %vm1785_vm7, %v4045_v58, 0.0 }
 0xf37   : > { %v2875_v61 = vsub.f32 %v2867_v42, %v2874_v59  ;;  %2652 = vadd.xlane.f32.xlu0 %v2651_v60 }
 0xf39   : > { %v2876_v62 = vmul.f32 1.442695, %v2875_v61 }
 0xf3b   : > { %4048 = vpow2.f32 %v2876_v62 }
 0xf3d   : > { %v4047_v63 = vpop.eup %4046 }
 0xf3e   : > { %v2765_v1 = vsel %vm1785_vm7, %v4047_v63, 0.0 }
 0xf3f   : > { %2766 = vadd.xlane.f32.xlu1 %v2765_v1  ;;  %v3446_v1 = vld [vmem:[%s5476_s23 + $0x1] ss:$0 sm:$0xff] }
 0xf45   : > { %v4049_v3 = vpop.eup %4048 }
 0xf46   : > { %v2878_v5 = vsel %vm1785_vm7, %v4049_v3, 0.0 }
 0xf47   : > { %2879 = vadd.xlane.f32.xlu0 %v2878_v5  ;;  %v3448_v5 = vld [vmem:[%s5477_s1 + $0x1] ss:$0 sm:$0xff] }
 0xf50   : > { %2884 = vrot.lane.b32.xlu1 %v2490_v26, %s4456_s3 }
 0xf51   : > { %v2545_v6 = vpop.xlane.xlu1 %2544 }
 0xf52   : > { %4050 = vrcp.f32 %v2545_v6 }
 0xf55   : > { %v2659_v10 = vpop.permute.xlu1 %2658 }
 0xf5c   : > { %v4051_v7 = vpop.eup %4050 }
 0xf5d   : > { %v2547_v8 = vmul.f32 %v4051_v7, %v4043_v50  ;;  %2771 = vrot.lane.b32.xlu0 %v2490_v26, %s4454_s14  ;;  %s5479_s14 = sld [smem:[#allocation47_spill]] }
 0xf5f   : > { %v2548_v9 = vpack.c.bf16 %v2547_v8, %v2547_v8 }
 0xf61   : > { %3776 = vmatmul.mubr.msk.bf16.vlgmr.msra.gmra.mrb[56].mxu0 %vm1785_vm7, %v2548_v9  ;;  %v3472_v9 = vld [vmem:[%s5475_s17 + $0x2] ss:$0 sm:$0xff] }
 0xf62   : > { %3786 = vmatpush3.bf16.msra.mxu0 %v2659_v10  ;;  %3787 = vmatprep.mubr.msk.bf16.mxu0 %vm4453_vm0, %v4452_v0 }
 0xf63   : > { %3797 = vmatprep.subr.bf16.mxu0 %v4452_v0 }
 0xfc4   : > { %v2653_v11 = vpop.xlane.xlu0 %2652 }
 0xfc5   : > { %4052 = vrcp.f32 %v2653_v11 }
 0xfcc   : > { %v2767_v12 = vpop.xlane.xlu1 %2766 }
 0xfcd   : > { %4054 = vrcp.f32 %v2767_v12 }
 0xfcf   : > { %v4053_v13 = vpop.eup %4052 }
 0xfd0   : > { %v2655_v14 = vmul.f32 %v4053_v13, %v4045_v58  ;;  %v2885_v21 = vpop.permute.xlu1 %2884 }
 0xfd2   : > { %v2656_v15 = vpack.c.bf16 %v2655_v14, %v2655_v14 }
 0xfd4   : > { %v2880_v16 = vpop.xlane.xlu0 %2879  ;;  %3788 = vmatmul.mubr.msk.bf16.vlgmr.msra.gmra.mrb[60].mxu0 %vm1785_vm7, %v2656_v15 }
 0xfd5   : > { %4056 = vrcp.f32 %v2880_v16  ;;  %3799 = vmatprep.mubr.msk.bf16.mxu0 %vm4453_vm0, %v4452_v0 }
 0xfd7   : > { %v4055_v17 = vpop.eup %4054 }
 0xfd8   : > { %v2769_v18 = vmul.f32 %v4055_v17, %v4047_v63  ;;  %v2772_v19 = vpop.permute.xlu0 %2771 }
 0xfd9   : > { %3798 = vmatpush3.bf16.msra.mxu0 %v2772_v19  ;;  %v4006_v19 = vld [vmem:[%s5479_s14] sm:$0xff]  }
 0xfda   : > { %v2770_v20 = vpack.c.bf16 %v2769_v18, %v2769_v18  ;;  %3809 = vmatprep.subr.bf16.mxu0 %v4452_v0 }
 0xfdc   : > { %3800 = vmatmul.mubr.msk.bf16.vlgmr.msra.gmra.mrb[64].mxu0 %vm1785_vm7, %v2770_v20  ;;  %v4007_v20 = vld [vmem:[%s5479_s14 + $0x8] sm:$0xff]  }
 0xfdd   : > { %3810 = vmatpush3.bf16.msra.mxu0 %v2885_v21  ;;  %3811 = vmatprep.mubr.msk.bf16.mxu0 %vm4453_vm0, %v4452_v0 }
 0xfde   : > { %3823 = vmatprep.subr.bf16.mxu0 %v4452_v0 }
 0xfdf   : > { %v4057_v4 = vpop.eup %4056 }
 0xfe0   : > { %v2882_v22 = vmul.f32 %v4057_v4, %v4049_v3 }
 0xfe2   : > { %v2883_v23 = vpack.c.bf16 %v2882_v22, %v2882_v22 }
 0xfe4   : > { %3812 = vmatmul.mubr.msk.bf16.vlgmr.msra.gmra.mrb[68].mxu0 %vm1785_vm7, %v2883_v23 }
 0xfe5   : > { %3827 = vmatprep.mubr.msk.bf16.mxu0 %vm4453_vm0, %v4452_v0 }
0x1034   : > { %v2586_v24 = vpop.f32.mrb[56].mxu0 }
0x1035   : > { %2592 = vst.msk [vmem:[#allocation2] sm:$0xff] %vm973_vm2, %v2586_v24  ;;  %v3777_v25 = vpop.f32.mrb[57].mxu0 }
0x1036   : > { %v2589_v37 = vpop.f32.mrb[58].mxu0 }
0x1037   : > { %v3778_v26 = vpop.f32.mrb[59].mxu0 }
0x10a7   : > { %v2698_v27 = vpop.f32.mrb[60].mxu0 }
0x10a8   : > { %2705 = vrot.lane.b32.xlu1 %v2698_v27, %s4457_s12  ;;  %v3789_v28 = vpop.f32.mrb[61].mxu0  ;;  %s5482_s12 = sld [smem:[#allocation50_spill]] }
0x10a9   : > { %v2701_v29 = vpop.f32.mrb[62].mxu0 }
0x10aa   : > { %v3790_v30 = vpop.f32.mrb[63].mxu0 }
0x10af   : > { %v2811_v33 = vpop.f32.mrb[64].mxu0 }
0x10b0   : > { %2818 = vrot.lane.b32.xlu0 %v2811_v33, %s4458_s13  ;;  %v3801_v34 = vpop.f32.mrb[65].mxu0  ;;  %s5478_s13 = sld [smem:[#allocation48_spill]] }
0x10b1   : > { %v2814_v35 = vpop.f32.mrb[66].mxu0 }
0x10b2   : > { %v3802_v38 = vpop.f32.mrb[67].mxu0 }
0x10b6   : > { %v4004_v49 = vld [vmem:[%s5478_s13] sm:$0xff]   ;;  %v4005_v50 = vld [vmem:[%s5478_s13 + $0x8] sm:$0xff]  }
0x10b7   : > { %v2924_v39 = vpop.f32.mrb[68].mxu0  ;;  %3824 = vmatpush3.bf16.msra.mxu0 %v4004_v49 }
0x10b8   : > { %2931 = vrot.lane.b32.xlu1 %v2924_v39, %s4459_s27  ;;  %v3813_v40 = vpop.f32.mrb[69].mxu0  ;;  %3825 = vmatprep.subr.bf16.mxu0 %v4452_v0  ;;  %v3486_v39 = vld [vmem:[%s5480_s10] ss:$0 sm:$0xff]  ;;  %s5305_s27 = scalar_lea.hbm %s5482_s12, %s3488_s0 }
0x10b9   : > { %v2927_v41 = vpop.f32.mrb[70].mxu0 }
0x10ba   : > { %v3814_v42 = vpop.f32.mrb[71].mxu0 }
0x10bb   : > { %3826 = vmatpush3.bf16.msra.mxu0 %v4005_v50 }
0x10cf   : > { %2256 = vadd.xlane.f32.xlu0 %v2255_v46 }
0x10d3   : > { %2261 = vadd.xlane.f32.xlu0 %v2260_v48 }
0x111a   : > { %v2706_v52 = vpop.permute.xlu1 %2705 }
0x111b   : > { %2708 = vst.msk [vmem:[#allocation2] sm:$0xff] %vm1197_vm4, %v2706_v52 }
0x1122   : > { %v2819_v51 = vpop.permute.xlu0 %2818 }
0x1123   : > { %2821 = vst.msk [vmem:[#allocation2] sm:$0xff] %vm1313_vm5, %v2819_v51 }
0x112a   : > { %v2932_v53 = vpop.permute.xlu1 %2931 }
0x112b   : > { %2934 = vst.msk [vmem:[#allocation2] sm:$0xff] %vm1429_vm6, %v2932_v53 }
0x1132   : > { %v2935_v54 = vld [vmem:[#allocation2] sm:$0xff] }
0x1133   : > { %v2936_v55 = vpack.c.bf16 %v2935_v54, %v2935_v54 }
0x1135   : > { %3820 = vmatmul.mubr.msk.bf16.vlgmr.msra.gmra.mrb[68].mxu1 %vm800_vm1, %v2936_v55 }
0x1136   : > { %3835 = vmatprep.mubr.msk.bf16.mxu1 %vm4453_vm0, %v4452_v0  ;;  %3832 = vmatpush3.bf16.msra.mxu1 %v4006_v19 }
0x1137   : > { %3833 = vmatprep.subr.bf16.mxu1 %v4452_v0  ;;  %v3477_v0 = vld [vmem:[%s5476_s23 + $0x2] ss:$0 sm:$0xff] }
0x113a   : > { %3834 = vmatpush3.bf16.msra.mxu1 %v4007_v20 }
0x115c   : > { %v2257_v2 = vpop.xlane.xlu0 %2256 }
0x115d   : > { %v2258_v56 = vmul.f32 0.03125, %v2257_v2 }
0x115f   : > { %v2264_v58 = vmul.f32 %v2258_v56, %v2258_v56  ;;  %v2266_v62 = vsub.f32 %v2254_v45, %v2258_v56 }
0x1160   : > { %v2262_v57 = vpop.xlane.xlu0 %2261 }
0x1161   : > { %v2263_v59 = vmul.f32 0.03125, %v2262_v57 }
0x1163   : > { %v2265_v60 = vsub.f32 %v2263_v59, %v2264_v58 }
0x1165   : > { %v2267_v61 = vadd.f32 1e-05, %v2265_v60 }
0x1167   : > { %4058 = vrsqrt.f32 %v2267_v61 }
0x1171   : > { %v4059_v63 = vpop.eup %4058 }
0x1172   : > { %v2269_v3 = vmul.f32 %v4059_v63, %v2266_v62 }
0x1174   : > { %v2278_v6 = vmul.f32 %v3446_v1, %v2269_v3 }
0x1176   : > { %v2287_v7 = vadd.f32 %v3448_v5, %v2278_v6 }
0x1178   : > { %v3044_v8 = vpack.c.bf16 %v2287_v7, %v2287_v7 }
0x117a   : > { %3828 = vmatmul.mubr.msk.bf16.vlgmr.msra.gmra.mrb[72].mxu0 %vm800_vm1, %v3044_v8 }
0x1208   : > { %v2999_v10 = vpop.f32.mrb[68].mxu1 }
0x1209   : > { %v3000_v11 = vadd.f32 %v3472_v9, %v2999_v10  ;;  %v3821_v12 = vpop.f32.mrb[69].mxu1 }
0x120a   : > { %v3002_v13 = vpop.f32.mrb[70].mxu1 }
0x120b   : > { %v3005_v14 = vadd.f32 %v3000_v11, %v5067_v36  ;;  %v3822_v15 = vpop.f32.mrb[71].mxu1 }
0x120d   : > { %v3006_v16 = vsel %vm800_vm1, %v3005_v14, 0.0  ;;  %v3010_v17 = vmul.f32 %v3005_v14, %v3005_v14 }
0x120e   : > { %3007 = vadd.xlane.f32.xlu1 %v3006_v16 }
0x120f   : > { %v3011_v18 = vsel %vm800_vm1, %v3010_v17, 0.0 }
0x1210   : > { %3012 = vadd.xlane.f32.xlu0 %v3011_v18 }
0x124d   : > { %v3098_v36 = vpop.f32.mrb[72].mxu0 }
0x124e   : > { %v3829_v21 = vpop.f32.mrb[73].mxu0 }
0x124f   : > { %v3101_v4 = vpop.f32.mrb[74].mxu0 }
0x1250   : > { %v3830_v22 = vpop.f32.mrb[75].mxu0 }
0x129b   : > { %v3008_v23 = vpop.xlane.xlu1 %3007 }
0x129c   : > { %v3009_v24 = vmul.f32 0.03125, %v3008_v23 }
0x129d   : > { %v3013_v25 = vpop.xlane.xlu0 %3012 }
0x129e   : > { %v3015_v37 = vmul.f32 %v3009_v24, %v3009_v24  ;;  %v3014_v26 = vmul.f32 0.03125, %v3013_v25  ;;  %v3017_v29 = vsub.f32 %v3005_v14, %v3009_v24 }
0x12a0   : > { %v3016_v27 = vsub.f32 %v3014_v26, %v3015_v37 }
0x12a2   : > { %v3018_v28 = vadd.f32 1e-05, %v3016_v27 }
0x12a4   : > { %4060 = vrsqrt.f32 %v3018_v28 }
0x12ae   : > { %v4061_v30 = vpop.eup %4060 }
0x12af   : > { %v3020_v31 = vmul.f32 %v4061_v30, %v3017_v29 }
0x12b1   : > { %v3029_v33 = vmul.f32 %v3477_v0, %v3020_v31 }
0x12b3   : > { %v3038_v34 = vadd.f32 %v3479_v32, %v3029_v33 }
0x12b5   : > { %v3039_v35 = vpack.c.bf16 %v3038_v34, %v3038_v34 }
0x12b7   : > { %3836 = vmatmul.mubr.msk.bf16.vlgmr.msra.gmra.mrb[72].mxu1 %vm800_vm1, %v3039_v35 }
0x138a   : > { %v3153_v38 = vpop.f32.mrb[72].mxu1 }
0x138b   : > { %v3154_v40 = vadd.f32 %v3153_v38, %v3098_v36  ;;  %v3837_v41 = vpop.f32.mrb[73].mxu1 }
0x138c   : > { %v3156_v42 = vpop.f32.mrb[74].mxu1 }
0x138d   : > { %v3166_v43 = vadd.f32 %v3486_v39, %v3154_v40  ;;  %v3838_v44 = vpop.f32.mrb[75].mxu1 }
0x138f   : > { %3167 = vst.msk [vmem:[%s765_s21] sm:$0xff] %vm800_vm1, %v3166_v43 }
0x1390   : > { %4361 = shalt.err (!%p4358_p7)
}
0x1391   : > { %s4362_s15 = scalar_lea.hbm %s5305_s27, 128  ;;  %s4366_s0 = scalar_lea.hbm %s5482_s12, 256 }
0x1392   : > { %p4363_p1 = scmp.ne.s32.totalorder %s5305_s27, %s4362_s15  ;;  %p4367_p8 = scmp.lt.u32.totalorder %s5305_s27, %s5482_s12 }
0x1393   : > { %p4368_p4 = scmp.lt.u32.totalorder %s4366_s0, %s4362_s15  ;;  %p4370_p12 = scmp.lt.u32.totalorder %s4362_s15, %s5305_s27 }
0x1394   : > { %p4364_p10 = pnand %p4363_p1, %p5483_p9 }
0x1395   : > { %p4369_p5 = por %p4368_p4, %p4367_p8 }
0x1396   : > { %p4365_p11 = pneg %p4364_p10 }
0x1397   : > { %p4371_p0 = por %p4370_p12, %p4369_p5 }
0x1399   : > { %p4372_p2 = pnand %p4371_p0, %p4365_p11 }
0x139b   : > { %4375 = shalt.err (!%p4372_p2)
}
0x139c   : > { %3873 = dma.vmem_to_hbm [thread:$0]  (%p5483_p9), %s5307_s25, 128, %s5305_s27, %s3169_s29  }
0x139d PF: > { %s5484_s3 = sld [smem:[#allocation28_spill]]  ;;  %s5485_s19 = sld [smem:[#allocation35_spill]] }
0x139e   : > { %p5487_p3 = scmp.ge.s32.totalorder %s4434_s30, 2 }
0x13a3   : > { %s3194_s26 = sand.u32 1, %s5484_s3   ;;  %p5486_p6 = scmp.ne.s32.totalorder %s5485_s19, 0 }
0x13a4   : > { %s3195_s5 = scalar_lea.sflag [#allocation5], %s3194_s26 }
0x13a5   : > { %p3908_p13 = pnand %p5487_p3, %p5486_p6 }
0x13a7   : > { %4417 = dma.done.wait (!%p3908_p13), %s3195_s5, 128  }
0x13a8   : > { %4419 = vsyncadd (!%p3908_p13), %s3195_s5, 4294967168  ;;  %s5488_s30 = sld [smem:[#allocation31_spill]]  ;;  %s5489_s2 = sld [smem:[#allocation29_spill]] }
0x13a9   : > { %s5490_s29 = sld [smem:[#allocation32_spill]]  ;;  %s5491_s27 = smov %s4426_s28 }
0x13ae   : > { %p38_p7 = scmp.ge.s32.totalorder %s5488_s30, 4   ;;  %s5492_s28 = smov %s5489_s2 }
0x13b0   :  { %40 = sbr.rel (!%p38_p7) target bundleno = 27 (0x1b), region = 209 }
0x13b7   :  { %3200 = vsyncpa [#allocation4], 1 }
0x13b8   :  { %3202 = vsyncpa [#allocation4 + $0x1], 1 }
0x13b9   :  { %3203 = vsyncpa [#allocation7], 1 }
0x13ba   :  { %3205 = vsyncpa [#allocation7 + $0x1], 1 }
0x13bb   :  { %3206 = vsyncpa [#allocation10], 1 }
0x13bc   :  { %3207 = vsyncpa [#allocation13], 1 }
0x13bd   :  { %3208 = vsyncpa [#allocation16], 1 }
0x13be   :  { %3209 = vsyncpa [#allocation19], 1 }
0x13bf   :  { %3210 = vsyncpa [#allocation5], 1 }
0x13c0   :  { %3212 = vsyncpa [#allocation5 + $0x1], 1 }

</bundles_post_ra>
